<compile_context>
chip_gen: v6e
topology: v6e:2x2x1
jax: 0.10.0
libtpu: 0.0.40
codegen_flags: <defaults>
</compile_context>

<pallas_src>
import functools
import math

import jax
import jax.numpy as jnp
from jax import lax
from jax.experimental import pallas as pl
from jax.experimental.pallas import tpu as pltpu


# ---------------------------------------------------------------------------
# helpers
# ---------------------------------------------------------------------------
def _round_up(n, m):
    return ((n + m - 1) // m) * m


def _pad_gate_cols(w, H, Hp):
    """Re-pack [..., 4H] (gate order i,f,g,o) into [..., 4Hp] with gate k at offset k*Hp."""
    if Hp == H:
        return w
    pad_width = [(0, 0)] * (w.ndim - 1) + [(0, Hp - H)]
    parts = [jnp.pad(w[..., k * H:(k + 1) * H], pad_width) for k in range(4)]
    return jnp.concatenate(parts, axis=-1)


def _pad_rows(w, rows_to):
    if w.shape[0] == rows_to:
        return w
    return jnp.pad(w, ((0, rows_to - w.shape[0]), (0, 0)))


def make_positional_encoding(seq_len, d_model):
    """Replicates PositionalEncoding.pe[:seq_len, 0, :] (eval-mode dropout = identity)."""
    assert d_model % 2 == 0, "PositionalEncoding assumes an even d_model"
    pos = jnp.arange(seq_len, dtype=jnp.float32)[:, None]
    div = jnp.exp(jnp.arange(0, d_model, 2, dtype=jnp.float32)
                  * (-math.log(10000.0) / d_model))
    pe = jnp.zeros((seq_len, d_model), jnp.float32)
    pe = pe.at[:, 0::2].set(jnp.sin(pos * div))
    pe = pe.at[:, 1::2].set(jnp.cos(pos * div))
    return pe


def _pick_batch_tile(B):
    """Fill the MXU M dimension (128 rows) when the batch allows it.
    TODO(synk): on v7x prefer batch_tile <= Bp/2 when B < 256 so the 'parallel'
    grid axis has >= 2 steps and both TensorCores are used."""
    return min(128, _round_up(B, 8))


def _pick_time_chunk(S, batch_tile, G, in_bytes, target_bytes=4 << 20):
    """Largest time chunk (divisor of S; multiple of 8 unless == S) whose xg block
    stays under target_bytes.  Bounds VMEM independent of S."""
    per_step = batch_tile * G * in_bytes
    cap = max(1, target_bytes // per_step)
    if S <= cap:
        return S
    best = None
    for d in range(8, S, 8):
        if S % d == 0 and d <= cap:
            best = d
    # TODO(synk): if S has no multiple-of-8 divisor <= cap, fall back to the
    # fully time-resident layout (may exceed the VMEM budget for very large S).
    return best if best is not None else S


# ---------------------------------------------------------------------------
# Pallas kernel: the two serial LSTM recurrences, time-chunked
# ---------------------------------------------------------------------------
def lstm_recurrence_kernel(xg_ref, pg_ref, w_hh_e_ref, w_hh_d_ref, h_out_ref,
                           h_sc, c_sc, *, n_tchunks, unroll):
    """
    Grid = (batch_tiles [parallel], 2*n_tchunks [arbitrary]).
    Time-axis step t = pl.program_id(1): steps [0, n_tchunks) run encoder chunks,
    steps [n_tchunks, 2*n_tchunks) run decoder chunks.  (h, c) carried across
    chunks in VMEM scratch; at the encoder->decoder hand-off h is kept and the
    cell is reset to 0 (matches the PyTorch forward).

    xg_ref    : [Tc, Bt, 4Hp]  encoder gate pre-activations chunk (compute dtype)
    pg_ref    : [Tc, 4Hp]      decoder gate pre-activations chunk (shared over batch)
    w_hh_*    : [Hp, 4Hp]      recurrent weights (gate-padded, compute dtype)
    h_out_ref : [Tc, Bt, Hp]   decoder hidden states (f32), written on decoder chunks
    h_sc,c_sc : [Bt, Hp] f32   recurrent state carried across grid steps
    """
    Tc, Bt, G = xg_ref.shape
    Hp = G // 4
    t_idx = pl.program_id(1)
    cdt = w_hh_e_ref.dtype   # bf16 on the fast path; LHS cast per step, accum in f32

    def cell_update(gates, c):
        # Each gate slice is lane-aligned (Hp multiple of 128): whole-vreg EUP/VPU ops.
        i = jax.nn.sigmoid(gates[:, 0 * Hp:1 * Hp])
        f = jax.nn.sigmoid(gates[:, 1 * Hp:2 * Hp])
        g = jnp.tanh(gates[:, 2 * Hp:3 * Hp])
        o = jax.nn.sigmoid(gates[:, 3 * Hp:4 * Hp])
        c_new = f * c + i * g
        return o * jnp.tanh(c_new), c_new

    @pl.when(t_idx == 0)                      # fresh batch tile: zero the state
    def _():
        h_sc[...] = jnp.zeros_like(h_sc)
        c_sc[...] = jnp.zeros_like(c_sc)

    @pl.when(t_idx == n_tchunks)              # decoder start: h = enc hidden, c = 0
    def _():
        c_sc[...] = jnp.zeros_like(c_sc)

    @pl.when(t_idx < n_tchunks)               # ---- encoder LSTM chunk ----
    def _():
        # TODO(synk): W_hh is loop-invariant; explicit pltpu.matmul_push_rhs /
        # matmul_acc_lhs would make it MXU weight-stationary (Mosaic normally
        # hoists the RHS push out of the unrolled loop).
        w = w_hh_e_ref[...]

        def body(t, carry):
            h, c = carry
            gates = xg_ref[t] + jnp.dot(h.astype(cdt), w,
                                        preferred_element_type=jnp.float32)
            return cell_update(gates, c)

        h, c = lax.fori_loop(0, Tc, body, (h_sc[...], c_sc[...]), unroll=unroll)
        h_sc[...] = h
        c_sc[...] = c

    @pl.when(t_idx >= n_tchunks)              # ---- decoder LSTM chunk ----
    def _():
        w = w_hh_d_ref[...]

        def body(t, carry):
            h, c = carry
            # TODO(synk): a pl.ds(t, Bt, stride=0) sublane-broadcast load would fold
            # this [1, 4Hp] broadcast into the vld where the runtime supports stride=0.
            pg_t = pg_ref[pl.ds(t, 1), :]
            gates = pg_t + jnp.dot(h.astype(cdt), w,
                                   preferred_element_type=jnp.float32)
            h, c = cell_update(gates, c)
            h_out_ref[t] = h                  # lane-dense (Hp multiple of 128) store
            return (h, c)

        h, c = lax.fori_loop(0, Tc, body, (h_sc[...], c_sc[...]), unroll=unroll)
        h_sc[...] = h
        c_sc[...] = c


# ---------------------------------------------------------------------------
# wrapper
# ---------------------------------------------------------------------------
def positional_autoencoder(x, params, *, batch_tile=None, time_chunk=None,
                           compute_dtype=jnp.bfloat16):
    """x: [B, S, input_dim] (batch_first, like the PyTorch module). Returns [B, S, output_dim]."""
    B, S, _ = x.shape
    H = params["w_hh_enc_t"].shape[0]
    f32 = jnp.float32
    cdt = compute_dtype
    in_bytes = jnp.dtype(cdt).itemsize

    Hp = _round_up(H, 128)            # lane-aligned gates
    # TODO(synk): for H << 128 the per-gate padding wastes ~75% of MXU/EUP work; a
    # packed-gates (4H <= 128 lanes) + pltpu.roll variant would avoid it if small H
    # is the production shape.  On v6e/v7x with 128 < H <= 256, rounding Hp to 256
    # would fill the 256-wide MXU K dimension.
    G = 4 * Hp

    if batch_tile is None:
        batch_tile = _pick_batch_tile(B)
    assert batch_tile % 8 == 0
    Bp = _round_up(B, batch_tile)     # sublane-aligned, tile-aligned batch
    nb = Bp // batch_tile

    if time_chunk is None:
        time_chunk = _pick_time_chunk(S, batch_tile, G, in_bytes)
    assert S % time_chunk == 0, (S, time_chunk)
    Tc = time_chunk
    nT = S // Tc

    # time-major, batch-padded input
    x_sbd = jnp.transpose(x, (1, 0, 2)).astype(f32)                 # [S, B, Din]
    x_sbd = jnp.pad(x_sbd, ((0, 0), (0, Bp - B), (0, 0)))           # [S, Bp, Din]

    # gate-padded weights (gate k at column offset k*Hp; zero padding keeps math exact).
    # NOTE: when loading real PyTorch LSTM weights, the fused bias must be b_ih + b_hh.
    w_ih_e = _pad_gate_cols(params["w_ih_enc_t"].astype(f32), H, Hp)                  # [Din, G]
    b_e = _pad_gate_cols(params["b_enc"].astype(f32), H, Hp)                          # [1, G]
    w_hh_e = _pad_gate_cols(_pad_rows(params["w_hh_enc_t"].astype(f32), Hp), H, Hp)   # [Hp, G]
    w_ih_d = _pad_gate_cols(params["w_ih_dec_t"].astype(f32), H, Hp)                  # [H, G]
    b_d = _pad_gate_cols(params["b_dec"].astype(f32), H, Hp)                          # [1, G]
    w_hh_d = _pad_gate_cols(_pad_rows(params["w_hh_dec_t"].astype(f32), Hp), H, Hp)   # [Hp, G]
    w_hh_e = w_hh_e.astype(cdt)
    w_hh_d = w_hh_d.astype(cdt)

    # Hoisted encoder input projection (f32 accumulate, single rounding to compute dtype).
    xg = (jnp.einsum('sbd,dg->sbg', x_sbd, w_ih_e) + b_e).astype(cdt)   # [S, Bp, G]

    # Hoisted decoder input projection from the positional encoding; NOT broadcast
    # over batch in HBM (kernel broadcasts one [1,4Hp] row per step).
    # TODO(synk): nn.Dropout(p=0.01) on the positional encoding modeled in eval mode.
    pe = make_positional_encoding(S, H)                                 # [S, H]
    pg = (pe @ w_ih_d + b_d).astype(cdt)                                # [S, G]

    unroll = True if Tc <= 32 else 8
    kernel = functools.partial(lstm_recurrence_kernel, n_tchunks=nT, unroll=unroll)

    # rough VMEM requirement (double-buffered blocks + scratch); bounded by Tc, not S
    vmem_bytes = (2 * (Tc * batch_tile * G * in_bytes
                       + Tc * batch_tile * Hp * 4
                       + Tc * G * in_bytes
                       + 2 * Hp * G * in_bytes)
                  + 2 * batch_tile * Hp * 4)
    vmem_limit = int(min(max(2 * vmem_bytes, 32 * 1024 * 1024), 100 * 1024 * 1024))

    hseq = pl.pallas_call(
        kernel,
        out_shape=jax.ShapeDtypeStruct((S, Bp, Hp), f32),
        grid_spec=pltpu.PrefetchScalarGridSpec(
            num_scalar_prefetch=0,
            grid=(nb, 2 * nT),
            in_specs=[
                # xg: streamed per encoder time chunk; index clamped during decoder
                # chunks so the block index is unchanged -> no extra DMA.
                pl.BlockSpec((Tc, batch_tile, G),
                             lambda b, t: (jnp.minimum(t, nT - 1), b, 0)),
                # pg: small, streamed during decoder chunks (clamped to 0 before).
                pl.BlockSpec((Tc, G), lambda b, t: (jnp.maximum(t - nT, 0), 0)),
                # TODO(synk): pipeline_mode=pl.Buffered(1) on the constant-index
                # inputs below would drop their dead second pipeline buffer.
                pl.BlockSpec((Hp, G), lambda b, t: (0, 0)),              # w_hh_enc
                pl.BlockSpec((Hp, G), lambda b, t: (0, 0)),              # w_hh_dec
            ],
            out_specs=pl.BlockSpec((Tc, batch_tile, Hp),
                                   lambda b, t: (jnp.maximum(t - nT, 0), b, 0)),
            scratch_shapes=[pltpu.VMEM((batch_tile, Hp), f32),           # h carry
                            pltpu.VMEM((batch_tile, Hp), f32)],          # c carry
        ),
        compiler_params=pltpu.CompilerParams(
            dimension_semantics=("parallel", "arbitrary"),   # batch tiles // , time serial
            vmem_limit_bytes=vmem_limit,
        ),
    )(xg, pg, w_hh_e, w_hh_d)                                            # [S, Bp, Hp]

    # Final Linear hoisted out of the serial loop: one [S*B, H] x [H, Dout] matmul.
    h_real = hseq[:, :B, :H]                                             # [S, B, H]
    out = jnp.einsum('sbh,hd->sbd', h_real, params["w_fc_t"].astype(f32)) \
        + params["b_fc"].astype(f32)                                     # [S, B, Dout]
    return jnp.transpose(out, (1, 0, 2))                                 # [B, S, Dout]


# ---------------------------------------------------------------------------
# parameters + pure-JAX reference
# ---------------------------------------------------------------------------
def init_params(key, input_dim, hidden_dim, output_dim):
    """Deterministic synthetic parameters (PyTorch-style uniform init bounds).
    TODO(synk): num_layers > 1 not implemented (module default is 1)."""
    ks = jax.random.split(key, 8)
    k_lstm = 1.0 / math.sqrt(hidden_dim)
    k_fc = 1.0 / math.sqrt(hidden_dim)

    def u(k, shape, bound):
        return jax.random.uniform(k, shape, jnp.float32, -bound, bound)

    return {
        # encoder LSTM (stored transposed; bias = b_ih + b_hh folded into one vector)
        "w_ih_enc_t": u(ks[0], (input_dim, 4 * hidden_dim), k_lstm),
        "w_hh_enc_t": u(ks[1], (hidden_dim, 4 * hidden_dim), k_lstm),
        "b_enc":      u(ks[2], (1, 4 * hidden_dim), k_lstm),
        # decoder LSTM
        "w_ih_dec_t": u(ks[3], (hidden_dim, 4 * hidden_dim), k_lstm),
        "w_hh_dec_t": u(ks[4], (hidden_dim, 4 * hidden_dim), k_lstm),
        "b_dec":      u(ks[5], (1, 4 * hidden_dim), k_lstm),
        # fc
        "w_fc_t":     u(ks[6], (hidden_dim, output_dim), k_fc),
        "b_fc":       u(ks[7], (1, output_dim), k_fc),
    }


def reference(x, params):
    """Pure-JAX reference of the same forward pass (for correctness checks)."""
    B, S, _ = x.shape
    H = params["w_hh_enc_t"].shape[0]

    def cell(carry, x_t, wih, whh, b):
        h, c = carry
        g = x_t @ wih + h @ whh + b
        i = jax.nn.sigmoid(g[:, :H])
        f = jax.nn.sigmoid(g[:, H:2 * H])
        gg = jnp.tanh(g[:, 2 * H:3 * H])
        o = jax.nn.sigmoid(g[:, 3 * H:])
        c = f * c + i * gg
        h = o * jnp.tanh(c)
        return (h, c), h

    xs = jnp.transpose(x, (1, 0, 2)).astype(jnp.float32)
    h0 = jnp.zeros((B, H), jnp.float32)
    (h_enc, _), _ = lax.scan(
        lambda c, xt: cell(c, xt, params["w_ih_enc_t"], params["w_hh_enc_t"], params["b_enc"]),
        (h0, h0), xs)

    pe = make_positional_encoding(S, H)
    pe_sbh = jnp.broadcast_to(pe[:, None, :], (S, B, H))
    (_, _), hs = lax.scan(
        lambda c, pt: cell(c, pt, params["w_ih_dec_t"], params["w_hh_dec_t"], params["b_dec"]),
        (h_enc, jnp.zeros((B, H), jnp.float32)), pe_sbh)
    out = hs @ params["w_fc_t"] + params["b_fc"]                    # [S, B, Dout]
    return jnp.transpose(out, (1, 0, 2))


if __name__ == "__main__":
    B, S, Din, H, Dout = 2, 8, 16, 32, 8
    key = jax.random.PRNGKey(0)
    kx, kp = jax.random.split(key)
    x = jax.random.normal(kx, (B, S, Din), dtype=jnp.float32)
    params = init_params(kp, Din, H, Dout)

    ref = reference(x, params)

    # exact path (f32 compute): strict check against the pure-JAX reference
    out_f32 = jax.block_until_ready(
        positional_autoencoder(x, params, compute_dtype=jnp.float32))
    assert out_f32.shape == (B, S, Dout), out_f32.shape
    assert jnp.allclose(out_f32, ref, atol=1e-4, rtol=1e-4), \
        float(jnp.max(jnp.abs(out_f32 - ref)))

    # fast path (default bf16 weights/activations, f32 state & accumulation):
    # relaxed tolerance — bf16 rounding compounds over the recurrence.
    out_bf16 = jax.block_until_ready(positional_autoencoder(x, params))
    assert out_bf16.shape == (B, S, Dout), out_bf16.shape
    bf16_err = float(jnp.max(jnp.abs(out_bf16 - ref)))
    assert bf16_err < 5e-2, bf16_err

    print("KERNEL_OK")
</pallas_src>

<mosaic_0001>
module attributes {stable_mosaic.version = 11 : i64} {
  func.func @lstm_recurrence_kernel(%arg0: i32, %arg1: i32, %arg2: memref<8x8x512xf32, #tpu.memory_space<vmem>>, %arg3: memref<8x512xf32, #tpu.memory_space<vmem>>, %arg4: memref<128x512xf32, #tpu.memory_space<vmem>>, %arg5: memref<128x512xf32, #tpu.memory_space<vmem>>, %arg6: memref<8x8x128xf32, #tpu.memory_space<vmem>>, %arg7: memref<8x128xf32, #tpu.memory_space<vmem>>, %arg8: memref<8x128xf32, #tpu.memory_space<vmem>>) attributes {dimension_semantics = [#tpu.dimension_semantics<parallel>, #tpu.dimension_semantics<arbitrary>], iteration_bounds = array<i64: 1, 2>, scalar_prefetch = 0 : i64, scratch_operands = 2 : i64, tpu.core_type = #tpu.core_type<tc>, window_params = [{transform_indices = @transform_0, window_bounds = array<i64: 8, 8, 512>}, {transform_indices = @transform_1, window_bounds = array<i64: 8, 512>}, {pipeline_mode = #tpu.pipeline_mode<synchronous>, transform_indices = @transform_2, window_bounds = array<i64: 128, 512>}, {pipeline_mode = #tpu.pipeline_mode<synchronous>, transform_indices = @transform_3, window_bounds = array<i64: 128, 512>}, {transform_indices = @transform_4, window_bounds = array<i64: 8, 8, 128>}]} {
    %c0_i32 = arith.constant 0 : i32
    %0 = arith.cmpi eq, %arg1, %c0_i32 : i32
    %1 = arith.extui %0 : i1 to i32
    %c0_i32_0 = arith.constant 0 : i32
    %2 = arith.cmpi ne, %1, %c0_i32_0 : i32
    scf.if %2 {
      %cst = arith.constant 0.000000e+00 : f32
      %12 = vector.broadcast %cst : f32 to vector<8x128xf32>
      %c0 = arith.constant 0 : index
      %c0_6 = arith.constant 0 : index
      %13 = vector.load %arg7[%c0, %c0_6] : memref<8x128xf32, #tpu.memory_space<vmem>>, vector<8x128xf32>
      tpu.vector_store %arg7[%c0, %c0_6], %12 {strides = array<i32>} : memref<8x128xf32, #tpu.memory_space<vmem>>, vector<8x128xf32>,
      %cst_7 = arith.constant 0.000000e+00 : f32
      %14 = vector.broadcast %cst_7 : f32 to vector<8x128xf32>
      %c0_8 = arith.constant 0 : index
      %c0_9 = arith.constant 0 : index
      %15 = vector.load %arg8[%c0_8, %c0_9] : memref<8x128xf32, #tpu.memory_space<vmem>>, vector<8x128xf32>
      tpu.vector_store %arg8[%c0_8, %c0_9], %14 {strides = array<i32>} : memref<8x128xf32, #tpu.memory_space<vmem>>, vector<8x128xf32>,
    } else {
    }
    %c1_i32 = arith.constant 1 : i32
    %3 = arith.cmpi eq, %arg1, %c1_i32 : i32
    %4 = arith.extui %3 : i1 to i32
    %c0_i32_1 = arith.constant 0 : i32
    %5 = arith.cmpi ne, %4, %c0_i32_1 : i32
    scf.if %5 {
      %cst = arith.constant 0.000000e+00 : f32
      %12 = vector.broadcast %cst : f32 to vector<8x128xf32>
      %c0 = arith.constant 0 : index
      %c0_6 = arith.constant 0 : index
      %13 = vector.load %arg8[%c0, %c0_6] : memref<8x128xf32, #tpu.memory_space<vmem>>, vector<8x128xf32>
      tpu.vector_store %arg8[%c0, %c0_6], %12 {strides = array<i32>} : memref<8x128xf32, #tpu.memory_space<vmem>>, vector<8x128xf32>,
    } else {
    }
    %c1_i32_2 = arith.constant 1 : i32
    %6 = arith.cmpi slt, %arg1, %c1_i32_2 : i32
    %7 = arith.extui %6 : i1 to i32
    %c0_i32_3 = arith.constant 0 : i32
    %8 = arith.cmpi ne, %7, %c0_i32_3 : i32
    scf.if %8 {
      %c0 = arith.constant 0 : index
      %c0_6 = arith.constant 0 : index
      %12 = vector.load %arg4[%c0, %c0_6] : memref<128x512xf32, #tpu.memory_space<vmem>>, vector<128x512xf32>
      %c0_7 = arith.constant 0 : index
      %c0_8 = arith.constant 0 : index
      %13 = vector.load %arg7[%c0_7, %c0_8] : memref<8x128xf32, #tpu.memory_space<vmem>>, vector<8x128xf32>
      %c0_9 = arith.constant 0 : index
      %c0_10 = arith.constant 0 : index
      %14 = vector.load %arg8[%c0_9, %c0_10] : memref<8x128xf32, #tpu.memory_space<vmem>>, vector<8x128xf32>
      %c0_i32_11 = arith.constant 0 : i32
      %15 = arith.index_cast %c0_i32_11 : i32 to index
      %c0_12 = arith.constant 0 : index
      %c0_13 = arith.constant 0 : index
      %16 = vector.load %arg2[%15, %c0_12, %c0_13] : memref<8x8x512xf32, #tpu.memory_space<vmem>>, vector<1x8x512xf32>
      %17 = vector.shape_cast %16 : vector<1x8x512xf32> to vector<8x512xf32>
      %cst = arith.constant dense<0.000000e+00> : vector<8x512xf32>
      %18 = tpu.matmul %13, %12, %cst {dimension_numbers = #tpu.dot_dimension_numbers<[1], [0], [0], [1], [0, 0, 1, 1], [], []>} : vector<8x128xf32>, vector<128x512xf32>, vector<8x512xf32> -> vector<8x512xf32>
      %19 = arith.addf %17, %18 : vector<8x512xf32>
      %20 = vector.extract_strided_slice %19 {offsets = [0, 0], sizes = [8, 128], strides = [1, 1]} : vector<8x512xf32> to vector<8x128xf32>
      %21 = arith.negf %20 : vector<8x128xf32>
      %22 = math.exp %21 : vector<8x128xf32>
      %cst_14 = arith.constant 1.000000e+00 : f32
      %23 = vector.broadcast %cst_14 : f32 to vector<8x128xf32>
      %24 = arith.addf %23, %22 : vector<8x128xf32>
      %25 = arith.divf %23, %24 : vector<8x128xf32>
      %26 = vector.extract_strided_slice %19 {offsets = [0, 128], sizes = [8, 128], strides = [1, 1]} : vector<8x512xf32> to vector<8x128xf32>
      %27 = arith.negf %26 : vector<8x128xf32>
      %28 = math.exp %27 : vector<8x128xf32>
      %cst_15 = arith.constant 1.000000e+00 : f32
      %29 = vector.broadcast %cst_15 : f32 to vector<8x128xf32>
      %30 = arith.addf %29, %28 : vector<8x128xf32>
      %31 = arith.divf %29, %30 : vector<8x128xf32>
      %32 = vector.extract_strided_slice %19 {offsets = [0, 256], sizes = [8, 128], strides = [1, 1]} : vector<8x512xf32> to vector<8x128xf32>
      %33 = math.tanh %32 : vector<8x128xf32>
      %34 = vector.extract_strided_slice %19 {offsets = [0, 384], sizes = [8, 128], strides = [1, 1]} : vector<8x512xf32> to vector<8x128xf32>
      %35 = arith.negf %34 : vector<8x128xf32>
      %36 = math.exp %35 : vector<8x128xf32>
      %cst_16 = arith.constant 1.000000e+00 : f32
      %37 = vector.broadcast %cst_16 : f32 to vector<8x128xf32>
      %38 = arith.addf %37, %36 : vector<8x128xf32>
      %39 = arith.divf %37, %38 : vector<8x128xf32>
      %40 = arith.mulf %31, %14 : vector<8x128xf32>
      %41 = arith.mulf %25, %33 : vector<8x128xf32>
      %42 = arith.addf %40, %41 : vector<8x128xf32>
      %43 = math.tanh %42 : vector<8x128xf32>
      %44 = arith.mulf %39, %43 : vector<8x128xf32>
      %c1_i32_17 = arith.constant 1 : i32
      %45 = arith.index_cast %c1_i32_17 : i32 to index
      %c0_18 = arith.constant 0 : index
      %c0_19 = arith.constant 0 : index
      %46 = vector.load %arg2[%45, %c0_18, %c0_19] : memref<8x8x512xf32, #tpu.memory_space<vmem>>, vector<1x8x512xf32>
      %47 = vector.shape_cast %46 : vector<1x8x512xf32> to vector<8x512xf32>
      %cst_20 = arith.constant dense<0.000000e+00> : vector<8x512xf32>
      %48 = tpu.matmul %44, %12, %cst_20 {dimension_numbers = #tpu.dot_dimension_numbers<[1], [0], [0], [1], [0, 0, 1, 1], [], []>} : vector<8x128xf32>, vector<128x512xf32>, vector<8x512xf32> -> vector<8x512xf32>
      %49 = arith.addf %47, %48 : vector<8x512xf32>
      %50 = vector.extract_strided_slice %49 {offsets = [0, 0], sizes = [8, 128], strides = [1, 1]} : vector<8x512xf32> to vector<8x128xf32>
      %51 = arith.negf %50 : vector<8x128xf32>
      %52 = math.exp %51 : vector<8x128xf32>
      %cst_21 = arith.constant 1.000000e+00 : f32
      %53 = vector.broadcast %cst_21 : f32 to vector<8x128xf32>
      %54 = arith.addf %53, %52 : vector<8x128xf32>
      %55 = arith.divf %53, %54 : vector<8x128xf32>
      %56 = vector.extract_strided_slice %49 {offsets = [0, 128], sizes = [8, 128], strides = [1, 1]} : vector<8x512xf32> to vector<8x128xf32>
      %57 = arith.negf %56 : vector<8x128xf32>
      %58 = math.exp %57 : vector<8x128xf32>
      %cst_22 = arith.constant 1.000000e+00 : f32
      %59 = vector.broadcast %cst_22 : f32 to vector<8x128xf32>
      %60 = arith.addf %59, %58 : vector<8x128xf32>
      %61 = arith.divf %59, %60 : vector<8x128xf32>
      %62 = vector.extract_strided_slice %49 {offsets = [0, 256], sizes = [8, 128], strides = [1, 1]} : vector<8x512xf32> to vector<8x128xf32>
      %63 = math.tanh %62 : vector<8x128xf32>
      %64 = vector.extract_strided_slice %49 {offsets = [0, 384], sizes = [8, 128], strides = [1, 1]} : vector<8x512xf32> to vector<8x128xf32>
      %65 = arith.negf %64 : vector<8x128xf32>
      %66 = math.exp %65 : vector<8x128xf32>
      %cst_23 = arith.constant 1.000000e+00 : f32
      %67 = vector.broadcast %cst_23 : f32 to vector<8x128xf32>
      %68 = arith.addf %67, %66 : vector<8x128xf32>
      %69 = arith.divf %67, %68 : vector<8x128xf32>
      %70 = arith.mulf %61, %42 : vector<8x128xf32>
      %71 = arith.mulf %55, %63 : vector<8x128xf32>
      %72 = arith.addf %70, %71 : vector<8x128xf32>
      %73 = math.tanh %72 : vector<8x128xf32>
      %74 = arith.mulf %69, %73 : vector<8x128xf32>
      %c2_i32 = arith.constant 2 : i32
      %75 = arith.index_cast %c2_i32 : i32 to index
      %c0_24 = arith.constant 0 : index
      %c0_25 = arith.constant 0 : index
      %76 = vector.load %arg2[%75, %c0_24, %c0_25] : memref<8x8x512xf32, #tpu.memory_space<vmem>>, vector<1x8x512xf32>
      %77 = vector.shape_cast %76 : vector<1x8x512xf32> to vector<8x512xf32>
      %cst_26 = arith.constant dense<0.000000e+00> : vector<8x512xf32>
      %78 = tpu.matmul %74, %12, %cst_26 {dimension_numbers = #tpu.dot_dimension_numbers<[1], [0], [0], [1], [0, 0, 1, 1], [], []>} : vector<8x128xf32>, vector<128x512xf32>, vector<8x512xf32> -> vector<8x512xf32>
      %79 = arith.addf %77, %78 : vector<8x512xf32>
      %80 = vector.extract_strided_slice %79 {offsets = [0, 0], sizes = [8, 128], strides = [1, 1]} : vector<8x512xf32> to vector<8x128xf32>
      %81 = arith.negf %80 : vector<8x128xf32>
      %82 = math.exp %81 : vector<8x128xf32>
      %cst_27 = arith.constant 1.000000e+00 : f32
      %83 = vector.broadcast %cst_27 : f32 to vector<8x128xf32>
      %84 = arith.addf %83, %82 : vector<8x128xf32>
      %85 = arith.divf %83, %84 : vector<8x128xf32>
      %86 = vector.extract_strided_slice %79 {offsets = [0, 128], sizes = [8, 128], strides = [1, 1]} : vector<8x512xf32> to vector<8x128xf32>
      %87 = arith.negf %86 : vector<8x128xf32>
      %88 = math.exp %87 : vector<8x128xf32>
      %cst_28 = arith.constant 1.000000e+00 : f32
      %89 = vector.broadcast %cst_28 : f32 to vector<8x128xf32>
      %90 = arith.addf %89, %88 : vector<8x128xf32>
      %91 = arith.divf %89, %90 : vector<8x128xf32>
      %92 = vector.extract_strided_slice %79 {offsets = [0, 256], sizes = [8, 128], strides = [1, 1]} : vector<8x512xf32> to vector<8x128xf32>
      %93 = math.tanh %92 : vector<8x128xf32>
      %94 = vector.extract_strided_slice %79 {offsets = [0, 384], sizes = [8, 128], strides = [1, 1]} : vector<8x512xf32> to vector<8x128xf32>
      %95 = arith.negf %94 : vector<8x128xf32>
      %96 = math.exp %95 : vector<8x128xf32>
      %cst_29 = arith.constant 1.000000e+00 : f32
      %97 = vector.broadcast %cst_29 : f32 to vector<8x128xf32>
      %98 = arith.addf %97, %96 : vector<8x128xf32>
      %99 = arith.divf %97, %98 : vector<8x128xf32>
      %100 = arith.mulf %91, %72 : vector<8x128xf32>
      %101 = arith.mulf %85, %93 : vector<8x128xf32>
      %102 = arith.addf %100, %101 : vector<8x128xf32>
      %103 = math.tanh %102 : vector<8x128xf32>
      %104 = arith.mulf %99, %103 : vector<8x128xf32>
      %c3_i32 = arith.constant 3 : i32
      %105 = arith.index_cast %c3_i32 : i32 to index
      %c0_30 = arith.constant 0 : index
      %c0_31 = arith.constant 0 : index
      %106 = vector.load %arg2[%105, %c0_30, %c0_31] : memref<8x8x512xf32, #tpu.memory_space<vmem>>, vector<1x8x512xf32>
      %107 = vector.shape_cast %106 : vector<1x8x512xf32> to vector<8x512xf32>
      %cst_32 = arith.constant dense<0.000000e+00> : vector<8x512xf32>
      %108 = tpu.matmul %104, %12, %cst_32 {dimension_numbers = #tpu.dot_dimension_numbers<[1], [0], [0], [1], [0, 0, 1, 1], [], []>} : vector<8x128xf32>, vector<128x512xf32>, vector<8x512xf32> -> vector<8x512xf32>
      %109 = arith.addf %107, %108 : vector<8x512xf32>
      %110 = vector.extract_strided_slice %109 {offsets = [0, 0], sizes = [8, 128], strides = [1, 1]} : vector<8x512xf32> to vector<8x128xf32>
      %111 = arith.negf %110 : vector<8x128xf32>
      %112 = math.exp %111 : vector<8x128xf32>
      %cst_33 = arith.constant 1.000000e+00 : f32
      %113 = vector.broadcast %cst_33 : f32 to vector<8x128xf32>
      %114 = arith.addf %113, %112 : vector<8x128xf32>
      %115 = arith.divf %113, %114 : vector<8x128xf32>
      %116 = vector.extract_strided_slice %109 {offsets = [0, 128], sizes = [8, 128], strides = [1, 1]} : vector<8x512xf32> to vector<8x128xf32>
      %117 = arith.negf %116 : vector<8x128xf32>
      %118 = math.exp %117 : vector<8x128xf32>
      %cst_34 = arith.constant 1.000000e+00 : f32
      %119 = vector.broadcast %cst_34 : f32 to vector<8x128xf32>
      %120 = arith.addf %119, %118 : vector<8x128xf32>
      %121 = arith.divf %119, %120 : vector<8x128xf32>
      %122 = vector.extract_strided_slice %109 {offsets = [0, 256], sizes = [8, 128], strides = [1, 1]} : vector<8x512xf32> to vector<8x128xf32>
      %123 = math.tanh %122 : vector<8x128xf32>
      %124 = vector.extract_strided_slice %109 {offsets = [0, 384], sizes = [8, 128], strides = [1, 1]} : vector<8x512xf32> to vector<8x128xf32>
      %125 = arith.negf %124 : vector<8x128xf32>
      %126 = math.exp %125 : vector<8x128xf32>
      %cst_35 = arith.constant 1.000000e+00 : f32
      %127 = vector.broadcast %cst_35 : f32 to vector<8x128xf32>
      %128 = arith.addf %127, %126 : vector<8x128xf32>
      %129 = arith.divf %127, %128 : vector<8x128xf32>
      %130 = arith.mulf %121, %102 : vector<8x128xf32>
      %131 = arith.mulf %115, %123 : vector<8x128xf32>
      %132 = arith.addf %130, %131 : vector<8x128xf32>
      %133 = math.tanh %132 : vector<8x128xf32>
      %134 = arith.mulf %129, %133 : vector<8x128xf32>
      %c4_i32 = arith.constant 4 : i32
      %135 = arith.index_cast %c4_i32 : i32 to index
      %c0_36 = arith.constant 0 : index
      %c0_37 = arith.constant 0 : index
      %136 = vector.load %arg2[%135, %c0_36, %c0_37] : memref<8x8x512xf32, #tpu.memory_space<vmem>>, vector<1x8x512xf32>
      %137 = vector.shape_cast %136 : vector<1x8x512xf32> to vector<8x512xf32>
      %cst_38 = arith.constant dense<0.000000e+00> : vector<8x512xf32>
      %138 = tpu.matmul %134, %12, %cst_38 {dimension_numbers = #tpu.dot_dimension_numbers<[1], [0], [0], [1], [0, 0, 1, 1], [], []>} : vector<8x128xf32>, vector<128x512xf32>, vector<8x512xf32> -> vector<8x512xf32>
      %139 = arith.addf %137, %138 : vector<8x512xf32>
      %140 = vector.extract_strided_slice %139 {offsets = [0, 0], sizes = [8, 128], strides = [1, 1]} : vector<8x512xf32> to vector<8x128xf32>
      %141 = arith.negf %140 : vector<8x128xf32>
      %142 = math.exp %141 : vector<8x128xf32>
      %cst_39 = arith.constant 1.000000e+00 : f32
      %143 = vector.broadcast %cst_39 : f32 to vector<8x128xf32>
      %144 = arith.addf %143, %142 : vector<8x128xf32>
      %145 = arith.divf %143, %144 : vector<8x128xf32>
      %146 = vector.extract_strided_slice %139 {offsets = [0, 128], sizes = [8, 128], strides = [1, 1]} : vector<8x512xf32> to vector<8x128xf32>
      %147 = arith.negf %146 : vector<8x128xf32>
      %148 = math.exp %147 : vector<8x128xf32>
      %cst_40 = arith.constant 1.000000e+00 : f32
      %149 = vector.broadcast %cst_40 : f32 to vector<8x128xf32>
      %150 = arith.addf %149, %148 : vector<8x128xf32>
      %151 = arith.divf %149, %150 : vector<8x128xf32>
      %152 = vector.extract_strided_slice %139 {offsets = [0, 256], sizes = [8, 128], strides = [1, 1]} : vector<8x512xf32> to vector<8x128xf32>
      %153 = math.tanh %152 : vector<8x128xf32>
      %154 = vector.extract_strided_slice %139 {offsets = [0, 384], sizes = [8, 128], strides = [1, 1]} : vector<8x512xf32> to vector<8x128xf32>
      %155 = arith.negf %154 : vector<8x128xf32>
      %156 = math.exp %155 : vector<8x128xf32>
      %cst_41 = arith.constant 1.000000e+00 : f32
      %157 = vector.broadcast %cst_41 : f32 to vector<8x128xf32>
      %158 = arith.addf %157, %156 : vector<8x128xf32>
      %159 = arith.divf %157, %158 : vector<8x128xf32>
      %160 = arith.mulf %151, %132 : vector<8x128xf32>
      %161 = arith.mulf %145, %153 : vector<8x128xf32>
      %162 = arith.addf %160, %161 : vector<8x128xf32>
      %163 = math.tanh %162 : vector<8x128xf32>
      %164 = arith.mulf %159, %163 : vector<8x128xf32>
      %c5_i32 = arith.constant 5 : i32
      %165 = arith.index_cast %c5_i32 : i32 to index
      %c0_42 = arith.constant 0 : index
      %c0_43 = arith.constant 0 : index
      %166 = vector.load %arg2[%165, %c0_42, %c0_43] : memref<8x8x512xf32, #tpu.memory_space<vmem>>, vector<1x8x512xf32>
      %167 = vector.shape_cast %166 : vector<1x8x512xf32> to vector<8x512xf32>
      %cst_44 = arith.constant dense<0.000000e+00> : vector<8x512xf32>
      %168 = tpu.matmul %164, %12, %cst_44 {dimension_numbers = #tpu.dot_dimension_numbers<[1], [0], [0], [1], [0, 0, 1, 1], [], []>} : vector<8x128xf32>, vector<128x512xf32>, vector<8x512xf32> -> vector<8x512xf32>
      %169 = arith.addf %167, %168 : vector<8x512xf32>
      %170 = vector.extract_strided_slice %169 {offsets = [0, 0], sizes = [8, 128], strides = [1, 1]} : vector<8x512xf32> to vector<8x128xf32>
      %171 = arith.negf %170 : vector<8x128xf32>
      %172 = math.exp %171 : vector<8x128xf32>
      %cst_45 = arith.constant 1.000000e+00 : f32
      %173 = vector.broadcast %cst_45 : f32 to vector<8x128xf32>
      %174 = arith.addf %173, %172 : vector<8x128xf32>
      %175 = arith.divf %173, %174 : vector<8x128xf32>
      %176 = vector.extract_strided_slice %169 {offsets = [0, 128], sizes = [8, 128], strides = [1, 1]} : vector<8x512xf32> to vector<8x128xf32>
      %177 = arith.negf %176 : vector<8x128xf32>
      %178 = math.exp %177 : vector<8x128xf32>
      %cst_46 = arith.constant 1.000000e+00 : f32
      %179 = vector.broadcast %cst_46 : f32 to vector<8x128xf32>
      %180 = arith.addf %179, %178 : vector<8x128xf32>
      %181 = arith.divf %179, %180 : vector<8x128xf32>
      %182 = vector.extract_strided_slice %169 {offsets = [0, 256], sizes = [8, 128], strides = [1, 1]} : vector<8x512xf32> to vector<8x128xf32>
      %183 = math.tanh %182 : vector<8x128xf32>
      %184 = vector.extract_strided_slice %169 {offsets = [0, 384], sizes = [8, 128], strides = [1, 1]} : vector<8x512xf32> to vector<8x128xf32>
      %185 = arith.negf %184 : vector<8x128xf32>
      %186 = math.exp %185 : vector<8x128xf32>
      %cst_47 = arith.constant 1.000000e+00 : f32
      %187 = vector.broadcast %cst_47 : f32 to vector<8x128xf32>
      %188 = arith.addf %187, %186 : vector<8x128xf32>
      %189 = arith.divf %187, %188 : vector<8x128xf32>
      %190 = arith.mulf %181, %162 : vector<8x128xf32>
      %191 = arith.mulf %175, %183 : vector<8x128xf32>
      %192 = arith.addf %190, %191 : vector<8x128xf32>
      %193 = math.tanh %192 : vector<8x128xf32>
      %194 = arith.mulf %189, %193 : vector<8x128xf32>
      %c6_i32 = arith.constant 6 : i32
      %195 = arith.index_cast %c6_i32 : i32 to index
      %c0_48 = arith.constant 0 : index
      %c0_49 = arith.constant 0 : index
      %196 = vector.load %arg2[%195, %c0_48, %c0_49] : memref<8x8x512xf32, #tpu.memory_space<vmem>>, vector<1x8x512xf32>
      %197 = vector.shape_cast %196 : vector<1x8x512xf32> to vector<8x512xf32>
      %cst_50 = arith.constant dense<0.000000e+00> : vector<8x512xf32>
      %198 = tpu.matmul %194, %12, %cst_50 {dimension_numbers = #tpu.dot_dimension_numbers<[1], [0], [0], [1], [0, 0, 1, 1], [], []>} : vector<8x128xf32>, vector<128x512xf32>, vector<8x512xf32> -> vector<8x512xf32>
      %199 = arith.addf %197, %198 : vector<8x512xf32>
      %200 = vector.extract_strided_slice %199 {offsets = [0, 0], sizes = [8, 128], strides = [1, 1]} : vector<8x512xf32> to vector<8x128xf32>
      %201 = arith.negf %200 : vector<8x128xf32>
      %202 = math.exp %201 : vector<8x128xf32>
      %cst_51 = arith.constant 1.000000e+00 : f32
      %203 = vector.broadcast %cst_51 : f32 to vector<8x128xf32>
      %204 = arith.addf %203, %202 : vector<8x128xf32>
      %205 = arith.divf %203, %204 : vector<8x128xf32>
      %206 = vector.extract_strided_slice %199 {offsets = [0, 128], sizes = [8, 128], strides = [1, 1]} : vector<8x512xf32> to vector<8x128xf32>
      %207 = arith.negf %206 : vector<8x128xf32>
      %208 = math.exp %207 : vector<8x128xf32>
      %cst_52 = arith.constant 1.000000e+00 : f32
      %209 = vector.broadcast %cst_52 : f32 to vector<8x128xf32>
      %210 = arith.addf %209, %208 : vector<8x128xf32>
      %211 = arith.divf %209, %210 : vector<8x128xf32>
      %212 = vector.extract_strided_slice %199 {offsets = [0, 256], sizes = [8, 128], strides = [1, 1]} : vector<8x512xf32> to vector<8x128xf32>
      %213 = math.tanh %212 : vector<8x128xf32>
      %214 = vector.extract_strided_slice %199 {offsets = [0, 384], sizes = [8, 128], strides = [1, 1]} : vector<8x512xf32> to vector<8x128xf32>
      %215 = arith.negf %214 : vector<8x128xf32>
      %216 = math.exp %215 : vector<8x128xf32>
      %cst_53 = arith.constant 1.000000e+00 : f32
      %217 = vector.broadcast %cst_53 : f32 to vector<8x128xf32>
      %218 = arith.addf %217, %216 : vector<8x128xf32>
      %219 = arith.divf %217, %218 : vector<8x128xf32>
      %220 = arith.mulf %211, %192 : vector<8x128xf32>
      %221 = arith.mulf %205, %213 : vector<8x128xf32>
      %222 = arith.addf %220, %221 : vector<8x128xf32>
      %223 = math.tanh %222 : vector<8x128xf32>
      %224 = arith.mulf %219, %223 : vector<8x128xf32>
      %c7_i32 = arith.constant 7 : i32
      %225 = arith.index_cast %c7_i32 : i32 to index
      %c0_54 = arith.constant 0 : index
      %c0_55 = arith.constant 0 : index
      %226 = vector.load %arg2[%225, %c0_54, %c0_55] : memref<8x8x512xf32, #tpu.memory_space<vmem>>, vector<1x8x512xf32>
      %227 = vector.shape_cast %226 : vector<1x8x512xf32> to vector<8x512xf32>
      %cst_56 = arith.constant dense<0.000000e+00> : vector<8x512xf32>
      %228 = tpu.matmul %224, %12, %cst_56 {dimension_numbers = #tpu.dot_dimension_numbers<[1], [0], [0], [1], [0, 0, 1, 1], [], []>} : vector<8x128xf32>, vector<128x512xf32>, vector<8x512xf32> -> vector<8x512xf32>
      %229 = arith.addf %227, %228 : vector<8x512xf32>
      %230 = vector.extract_strided_slice %229 {offsets = [0, 0], sizes = [8, 128], strides = [1, 1]} : vector<8x512xf32> to vector<8x128xf32>
      %231 = arith.negf %230 : vector<8x128xf32>
      %232 = math.exp %231 : vector<8x128xf32>
      %cst_57 = arith.constant 1.000000e+00 : f32
      %233 = vector.broadcast %cst_57 : f32 to vector<8x128xf32>
      %234 = arith.addf %233, %232 : vector<8x128xf32>
      %235 = arith.divf %233, %234 : vector<8x128xf32>
      %236 = vector.extract_strided_slice %229 {offsets = [0, 128], sizes = [8, 128], strides = [1, 1]} : vector<8x512xf32> to vector<8x128xf32>
      %237 = arith.negf %236 : vector<8x128xf32>
      %238 = math.exp %237 : vector<8x128xf32>
      %cst_58 = arith.constant 1.000000e+00 : f32
      %239 = vector.broadcast %cst_58 : f32 to vector<8x128xf32>
      %240 = arith.addf %239, %238 : vector<8x128xf32>
      %241 = arith.divf %239, %240 : vector<8x128xf32>
      %242 = vector.extract_strided_slice %229 {offsets = [0, 256], sizes = [8, 128], strides = [1, 1]} : vector<8x512xf32> to vector<8x128xf32>
      %243 = math.tanh %242 : vector<8x128xf32>
      %244 = vector.extract_strided_slice %229 {offsets = [0, 384], sizes = [8, 128], strides = [1, 1]} : vector<8x512xf32> to vector<8x128xf32>
      %245 = arith.negf %244 : vector<8x128xf32>
      %246 = math.exp %245 : vector<8x128xf32>
      %cst_59 = arith.constant 1.000000e+00 : f32
      %247 = vector.broadcast %cst_59 : f32 to vector<8x128xf32>
      %248 = arith.addf %247, %246 : vector<8x128xf32>
      %249 = arith.divf %247, %248 : vector<8x128xf32>
      %250 = arith.mulf %241, %222 : vector<8x128xf32>
      %251 = arith.mulf %235, %243 : vector<8x128xf32>
      %252 = arith.addf %250, %251 : vector<8x128xf32>
      %253 = math.tanh %252 : vector<8x128xf32>
      %254 = arith.mulf %249, %253 : vector<8x128xf32>
      %c8_i32 = arith.constant 8 : i32
      %c0_60 = arith.constant 0 : index
      %c0_61 = arith.constant 0 : index
      %255 = vector.load %arg7[%c0_60, %c0_61] : memref<8x128xf32, #tpu.memory_space<vmem>>, vector<8x128xf32>
      tpu.vector_store %arg7[%c0_60, %c0_61], %254 {strides = array<i32>} : memref<8x128xf32, #tpu.memory_space<vmem>>, vector<8x128xf32>,
      %c0_62 = arith.constant 0 : index
      %c0_63 = arith.constant 0 : index
      %256 = vector.load %arg8[%c0_62, %c0_63] : memref<8x128xf32, #tpu.memory_space<vmem>>, vector<8x128xf32>
      tpu.vector_store %arg8[%c0_62, %c0_63], %252 {strides = array<i32>} : memref<8x128xf32, #tpu.memory_space<vmem>>, vector<8x128xf32>,
    } else {
    }
    %c1_i32_4 = arith.constant 1 : i32
    %9 = arith.cmpi sge, %arg1, %c1_i32_4 : i32
    %10 = arith.extui %9 : i1 to i32
    %c0_i32_5 = arith.constant 0 : i32
    %11 = arith.cmpi ne, %10, %c0_i32_5 : i32
    scf.if %11 {
      %c0 = arith.constant 0 : index
      %c0_6 = arith.constant 0 : index
      %12 = vector.load %arg5[%c0, %c0_6] : memref<128x512xf32, #tpu.memory_space<vmem>>, vector<128x512xf32>
      %c0_7 = arith.constant 0 : index
      %c0_8 = arith.constant 0 : index
      %13 = vector.load %arg7[%c0_7, %c0_8] : memref<8x128xf32, #tpu.memory_space<vmem>>, vector<8x128xf32>
      %c0_9 = arith.constant 0 : index
      %c0_10 = arith.constant 0 : index
      %14 = vector.load %arg8[%c0_9, %c0_10] : memref<8x128xf32, #tpu.memory_space<vmem>>, vector<8x128xf32>
      %c0_i32_11 = arith.constant 0 : i32
      %15 = arith.index_cast %c0_i32_11 : i32 to index
      %c0_12 = arith.constant 0 : index
      %16 = vector.load %arg3[%15, %c0_12] : memref<8x512xf32, #tpu.memory_space<vmem>>, vector<1x512xf32>
      %cst = arith.constant dense<0.000000e+00> : vector<8x512xf32>
      %17 = tpu.matmul %13, %12, %cst {dimension_numbers = #tpu.dot_dimension_numbers<[1], [0], [0], [1], [0, 0, 1, 1], [], []>} : vector<8x128xf32>, vector<128x512xf32>, vector<8x512xf32> -> vector<8x512xf32>
      %18 = vector.broadcast %16 : vector<1x512xf32> to vector<8x512xf32>
      %19 = arith.addf %18, %17 : vector<8x512xf32>
      %20 = vector.extract_strided_slice %19 {offsets = [0, 0], sizes = [8, 128], strides = [1, 1]} : vector<8x512xf32> to vector<8x128xf32>
      %21 = arith.negf %20 : vector<8x128xf32>
      %22 = math.exp %21 : vector<8x128xf32>
      %cst_13 = arith.constant 1.000000e+00 : f32
      %23 = vector.broadcast %cst_13 : f32 to vector<8x128xf32>
      %24 = arith.addf %23, %22 : vector<8x128xf32>
      %25 = arith.divf %23, %24 : vector<8x128xf32>
      %26 = vector.extract_strided_slice %19 {offsets = [0, 128], sizes = [8, 128], strides = [1, 1]} : vector<8x512xf32> to vector<8x128xf32>
      %27 = arith.negf %26 : vector<8x128xf32>
      %28 = math.exp %27 : vector<8x128xf32>
      %cst_14 = arith.constant 1.000000e+00 : f32
      %29 = vector.broadcast %cst_14 : f32 to vector<8x128xf32>
      %30 = arith.addf %29, %28 : vector<8x128xf32>
      %31 = arith.divf %29, %30 : vector<8x128xf32>
      %32 = vector.extract_strided_slice %19 {offsets = [0, 256], sizes = [8, 128], strides = [1, 1]} : vector<8x512xf32> to vector<8x128xf32>
      %33 = math.tanh %32 : vector<8x128xf32>
      %34 = vector.extract_strided_slice %19 {offsets = [0, 384], sizes = [8, 128], strides = [1, 1]} : vector<8x512xf32> to vector<8x128xf32>
      %35 = arith.negf %34 : vector<8x128xf32>
      %36 = math.exp %35 : vector<8x128xf32>
      %cst_15 = arith.constant 1.000000e+00 : f32
      %37 = vector.broadcast %cst_15 : f32 to vector<8x128xf32>
      %38 = arith.addf %37, %36 : vector<8x128xf32>
      %39 = arith.divf %37, %38 : vector<8x128xf32>
      %40 = arith.mulf %31, %14 : vector<8x128xf32>
      %41 = arith.mulf %25, %33 : vector<8x128xf32>
      %42 = arith.addf %40, %41 : vector<8x128xf32>
      %43 = math.tanh %42 : vector<8x128xf32>
      %44 = arith.mulf %39, %43 : vector<8x128xf32>
      %45 = arith.index_cast %c0_i32_11 : i32 to index
      %c0_16 = arith.constant 0 : index
      %c0_17 = arith.constant 0 : index
      %46 = vector.load %arg6[%45, %c0_16, %c0_17] : memref<8x8x128xf32, #tpu.memory_space<vmem>>, vector<1x8x128xf32>
      %47 = vector.shape_cast %46 : vector<1x8x128xf32> to vector<8x128xf32>
      %48 = vector.shape_cast %44 : vector<8x128xf32> to vector<1x8x128xf32>
      tpu.vector_store %arg6[%45, %c0_16, %c0_17], %48 {strides = array<i32>} : memref<8x8x128xf32, #tpu.memory_space<vmem>>, vector<1x8x128xf32>,
      %c1_i32_18 = arith.constant 1 : i32
      %49 = arith.index_cast %c1_i32_18 : i32 to index
      %c0_19 = arith.constant 0 : index
      %50 = vector.load %arg3[%49, %c0_19] : memref<8x512xf32, #tpu.memory_space<vmem>>, vector<1x512xf32>
      %cst_20 = arith.constant dense<0.000000e+00> : vector<8x512xf32>
      %51 = tpu.matmul %44, %12, %cst_20 {dimension_numbers = #tpu.dot_dimension_numbers<[1], [0], [0], [1], [0, 0, 1, 1], [], []>} : vector<8x128xf32>, vector<128x512xf32>, vector<8x512xf32> -> vector<8x512xf32>
      %52 = vector.broadcast %50 : vector<1x512xf32> to vector<8x512xf32>
      %53 = arith.addf %52, %51 : vector<8x512xf32>
      %54 = vector.extract_strided_slice %53 {offsets = [0, 0], sizes = [8, 128], strides = [1, 1]} : vector<8x512xf32> to vector<8x128xf32>
      %55 = arith.negf %54 : vector<8x128xf32>
      %56 = math.exp %55 : vector<8x128xf32>
      %cst_21 = arith.constant 1.000000e+00 : f32
      %57 = vector.broadcast %cst_21 : f32 to vector<8x128xf32>
      %58 = arith.addf %57, %56 : vector<8x128xf32>
      %59 = arith.divf %57, %58 : vector<8x128xf32>
      %60 = vector.extract_strided_slice %53 {offsets = [0, 128], sizes = [8, 128], strides = [1, 1]} : vector<8x512xf32> to vector<8x128xf32>
      %61 = arith.negf %60 : vector<8x128xf32>
      %62 = math.exp %61 : vector<8x128xf32>
      %cst_22 = arith.constant 1.000000e+00 : f32
      %63 = vector.broadcast %cst_22 : f32 to vector<8x128xf32>
      %64 = arith.addf %63, %62 : vector<8x128xf32>
      %65 = arith.divf %63, %64 : vector<8x128xf32>
      %66 = vector.extract_strided_slice %53 {offsets = [0, 256], sizes = [8, 128], strides = [1, 1]} : vector<8x512xf32> to vector<8x128xf32>
      %67 = math.tanh %66 : vector<8x128xf32>
      %68 = vector.extract_strided_slice %53 {offsets = [0, 384], sizes = [8, 128], strides = [1, 1]} : vector<8x512xf32> to vector<8x128xf32>
      %69 = arith.negf %68 : vector<8x128xf32>
      %70 = math.exp %69 : vector<8x128xf32>
      %cst_23 = arith.constant 1.000000e+00 : f32
      %71 = vector.broadcast %cst_23 : f32 to vector<8x128xf32>
      %72 = arith.addf %71, %70 : vector<8x128xf32>
      %73 = arith.divf %71, %72 : vector<8x128xf32>
      %74 = arith.mulf %65, %42 : vector<8x128xf32>
      %75 = arith.mulf %59, %67 : vector<8x128xf32>
      %76 = arith.addf %74, %75 : vector<8x128xf32>
      %77 = math.tanh %76 : vector<8x128xf32>
      %78 = arith.mulf %73, %77 : vector<8x128xf32>
      %79 = arith.index_cast %c1_i32_18 : i32 to index
      %c0_24 = arith.constant 0 : index
      %c0_25 = arith.constant 0 : index
      %80 = vector.load %arg6[%79, %c0_24, %c0_25] : memref<8x8x128xf32, #tpu.memory_space<vmem>>, vector<1x8x128xf32>
      %81 = vector.shape_cast %80 : vector<1x8x128xf32> to vector<8x128xf32>
      %82 = vector.shape_cast %78 : vector<8x128xf32> to vector<1x8x128xf32>
      tpu.vector_store %arg6[%79, %c0_24, %c0_25], %82 {strides = array<i32>} : memref<8x8x128xf32, #tpu.memory_space<vmem>>, vector<1x8x128xf32>,
      %c2_i32 = arith.constant 2 : i32
      %83 = arith.index_cast %c2_i32 : i32 to index
      %c0_26 = arith.constant 0 : index
      %84 = vector.load %arg3[%83, %c0_26] : memref<8x512xf32, #tpu.memory_space<vmem>>, vector<1x512xf32>
      %cst_27 = arith.constant dense<0.000000e+00> : vector<8x512xf32>
      %85 = tpu.matmul %78, %12, %cst_27 {dimension_numbers = #tpu.dot_dimension_numbers<[1], [0], [0], [1], [0, 0, 1, 1], [], []>} : vector<8x128xf32>, vector<128x512xf32>, vector<8x512xf32> -> vector<8x512xf32>
      %86 = vector.broadcast %84 : vector<1x512xf32> to vector<8x512xf32>
      %87 = arith.addf %86, %85 : vector<8x512xf32>
      %88 = vector.extract_strided_slice %87 {offsets = [0, 0], sizes = [8, 128], strides = [1, 1]} : vector<8x512xf32> to vector<8x128xf32>
      %89 = arith.negf %88 : vector<8x128xf32>
      %90 = math.exp %89 : vector<8x128xf32>
      %cst_28 = arith.constant 1.000000e+00 : f32
      %91 = vector.broadcast %cst_28 : f32 to vector<8x128xf32>
      %92 = arith.addf %91, %90 : vector<8x128xf32>
      %93 = arith.divf %91, %92 : vector<8x128xf32>
      %94 = vector.extract_strided_slice %87 {offsets = [0, 128], sizes = [8, 128], strides = [1, 1]} : vector<8x512xf32> to vector<8x128xf32>
      %95 = arith.negf %94 : vector<8x128xf32>
      %96 = math.exp %95 : vector<8x128xf32>
      %cst_29 = arith.constant 1.000000e+00 : f32
      %97 = vector.broadcast %cst_29 : f32 to vector<8x128xf32>
      %98 = arith.addf %97, %96 : vector<8x128xf32>
      %99 = arith.divf %97, %98 : vector<8x128xf32>
      %100 = vector.extract_strided_slice %87 {offsets = [0, 256], sizes = [8, 128], strides = [1, 1]} : vector<8x512xf32> to vector<8x128xf32>
      %101 = math.tanh %100 : vector<8x128xf32>
      %102 = vector.extract_strided_slice %87 {offsets = [0, 384], sizes = [8, 128], strides = [1, 1]} : vector<8x512xf32> to vector<8x128xf32>
      %103 = arith.negf %102 : vector<8x128xf32>
      %104 = math.exp %103 : vector<8x128xf32>
      %cst_30 = arith.constant 1.000000e+00 : f32
      %105 = vector.broadcast %cst_30 : f32 to vector<8x128xf32>
      %106 = arith.addf %105, %104 : vector<8x128xf32>
      %107 = arith.divf %105, %106 : vector<8x128xf32>
      %108 = arith.mulf %99, %76 : vector<8x128xf32>
      %109 = arith.mulf %93, %101 : vector<8x128xf32>
      %110 = arith.addf %108, %109 : vector<8x128xf32>
      %111 = math.tanh %110 : vector<8x128xf32>
      %112 = arith.mulf %107, %111 : vector<8x128xf32>
      %113 = arith.index_cast %c2_i32 : i32 to index
      %c0_31 = arith.constant 0 : index
      %c0_32 = arith.constant 0 : index
      %114 = vector.load %arg6[%113, %c0_31, %c0_32] : memref<8x8x128xf32, #tpu.memory_space<vmem>>, vector<1x8x128xf32>
      %115 = vector.shape_cast %114 : vector<1x8x128xf32> to vector<8x128xf32>
      %116 = vector.shape_cast %112 : vector<8x128xf32> to vector<1x8x128xf32>
      tpu.vector_store %arg6[%113, %c0_31, %c0_32], %116 {strides = array<i32>} : memref<8x8x128xf32, #tpu.memory_space<vmem>>, vector<1x8x128xf32>,
      %c3_i32 = arith.constant 3 : i32
      %117 = arith.index_cast %c3_i32 : i32 to index
      %c0_33 = arith.constant 0 : index
      %118 = vector.load %arg3[%117, %c0_33] : memref<8x512xf32, #tpu.memory_space<vmem>>, vector<1x512xf32>
      %cst_34 = arith.constant dense<0.000000e+00> : vector<8x512xf32>
      %119 = tpu.matmul %112, %12, %cst_34 {dimension_numbers = #tpu.dot_dimension_numbers<[1], [0], [0], [1], [0, 0, 1, 1], [], []>} : vector<8x128xf32>, vector<128x512xf32>, vector<8x512xf32> -> vector<8x512xf32>
      %120 = vector.broadcast %118 : vector<1x512xf32> to vector<8x512xf32>
      %121 = arith.addf %120, %119 : vector<8x512xf32>
      %122 = vector.extract_strided_slice %121 {offsets = [0, 0], sizes = [8, 128], strides = [1, 1]} : vector<8x512xf32> to vector<8x128xf32>
      %123 = arith.negf %122 : vector<8x128xf32>
      %124 = math.exp %123 : vector<8x128xf32>
      %cst_35 = arith.constant 1.000000e+00 : f32
      %125 = vector.broadcast %cst_35 : f32 to vector<8x128xf32>
      %126 = arith.addf %125, %124 : vector<8x128xf32>
      %127 = arith.divf %125, %126 : vector<8x128xf32>
      %128 = vector.extract_strided_slice %121 {offsets = [0, 128], sizes = [8, 128], strides = [1, 1]} : vector<8x512xf32> to vector<8x128xf32>
      %129 = arith.negf %128 : vector<8x128xf32>
      %130 = math.exp %129 : vector<8x128xf32>
      %cst_36 = arith.constant 1.000000e+00 : f32
      %131 = vector.broadcast %cst_36 : f32 to vector<8x128xf32>
      %132 = arith.addf %131, %130 : vector<8x128xf32>
      %133 = arith.divf %131, %132 : vector<8x128xf32>
      %134 = vector.extract_strided_slice %121 {offsets = [0, 256], sizes = [8, 128], strides = [1, 1]} : vector<8x512xf32> to vector<8x128xf32>
      %135 = math.tanh %134 : vector<8x128xf32>
      %136 = vector.extract_strided_slice %121 {offsets = [0, 384], sizes = [8, 128], strides = [1, 1]} : vector<8x512xf32> to vector<8x128xf32>
      %137 = arith.negf %136 : vector<8x128xf32>
      %138 = math.exp %137 : vector<8x128xf32>
      %cst_37 = arith.constant 1.000000e+00 : f32
      %139 = vector.broadcast %cst_37 : f32 to vector<8x128xf32>
      %140 = arith.addf %139, %138 : vector<8x128xf32>
      %141 = arith.divf %139, %140 : vector<8x128xf32>
      %142 = arith.mulf %133, %110 : vector<8x128xf32>
      %143 = arith.mulf %127, %135 : vector<8x128xf32>
      %144 = arith.addf %142, %143 : vector<8x128xf32>
      %145 = math.tanh %144 : vector<8x128xf32>
      %146 = arith.mulf %141, %145 : vector<8x128xf32>
      %147 = arith.index_cast %c3_i32 : i32 to index
      %c0_38 = arith.constant 0 : index
      %c0_39 = arith.constant 0 : index
      %148 = vector.load %arg6[%147, %c0_38, %c0_39] : memref<8x8x128xf32, #tpu.memory_space<vmem>>, vector<1x8x128xf32>
      %149 = vector.shape_cast %148 : vector<1x8x128xf32> to vector<8x128xf32>
      %150 = vector.shape_cast %146 : vector<8x128xf32> to vector<1x8x128xf32>
      tpu.vector_store %arg6[%147, %c0_38, %c0_39], %150 {strides = array<i32>} : memref<8x8x128xf32, #tpu.memory_space<vmem>>, vector<1x8x128xf32>,
      %c4_i32 = arith.constant 4 : i32
      %151 = arith.index_cast %c4_i32 : i32 to index
      %c0_40 = arith.constant 0 : index
      %152 = vector.load %arg3[%151, %c0_40] : memref<8x512xf32, #tpu.memory_space<vmem>>, vector<1x512xf32>
      %cst_41 = arith.constant dense<0.000000e+00> : vector<8x512xf32>
      %153 = tpu.matmul %146, %12, %cst_41 {dimension_numbers = #tpu.dot_dimension_numbers<[1], [0], [0], [1], [0, 0, 1, 1], [], []>} : vector<8x128xf32>, vector<128x512xf32>, vector<8x512xf32> -> vector<8x512xf32>
      %154 = vector.broadcast %152 : vector<1x512xf32> to vector<8x512xf32>
      %155 = arith.addf %154, %153 : vector<8x512xf32>
      %156 = vector.extract_strided_slice %155 {offsets = [0, 0], sizes = [8, 128], strides = [1, 1]} : vector<8x512xf32> to vector<8x128xf32>
      %157 = arith.negf %156 : vector<8x128xf32>
      %158 = math.exp %157 : vector<8x128xf32>
      %cst_42 = arith.constant 1.000000e+00 : f32
      %159 = vector.broadcast %cst_42 : f32 to vector<8x128xf32>
      %160 = arith.addf %159, %158 : vector<8x128xf32>
      %161 = arith.divf %159, %160 : vector<8x128xf32>
      %162 = vector.extract_strided_slice %155 {offsets = [0, 128], sizes = [8, 128], strides = [1, 1]} : vector<8x512xf32> to vector<8x128xf32>
      %163 = arith.negf %162 : vector<8x128xf32>
      %164 = math.exp %163 : vector<8x128xf32>
      %cst_43 = arith.constant 1.000000e+00 : f32
      %165 = vector.broadcast %cst_43 : f32 to vector<8x128xf32>
      %166 = arith.addf %165, %164 : vector<8x128xf32>
      %167 = arith.divf %165, %166 : vector<8x128xf32>
      %168 = vector.extract_strided_slice %155 {offsets = [0, 256], sizes = [8, 128], strides = [1, 1]} : vector<8x512xf32> to vector<8x128xf32>
      %169 = math.tanh %168 : vector<8x128xf32>
      %170 = vector.extract_strided_slice %155 {offsets = [0, 384], sizes = [8, 128], strides = [1, 1]} : vector<8x512xf32> to vector<8x128xf32>
      %171 = arith.negf %170 : vector<8x128xf32>
      %172 = math.exp %171 : vector<8x128xf32>
      %cst_44 = arith.constant 1.000000e+00 : f32
      %173 = vector.broadcast %cst_44 : f32 to vector<8x128xf32>
      %174 = arith.addf %173, %172 : vector<8x128xf32>
      %175 = arith.divf %173, %174 : vector<8x128xf32>
      %176 = arith.mulf %167, %144 : vector<8x128xf32>
      %177 = arith.mulf %161, %169 : vector<8x128xf32>
      %178 = arith.addf %176, %177 : vector<8x128xf32>
      %179 = math.tanh %178 : vector<8x128xf32>
      %180 = arith.mulf %175, %179 : vector<8x128xf32>
      %181 = arith.index_cast %c4_i32 : i32 to index
      %c0_45 = arith.constant 0 : index
      %c0_46 = arith.constant 0 : index
      %182 = vector.load %arg6[%181, %c0_45, %c0_46] : memref<8x8x128xf32, #tpu.memory_space<vmem>>, vector<1x8x128xf32>
      %183 = vector.shape_cast %182 : vector<1x8x128xf32> to vector<8x128xf32>
      %184 = vector.shape_cast %180 : vector<8x128xf32> to vector<1x8x128xf32>
      tpu.vector_store %arg6[%181, %c0_45, %c0_46], %184 {strides = array<i32>} : memref<8x8x128xf32, #tpu.memory_space<vmem>>, vector<1x8x128xf32>,
      %c5_i32 = arith.constant 5 : i32
      %185 = arith.index_cast %c5_i32 : i32 to index
      %c0_47 = arith.constant 0 : index
      %186 = vector.load %arg3[%185, %c0_47] : memref<8x512xf32, #tpu.memory_space<vmem>>, vector<1x512xf32>
      %cst_48 = arith.constant dense<0.000000e+00> : vector<8x512xf32>
      %187 = tpu.matmul %180, %12, %cst_48 {dimension_numbers = #tpu.dot_dimension_numbers<[1], [0], [0], [1], [0, 0, 1, 1], [], []>} : vector<8x128xf32>, vector<128x512xf32>, vector<8x512xf32> -> vector<8x512xf32>
      %188 = vector.broadcast %186 : vector<1x512xf32> to vector<8x512xf32>
      %189 = arith.addf %188, %187 : vector<8x512xf32>
      %190 = vector.extract_strided_slice %189 {offsets = [0, 0], sizes = [8, 128], strides = [1, 1]} : vector<8x512xf32> to vector<8x128xf32>
      %191 = arith.negf %190 : vector<8x128xf32>
      %192 = math.exp %191 : vector<8x128xf32>
      %cst_49 = arith.constant 1.000000e+00 : f32
      %193 = vector.broadcast %cst_49 : f32 to vector<8x128xf32>
      %194 = arith.addf %193, %192 : vector<8x128xf32>
      %195 = arith.divf %193, %194 : vector<8x128xf32>
      %196 = vector.extract_strided_slice %189 {offsets = [0, 128], sizes = [8, 128], strides = [1, 1]} : vector<8x512xf32> to vector<8x128xf32>
      %197 = arith.negf %196 : vector<8x128xf32>
      %198 = math.exp %197 : vector<8x128xf32>
      %cst_50 = arith.constant 1.000000e+00 : f32
      %199 = vector.broadcast %cst_50 : f32 to vector<8x128xf32>
      %200 = arith.addf %199, %198 : vector<8x128xf32>
      %201 = arith.divf %199, %200 : vector<8x128xf32>
      %202 = vector.extract_strided_slice %189 {offsets = [0, 256], sizes = [8, 128], strides = [1, 1]} : vector<8x512xf32> to vector<8x128xf32>
      %203 = math.tanh %202 : vector<8x128xf32>
      %204 = vector.extract_strided_slice %189 {offsets = [0, 384], sizes = [8, 128], strides = [1, 1]} : vector<8x512xf32> to vector<8x128xf32>
      %205 = arith.negf %204 : vector<8x128xf32>
      %206 = math.exp %205 : vector<8x128xf32>
      %cst_51 = arith.constant 1.000000e+00 : f32
      %207 = vector.broadcast %cst_51 : f32 to vector<8x128xf32>
      %208 = arith.addf %207, %206 : vector<8x128xf32>
      %209 = arith.divf %207, %208 : vector<8x128xf32>
      %210 = arith.mulf %201, %178 : vector<8x128xf32>
      %211 = arith.mulf %195, %203 : vector<8x128xf32>
      %212 = arith.addf %210, %211 : vector<8x128xf32>
      %213 = math.tanh %212 : vector<8x128xf32>
      %214 = arith.mulf %209, %213 : vector<8x128xf32>
      %215 = arith.index_cast %c5_i32 : i32 to index
      %c0_52 = arith.constant 0 : index
      %c0_53 = arith.constant 0 : index
      %216 = vector.load %arg6[%215, %c0_52, %c0_53] : memref<8x8x128xf32, #tpu.memory_space<vmem>>, vector<1x8x128xf32>
      %217 = vector.shape_cast %216 : vector<1x8x128xf32> to vector<8x128xf32>
      %218 = vector.shape_cast %214 : vector<8x128xf32> to vector<1x8x128xf32>
      tpu.vector_store %arg6[%215, %c0_52, %c0_53], %218 {strides = array<i32>} : memref<8x8x128xf32, #tpu.memory_space<vmem>>, vector<1x8x128xf32>,
      %c6_i32 = arith.constant 6 : i32
      %219 = arith.index_cast %c6_i32 : i32 to index
      %c0_54 = arith.constant 0 : index
      %220 = vector.load %arg3[%219, %c0_54] : memref<8x512xf32, #tpu.memory_space<vmem>>, vector<1x512xf32>
      %cst_55 = arith.constant dense<0.000000e+00> : vector<8x512xf32>
      %221 = tpu.matmul %214, %12, %cst_55 {dimension_numbers = #tpu.dot_dimension_numbers<[1], [0], [0], [1], [0, 0, 1, 1], [], []>} : vector<8x128xf32>, vector<128x512xf32>, vector<8x512xf32> -> vector<8x512xf32>
      %222 = vector.broadcast %220 : vector<1x512xf32> to vector<8x512xf32>
      %223 = arith.addf %222, %221 : vector<8x512xf32>
      %224 = vector.extract_strided_slice %223 {offsets = [0, 0], sizes = [8, 128], strides = [1, 1]} : vector<8x512xf32> to vector<8x128xf32>
      %225 = arith.negf %224 : vector<8x128xf32>
      %226 = math.exp %225 : vector<8x128xf32>
      %cst_56 = arith.constant 1.000000e+00 : f32
      %227 = vector.broadcast %cst_56 : f32 to vector<8x128xf32>
      %228 = arith.addf %227, %226 : vector<8x128xf32>
      %229 = arith.divf %227, %228 : vector<8x128xf32>
      %230 = vector.extract_strided_slice %223 {offsets = [0, 128], sizes = [8, 128], strides = [1, 1]} : vector<8x512xf32> to vector<8x128xf32>
      %231 = arith.negf %230 : vector<8x128xf32>
      %232 = math.exp %231 : vector<8x128xf32>
      %cst_57 = arith.constant 1.000000e+00 : f32
      %233 = vector.broadcast %cst_57 : f32 to vector<8x128xf32>
      %234 = arith.addf %233, %232 : vector<8x128xf32>
      %235 = arith.divf %233, %234 : vector<8x128xf32>
      %236 = vector.extract_strided_slice %223 {offsets = [0, 256], sizes = [8, 128], strides = [1, 1]} : vector<8x512xf32> to vector<8x128xf32>
      %237 = math.tanh %236 : vector<8x128xf32>
      %238 = vector.extract_strided_slice %223 {offsets = [0, 384], sizes = [8, 128], strides = [1, 1]} : vector<8x512xf32> to vector<8x128xf32>
      %239 = arith.negf %238 : vector<8x128xf32>
      %240 = math.exp %239 : vector<8x128xf32>
      %cst_58 = arith.constant 1.000000e+00 : f32
      %241 = vector.broadcast %cst_58 : f32 to vector<8x128xf32>
      %242 = arith.addf %241, %240 : vector<8x128xf32>
      %243 = arith.divf %241, %242 : vector<8x128xf32>
      %244 = arith.mulf %235, %212 : vector<8x128xf32>
      %245 = arith.mulf %229, %237 : vector<8x128xf32>
      %246 = arith.addf %244, %245 : vector<8x128xf32>
      %247 = math.tanh %246 : vector<8x128xf32>
      %248 = arith.mulf %243, %247 : vector<8x128xf32>
      %249 = arith.index_cast %c6_i32 : i32 to index
      %c0_59 = arith.constant 0 : index
      %c0_60 = arith.constant 0 : index
      %250 = vector.load %arg6[%249, %c0_59, %c0_60] : memref<8x8x128xf32, #tpu.memory_space<vmem>>, vector<1x8x128xf32>
      %251 = vector.shape_cast %250 : vector<1x8x128xf32> to vector<8x128xf32>
      %252 = vector.shape_cast %248 : vector<8x128xf32> to vector<1x8x128xf32>
      tpu.vector_store %arg6[%249, %c0_59, %c0_60], %252 {strides = array<i32>} : memref<8x8x128xf32, #tpu.memory_space<vmem>>, vector<1x8x128xf32>,
      %c7_i32 = arith.constant 7 : i32
      %253 = arith.index_cast %c7_i32 : i32 to index
      %c0_61 = arith.constant 0 : index
      %254 = vector.load %arg3[%253, %c0_61] : memref<8x512xf32, #tpu.memory_space<vmem>>, vector<1x512xf32>
      %cst_62 = arith.constant dense<0.000000e+00> : vector<8x512xf32>
      %255 = tpu.matmul %248, %12, %cst_62 {dimension_numbers = #tpu.dot_dimension_numbers<[1], [0], [0], [1], [0, 0, 1, 1], [], []>} : vector<8x128xf32>, vector<128x512xf32>, vector<8x512xf32> -> vector<8x512xf32>
      %256 = vector.broadcast %254 : vector<1x512xf32> to vector<8x512xf32>
      %257 = arith.addf %256, %255 : vector<8x512xf32>
      %258 = vector.extract_strided_slice %257 {offsets = [0, 0], sizes = [8, 128], strides = [1, 1]} : vector<8x512xf32> to vector<8x128xf32>
      %259 = arith.negf %258 : vector<8x128xf32>
      %260 = math.exp %259 : vector<8x128xf32>
      %cst_63 = arith.constant 1.000000e+00 : f32
      %261 = vector.broadcast %cst_63 : f32 to vector<8x128xf32>
      %262 = arith.addf %261, %260 : vector<8x128xf32>
      %263 = arith.divf %261, %262 : vector<8x128xf32>
      %264 = vector.extract_strided_slice %257 {offsets = [0, 128], sizes = [8, 128], strides = [1, 1]} : vector<8x512xf32> to vector<8x128xf32>
      %265 = arith.negf %264 : vector<8x128xf32>
      %266 = math.exp %265 : vector<8x128xf32>
      %cst_64 = arith.constant 1.000000e+00 : f32
      %267 = vector.broadcast %cst_64 : f32 to vector<8x128xf32>
      %268 = arith.addf %267, %266 : vector<8x128xf32>
      %269 = arith.divf %267, %268 : vector<8x128xf32>
      %270 = vector.extract_strided_slice %257 {offsets = [0, 256], sizes = [8, 128], strides = [1, 1]} : vector<8x512xf32> to vector<8x128xf32>
      %271 = math.tanh %270 : vector<8x128xf32>
      %272 = vector.extract_strided_slice %257 {offsets = [0, 384], sizes = [8, 128], strides = [1, 1]} : vector<8x512xf32> to vector<8x128xf32>
      %273 = arith.negf %272 : vector<8x128xf32>
      %274 = math.exp %273 : vector<8x128xf32>
      %cst_65 = arith.constant 1.000000e+00 : f32
      %275 = vector.broadcast %cst_65 : f32 to vector<8x128xf32>
      %276 = arith.addf %275, %274 : vector<8x128xf32>
      %277 = arith.divf %275, %276 : vector<8x128xf32>
      %278 = arith.mulf %269, %246 : vector<8x128xf32>
      %279 = arith.mulf %263, %271 : vector<8x128xf32>
      %280 = arith.addf %278, %279 : vector<8x128xf32>
      %281 = math.tanh %280 : vector<8x128xf32>
      %282 = arith.mulf %277, %281 : vector<8x128xf32>
      %283 = arith.index_cast %c7_i32 : i32 to index
      %c0_66 = arith.constant 0 : index
      %c0_67 = arith.constant 0 : index
      %284 = vector.load %arg6[%283, %c0_66, %c0_67] : memref<8x8x128xf32, #tpu.memory_space<vmem>>, vector<1x8x128xf32>
      %285 = vector.shape_cast %284 : vector<1x8x128xf32> to vector<8x128xf32>
      %286 = vector.shape_cast %282 : vector<8x128xf32> to vector<1x8x128xf32>
      tpu.vector_store %arg6[%283, %c0_66, %c0_67], %286 {strides = array<i32>} : memref<8x8x128xf32, #tpu.memory_space<vmem>>, vector<1x8x128xf32>,
      %c8_i32 = arith.constant 8 : i32
      %c0_68 = arith.constant 0 : index
      %c0_69 = arith.constant 0 : index
      %287 = vector.load %arg7[%c0_68, %c0_69] : memref<8x128xf32, #tpu.memory_space<vmem>>, vector<8x128xf32>
      tpu.vector_store %arg7[%c0_68, %c0_69], %282 {strides = array<i32>} : memref<8x128xf32, #tpu.memory_space<vmem>>, vector<8x128xf32>,
      %c0_70 = arith.constant 0 : index
      %c0_71 = arith.constant 0 : index
      %288 = vector.load %arg8[%c0_70, %c0_71] : memref<8x128xf32, #tpu.memory_space<vmem>>, vector<8x128xf32>
      tpu.vector_store %arg8[%c0_70, %c0_71], %280 {strides = array<i32>} : memref<8x128xf32, #tpu.memory_space<vmem>>, vector<8x128xf32>,
    } else {
    }
    return
  }
  func.func @transform_0(%arg0: i32, %arg1: i32) -> (i32, i32, i32) {
    %c0_i32 = arith.constant 0 : i32
    %0 = arith.minsi %arg1, %c0_i32 : i32
    %c0_i32_0 = arith.constant 0 : i32
    %c0_i32_1 = arith.constant 0 : i32
    return %0, %arg0, %c0_i32_0 : i32, i32, i32
  }
  func.func @transform_1(%arg0: i32, %arg1: i32) -> (i32, i32) {
    %c1_i32 = arith.constant 1 : i32
    %0 = arith.subi %arg1, %c1_i32 : i32
    %c0_i32 = arith.constant 0 : i32
    %1 = arith.maxsi %0, %c0_i32 : i32
    %c0_i32_0 = arith.constant 0 : i32
    %c0_i32_1 = arith.constant 0 : i32
    return %1, %c0_i32_0 : i32, i32
  }
  func.func @transform_2(%arg0: i32, %arg1: i32) -> (i32, i32) {
    %c0_i32 = arith.constant 0 : i32
    %c0_i32_0 = arith.constant 0 : i32
    %c0_i32_1 = arith.constant 0 : i32
    return %c0_i32, %c0_i32_0 : i32, i32
  }
  func.func @transform_3(%arg0: i32, %arg1: i32) -> (i32, i32) {
    %c0_i32 = arith.constant 0 : i32
    %c0_i32_0 = arith.constant 0 : i32
    %c0_i32_1 = arith.constant 0 : i32
    return %c0_i32, %c0_i32_0 : i32, i32
  }
  func.func @transform_4(%arg0: i32, %arg1: i32) -> (i32, i32, i32) {
    %c1_i32 = arith.constant 1 : i32
    %0 = arith.subi %arg1, %c1_i32 : i32
    %c0_i32 = arith.constant 0 : i32
    %1 = arith.maxsi %0, %c0_i32 : i32
    %c0_i32_0 = arith.constant 0 : i32
    %c0_i32_1 = arith.constant 0 : i32
    return %1, %arg0, %c0_i32_0 : i32, i32, i32
  }
}

</mosaic_0001>

<bundles_post_ra>
// kernel: tpu_custom_call.1
= control target key start
LH: loop header
LB: loop body
LE: loop exit
PB: predicated region body
PF: predicated region fallthrough
CT: control target
= control target key end

     0   :  { %9 = vsyncpa [#allocation5], 0  ;;  %s6426_s0 = inlined_call_operand.hbm [shape: f32[8,8,512], index: 0, kind: input, shape index: {}]   ;;  %s6427_s1 = inlined_call_operand.hbm [shape: f32[8,512], index: 1, kind: input, shape index: {}]   ;;  %s6428_s2 = inlined_call_operand.hbm [shape: f32[128,512], index: 2, kind: input, shape index: {}]   ;;  %s6429_s3 = inlined_call_operand.hbm [shape: f32[128,512], index: 3, kind: input, shape index: {}]   ;;  %s6430_s4 = inlined_call_operand.hbm [shape: f32[8,8,128], index: 4, kind: output, shape index: {}]  }
   0x1   :  { %11 = vsyncpa [#allocation5 + $0x1], 0 }
   0x2   :  { %12 = vsyncpa [#allocation8], 0 }
   0x3   :  { %14 = vsyncpa [#allocation8 + $0x1], 0 }
   0x4   :  { %15 = vsyncpa [#allocation11], 0 }
   0x5   :  { %16 = vsyncpa [#allocation6], 0 }
   0x6   :  { %18 = vsyncpa [#allocation6 + $0x1], 0  ;;  %s4481_s15 = smov 0   ;;  %s4483_s16 = smov 0  }
   0x7   :  { %s4485_s17 = smov 0   ;;  %s4487_s18 = smov 0  }
   0x8   :  { %s4489_s19 = smov 0   ;;  %s4491_s20 = smov 0  }
   0x9   :  { %s4493_s21 = smov 0  }
   0xa LB: > { %s4515_s22 = sadd.s32 4294967295, %s4441_s21   ;;  %p62_p0 = scmp.ne.s32.totalorder %s4429_s18, %s4425_s17  ;;  %s4441_s21 = sphi %s4493_s21, %s24_s21   ;;  %s4437_s20 = sphi %s4491_s20, %s6919_s20   ;;  %s4433_s19 = sphi %s4489_s19, %s6918_s19   ;;  %s4429_s18 = sphi %s4487_s18, %s6416_s18   ;;  %s4425_s17 = sphi %s4485_s17, %s6917_s17   ;;  %s4421_s16 = sphi %s4483_s16, %s6411_s16   ;;  %s4417_s15 = sphi %s4481_s15, %s6916_s15  }
   0xb   : > { %p6432_p1 = scmp.eq.s32.totalorder %s4515_s22, 0  ;;  %p3597_p3 = scmp.ge.s32.totalorder %s4441_s21, 1 }
   0xc   : > { %p181_p4 = scmp.lt.s32.totalorder %s4441_s21, 3  ;;  %s4443_s25 = smov [#allocation9]  }
   0xd   : > { %p4524_p5 = por %p6432_p1, %p62_p0  ;;  %s193_s26 = sshll.u32 %s4443_s25, 4  ;;  %s194_s26 = int_to_ptr.vmem [resolvable:$true] %s193_s26 }
   0xe   : > { %p4528_p6 = pnand %p3597_p3, %p181_p4  ;;  %s4444_s28 = smov [#allocation10]  }
   0xf   : > { %s6603_s23 = scalar_select %p4524_p5, 1, 0 }
  0x10   : > { %s6604_s24 = scalar_select %p4528_p6, 1, 0 }
  0x11   : > { %p3733_p7 = pneg %p4528_p6  ;;  %s206_s29 = sshll.u32 %s4444_s28, 4  ;;  %s207_s29 = int_to_ptr.vmem [resolvable:$true] %s206_s29 }
  0x12   : > { %s4234_s30 = scalar_lea.vmem %s194_s26, 8192  ;;  %p4242_p0 = scmp.lt.s32.totalorder %s194_s26, %s194_s26 }
  0x13   : > { %p4537_p9 = pnand %p3733_p7, %p6432_p1  ;;  %p4235_p11 = scmp.ne.s32.totalorder %s194_s26, %s4234_s30 }
  0x14   : > { %p4243_p3 = scmp.lt.s32.totalorder %s4234_s30, %s4234_s30 }
  0x15   : > { %p4225_p10 = pneg %p4537_p9 }
  0x16   : > { %p4244_p4 = por %p4243_p3, %p4242_p0 }
  0x17   : > { %p4237_p12 = pnand %p4235_p11, %p4225_p10 }
  0x19   : > { %p4238_p13 = pneg %p4237_p12 }
  0x1b   : > { %p4245_p7 = pnand %p4244_p4, %p4238_p13 }
  0x1d   : > { %4248 = shalt.err (!%p4245_p7)
}
  0x1e   : > { %s4445_s5 = smov 512   ;;  %s4446_s6 = smov 32  }
  0x1f   : > { %3736 = dma.hbm_to_vmem [thread:$0]  (!%p4537_p9), %s6428_s2, 8192, %s194_s26, [#allocation8], %s4445_s5, %s4445_s5, %s4446_s6  }
  0x20   : > { %s4260_s9 = scalar_lea.vmem %s207_s29, 8192  ;;  %p4268_p13 = scmp.lt.s32.totalorder %s207_s29, %s207_s29 }
  0x21   : > { %p4261_p11 = scmp.ne.s32.totalorder %s207_s29, %s4260_s9  ;;  %p4269_p3 = scmp.lt.s32.totalorder %s4260_s9, %s4260_s9 }
  0x23   : > { %p4263_p12 = pnand %p4261_p11, %p4225_p10  ;;  %p4270_p4 = por %p4269_p3, %p4268_p13 }
  0x25   : > { %p4264_p0 = pneg %p4263_p12 }
  0x27   : > { %p4271_p7 = pnand %p4270_p4, %p4264_p0 }
  0x29   : > { %4274 = shalt.err (!%p4271_p7)
}
  0x2a   : > { %3739 = dma.hbm_to_vmem [thread:$0]  (!%p4537_p9), %s6429_s3, 8192, %s207_s29, [#allocation11], %s4445_s5, %s4445_s5, %s4446_s6  }
  0x2b   : > { %s33_s12 = sadd.s32 1, %s4437_s20  ;;  %p4413_p11 = scmp.ne.s32.totalorder %s4429_s18, 0 }
  0x2c   : > { %p34_p10 = scmp.ge.s32.totalorder %s33_s12, 2  ;;  %p6433_p12 = scmp.eq.s32.totalorder %s4441_s21, 0 }
  0x2d   : > { %p6431_p0 = scmp.lt.s32.totalorder %s4441_s21, 2  ;;  %s4447_s13 = smov [#allocation4]  }
  0x2e   : > { %s6921_s12 = smov (%p34_p10, %s33_s12), 0  ;;  %p58_p13 = por %p4413_p11, %p6433_p12 }
  0x2f   : > { %s236_s14 = sshll.u32 %s4447_s13, 4  ;;  %s4275_s27 = scalar_lea.hbm %s6426_s0, 4096  ;;  %s237_s14 = int_to_ptr.vmem [resolvable:$true] %s236_s14 }
  0x30   : > { %p4575_p3 = pnand %p6431_p0, %p58_p13  ;;  %p4276_p9 = scmp.ne.s32.totalorder %s6426_s0, %s4275_s27 }
  0x31   : > { %p4282_p11 = scmp.lt.s32.totalorder %s4275_s27, %s4275_s27 }
  0x32   : > { %p4277_p4 = pneg %p4575_p3 }
  0x34   : > { %p4278_p7 = pnand %p4277_p4, %p4276_p9 }
  0x36   : > { %p4279_p10 = pneg %p4278_p7 }
  0x38   : > { %p4284_p8 = pnand %p4282_p11, %p4279_p10 }
  0x3a   : > { %4287 = shalt.err (!%p4284_p8)
}
  0x3b   : > { %s4288_s30 = scalar_lea.vmem %s237_s14, 4096  ;;  %s4295_s7 = scalar_lea.vmem %s237_s14, 8192 }
  0x3c   : > { %p4289_p13 = scmp.ne.s32.totalorder %s237_s14, %s4288_s30  ;;  %p4296_p1 = scmp.lt.s32.totalorder %s237_s14, %s237_s14 }
  0x3d   : > { %p4297_p12 = scmp.lt.s32.totalorder %s4295_s7, %s4288_s30 }
  0x3e   : > { %p4291_p0 = pnand %p4289_p13, %p4277_p4 }
  0x3f   : > { %p4298_p5 = por %p4297_p12, %p4296_p1 }
  0x40   : > { %p4292_p2 = pneg %p4291_p0 }
  0x42   : > { %p4299_p6 = pnand %p4298_p5, %p4292_p2 }
  0x44   : > { %4302 = shalt.err (!%p4299_p6)
}
  0x45   : > { %3743 = dma.hbm_to_vmem [thread:$0]  (!%p4575_p3), %s6426_s0, 4096, %s237_s14, [#allocation5], %s4445_s5, %s4445_s5, %s4446_s6  }
  0x46   : > { %s3592_s10 = sadd.s32 4294967294, %s4441_s21   ;;  %p4414_p1 = scmp.ne.s32.totalorder %s4421_s16, 0 }
  0x47   : > { %p94_p2 = scmp.ne.s32.totalorder %s4421_s16, %s4417_s15  ;;  %p174_p5 = scmp.eq.s32.totalorder %s3592_s10, 1 }
  0x48   : > { %p6607_p6 = scmp.eq.s32.totalorder %s4441_s21, 0  ;;  %p6608_p12 = scmp.eq.s32.totalorder %s4515_s22, 0 }
  0x49   : > { %p6610_p9 = scmp.eq.s32.totalorder %s4515_s22, 1  ;;  %p4613_p7 = por %p174_p5, %p94_p2 }
  0x4a   : > { %p90_p8 = por %p4414_p1, %p6607_p6  ;;  %p4603_p0 = por %p94_p2, %p6608_p12 }
  0x4b   : > { %p4609_p4 = por %p4414_p1, %p6610_p9  ;;  %s246_s5 = sand.u32 1, %s4441_s21  }
  0x4c   : > { %s4448_s6 = smov [#allocation7]   ;;  %p6613_p3 = scmp.lt.s32.totalorder %s4441_s21, 2 }
  0x4d   : > { %s261_s14 = sshll.u32 %s4448_s6, 4  ;;  %s247_s26 = scalar_lea.sflag [#allocation8], %s246_s5  ;;  %s262_s14 = int_to_ptr.vmem [resolvable:$true] %s261_s14 }
  0x4e   : > { %p4620_p10 = pnand %p6613_p3, %p90_p8  ;;  %s4316_s27 = scalar_lea.vmem %s262_s14, 512 }
  0x4f   : > { %p4317_p13 = scmp.ne.s32.totalorder %s262_s14, %s4316_s27  ;;  %s4323_s28 = scalar_lea.vmem %s262_s14, 1024 }
  0x50   : > { %p4305_p11 = pneg %p4620_p10  ;;  %p4324_p5 = scmp.lt.s32.totalorder %s262_s14, %s262_s14 }
  0x51   : > { %p4325_p6 = scmp.lt.s32.totalorder %s4323_s28, %s4316_s27 }
  0x52   : > { %p4319_p1 = pnand %p4317_p13, %p4305_p11 }
  0x53   : > { %p4326_p12 = por %p4325_p6, %p4324_p5 }
  0x54   : > { %p4320_p2 = pneg %p4319_p1 }
  0x56   : > { %p4327_p9 = pnand %p4326_p12, %p4320_p2 }
  0x58   : > { %4330 = shalt.err (!%p4327_p9)
}
  0x59   : > { %3746 = dma.hbm_to_vmem [thread:$0]  (!%p4620_p10), %s6427_s1, 512, %s262_s14, %s247_s26  }
  0x5a   : > { %p6615_p8 = scmp.ne.s32.totalorder %s6604_s24, 0 }
  0x5b   : > { %s272_s7 = sand.u32 (!%p6615_p8), 1, %s4429_s18   ;;  %p6616_p3 = scmp.ne.s32.totalorder (!%p6615_p8), %s6603_s23, 0 }
  0x5c   : > { %270 = sbr.rel (%p6615_p8) target bundleno = 4218 (0x107a), region = 36  ;;  %s3610_s8 = sshll.u32 (!%p6615_p8), %s272_s7, 8 }
  0x5d   : > { %s273_s9 = scalar_lea.sflag (!%p6615_p8), [#allocation5], %s272_s7  ;;  %s4634_s10 = scalar_lea.vmem (!%p6615_p8), [#allocation4], %s3610_s8 }
  0x61   : > { %4394 = dma.done.wait (%p6616_p3), %s273_s9, 4096  }
  0x62   : > { %4396 = vsyncadd (%p6616_p3), %s273_s9, 4294963200  ;;  %s281_s5 = sand.u32 1, %s4515_s22   ;;  %s4642_s6 = sand.u32 1, %s4421_s16  }
  0x63   : > { %s3611_s24 = sshll.u32 %s4642_s6, 5  ;;  %s282_s14 = scalar_lea.sflag [#allocation8], %s281_s5 }
  0x64   : > { %s4645_s25 = scalar_lea.vmem [#allocation7], %s3611_s24 }
  0x65   : > { %4398 = dma.done.wait (%p4603_p0), %s282_s14, 512  }
  0x66   : > { %4400 = vsyncadd (%p4603_p0), %s282_s14, 4294966784  ;;  %p6617_p10 = scmp.eq.s32.totalorder %s4515_s22, 0 }
  0x68   : > { %4402 = dma.done.wait (%p6617_p10), [#allocation8], 8192   ;;  %p6618_p11 = pmov %p6617_p10 }
  0x69   : > { %p6619_p13 = pmov %p6617_p10 }
  0x6a   : > { %4404 = vsyncadd (%p6618_p11), [#allocation8], 4294959104 }
  0x6b   : > { %4406 = dma.done.wait (%p6619_p13), [#allocation11], 8192   ;;  %p6620_p1 = pmov %p6617_p10 }
  0x6c   : > { %s3614_s23 = sshll.u32 %s4642_s6, 6  ;;  %p3615_p2 = scmp.ne.s32.totalorder %s4433_s19, 0 }
  0x6d   : > { %4408 = vsyncadd (%p6620_p1), [#allocation11], 4294959104  ;;  %s4660_s26 = scalar_lea.vmem [#allocation12], %s3614_s23 }
  0x6e   : > { %336 = sbr.rel (%p3615_p2) target bundleno = 117 (0x75), region = 56 }
  0x73   : > { %v4449_v0 = vmov 0.0  }
  0x74   : > { %337 = vst [vmem:[#allocation2] sm:$0xff] %v4449_v0  ;;  %338 = vst [vmem:[#allocation3] sm:$0xff] %v4449_v0 }
  0x75 PF: > { %p3616_p0 = scmp.ne.s32.totalorder %s4433_s19, 1 }
  0x77   : > { %342 = sbr.rel (%p3616_p0) target bundleno = 126 (0x7e), region = 60 }
  0x7c   : > { %v4450_v1 = vmov 0.0  }
  0x7d   : > { %343 = vst [vmem:[#allocation3] sm:$0xff] %v4450_v1 }
  0x7e PF: > { %p3617_p5 = scmp.ge.s32.totalorder %s4433_s19, 1 }
  0x80   : > { %347 = sbr.rel (%p3617_p5) target bundleno = 2159 (0x86f), region = 64 }
  0x85   : > { %v4665_v2 = vld [vmem:[#allocation9 + $0x1e8] sm:$0xff]  ;;  %v4667_v3 = vld [vmem:[#allocation9 + $0x1e0] sm:$0xff]  ;;  %v6436_v6 = vmov 0.0   ;;  %v4688_v11 = vld [vmem:[#allocation9 + $0x1f8] sm:$0xff] }
  0x86   : > { %6621 = vst [vmem:[#allocation18_spill] sm:$0xff] %v4665_v2  ;;  %v4669_v4 = vld [vmem:[#allocation9 + $0x1c8] sm:$0xff]  ;;  %418 = vmatprep.subr.mxu0 %v4665_v2  ;;  %v4672_v5 = vld [vmem:[#allocation9 + $0x1c0] sm:$0xff]  ;;  %482 = vmatprep.mubr.f32.mxu0 %v6436_v6  ;;  %6622 = vst [vmem:[#allocation19_spill] sm:$0xff] %v4688_v11 }
  0x87   : > { %419 = vmatpush1.msra.mxu0 %v4667_v3  ;;  %v4676_v7 = vld [vmem:[#allocation9 + $0x1a8] sm:$0xff]  ;;  %553 = vmatprep.mubr.f32.mxu1 %v6436_v6  ;;  %v4680_v8 = vld [vmem:[#allocation9 + $0x1a0] sm:$0xff]  ;;  %v4694_v13 = vld [vmem:[#allocation9 + $0x1f0] sm:$0xff] }
  0x88   : > { %420 = vmatprep.subr.mxu0 %v4669_v4  ;;  %v4683_v9 = vld [vmem:[#allocation9 + $0x188] sm:$0xff]  ;;  %v4686_v10 = vld [vmem:[#allocation9 + $0x180] sm:$0xff]  ;;  %489 = vmatprep.subr.mxu1 %v4688_v11  ;;  %v4700_v15 = vld [vmem:[#allocation9 + $0x1d8] sm:$0xff] }
  0x89   : > { %421 = vmatpush1.msra.mxu0 %v4672_v5  ;;  %v4691_v12 = vld [vmem:[#allocation9 + $0x168] sm:$0xff]  ;;  %v4697_v14 = vld [vmem:[#allocation9 + $0x160] sm:$0xff]  ;;  %490 = vmatpush1.msra.mxu1 %v4694_v13  ;;  %v4702_v16 = vld [vmem:[#allocation9 + $0x1d0] sm:$0xff] }
  0x8a   : > { %422 = vmatprep.subr.mxu0 %v4676_v7  ;;  %v4705_v17 = vld [vmem:[#allocation9 + $0x148] sm:$0xff]  ;;  %491 = vmatprep.subr.mxu1 %v4700_v15  ;;  %v4708_v18 = vld [vmem:[#allocation9 + $0x1b8] sm:$0xff]  ;;  %v4711_v19 = vld [vmem:[#allocation9 + $0x140] sm:$0xff] }
  0x8b   : > { %423 = vmatpush1.msra.mxu0 %v4680_v8  ;;  %492 = vmatpush1.msra.mxu1 %v4702_v16  ;;  %v4714_v20 = vld [vmem:[#allocation9 + $0x1b0] sm:$0xff]  ;;  %v4716_v21 = vld [vmem:[#allocation9 + $0x198] sm:$0xff]  ;;  %v4719_v22 = vld [vmem:[#allocation9 + $0x128] sm:$0xff] }
  0x8c   : > { %424 = vmatprep.subr.mxu0 %v4683_v9  ;;  %493 = vmatprep.subr.mxu1 %v4708_v18  ;;  %v4722_v23 = vld [vmem:[#allocation9 + $0x190] sm:$0xff]  ;;  %v4725_v24 = vld [vmem:[#allocation9 + $0x120] sm:$0xff]  ;;  %v4728_v25 = vld [vmem:[#allocation9 + $0x178] sm:$0xff] }
  0x8d   : > { %425 = vmatpush1.msra.mxu0 %v4686_v10  ;;  %494 = vmatpush1.msra.mxu1 %v4714_v20  ;;  %v4731_v26 = vld [vmem:[#allocation9 + $0x108] sm:$0xff]  ;;  %v4734_v27 = vld [vmem:[#allocation9 + $0x170] sm:$0xff]  ;;  %v4737_v28 = vld [vmem:[#allocation9 + $0x100] sm:$0xff] }
  0x8e   : > { %426 = vmatprep.subr.mxu0 %v4691_v12  ;;  %495 = vmatprep.subr.mxu1 %v4716_v21  ;;  %v4740_v29 = vld [vmem:[#allocation9 + $0x158] sm:$0xff]  ;;  %v4743_v30 = vld [vmem:[#allocation9 + $0xe8] sm:$0xff]  ;;  %v4746_v31 = vld [vmem:[#allocation9 + $0x150] sm:$0xff] }
  0x8f   : > { %427 = vmatpush1.msra.mxu0 %v4697_v14  ;;  %496 = vmatpush1.msra.mxu1 %v4722_v23  ;;  %v4749_v32 = vld [vmem:[#allocation9 + $0xe0] sm:$0xff]  ;;  %v4752_v33 = vld [vmem:[#allocation9 + $0x138] sm:$0xff]  ;;  %v4755_v34 = vld [vmem:[#allocation9 + $0xc8] sm:$0xff] }
  0x90   : > { %428 = vmatprep.subr.mxu0 %v4705_v17  ;;  %497 = vmatprep.subr.mxu1 %v4728_v25  ;;  %v4758_v35 = vld [vmem:[#allocation9 + $0x130] sm:$0xff]  ;;  %v4761_v36 = vld [vmem:[#allocation9 + $0xc0] sm:$0xff]  ;;  %v4764_v37 = vld [vmem:[#allocation9 + $0x118] sm:$0xff] }
  0x91   : > { %429 = vmatpush1.msra.mxu0 %v4711_v19  ;;  %498 = vmatpush1.msra.mxu1 %v4734_v27  ;;  %v4767_v38 = vld [vmem:[#allocation9 + $0xa8] sm:$0xff]  ;;  %v4770_v39 = vld [vmem:[#allocation9 + $0x110] sm:$0xff]  ;;  %v4773_v40 = vld [vmem:[#allocation9 + $0xa0] sm:$0xff] }
  0x92   : > { %430 = vmatprep.subr.mxu0 %v4719_v22  ;;  %499 = vmatprep.subr.mxu1 %v4740_v29  ;;  %v4776_v41 = vld [vmem:[#allocation9 + $0xf8] sm:$0xff]  ;;  %v4779_v42 = vld [vmem:[#allocation9 + $0x88] sm:$0xff]  ;;  %v4782_v43 = vld [vmem:[#allocation9 + $0xf0] sm:$0xff] }
  0x93   : > { %431 = vmatpush1.msra.mxu0 %v4725_v24  ;;  %500 = vmatpush1.msra.mxu1 %v4746_v31  ;;  %v4785_v44 = vld [vmem:[#allocation9 + $0x80] sm:$0xff]  ;;  %v4788_v45 = vld [vmem:[#allocation9 + $0xd8] sm:$0xff]  ;;  %v4791_v46 = vld [vmem:[#allocation9 + $0x68] sm:$0xff] }
  0x94   : > { %432 = vmatprep.subr.mxu0 %v4731_v26  ;;  %501 = vmatprep.subr.mxu1 %v4752_v33  ;;  %6623 = vst [vmem:[#allocation20_spill] sm:$0xff] %v4785_v44  ;;  %6624 = vst [vmem:[#allocation21_spill] sm:$0xff] %v4791_v46  ;;  %v4794_v47 = vld [vmem:[#allocation9 + $0xd0] sm:$0xff]  ;;  %v4797_v48 = vld [vmem:[#allocation9 + $0x60] sm:$0xff] }
  0x95   : > { %433 = vmatpush1.msra.mxu0 %v4737_v28  ;;  %502 = vmatpush1.msra.mxu1 %v4758_v35  ;;  %6625 = vst [vmem:[#allocation22_spill] sm:$0xff] %v4797_v48  ;;  %v4800_v49 = vld [vmem:[#allocation9 + $0xb8] sm:$0xff]  ;;  %v4803_v50 = vld [vmem:[#allocation9 + $0x48] sm:$0xff]  ;;  %v4806_v51 = vld [vmem:[#allocation9 + $0xb0] sm:$0xff] }
  0x96   : > { %434 = vmatprep.subr.mxu0 %v4743_v30  ;;  %503 = vmatprep.subr.mxu1 %v4764_v37  ;;  %6626 = vst [vmem:[#allocation23_spill] sm:$0xff] %v4803_v50  ;;  %v4809_v52 = vld [vmem:[#allocation9 + $0x40] sm:$0xff]  ;;  %v4812_v53 = vld [vmem:[#allocation9 + $0x98] sm:$0xff]  ;;  %v4815_v54 = vld [vmem:[#allocation9 + $0x28] sm:$0xff] }
  0x97   : > { %435 = vmatpush1.msra.mxu0 %v4749_v32  ;;  %504 = vmatpush1.msra.mxu1 %v4770_v39  ;;  %6627 = vst [vmem:[#allocation24_spill] sm:$0xff] %v4809_v52  ;;  %6628 = vst [vmem:[#allocation25_spill] sm:$0xff] %v4815_v54  ;;  %v4818_v55 = vld [vmem:[#allocation9 + $0x90] sm:$0xff]  ;;  %v4821_v56 = vld [vmem:[#allocation9 + $0x20] sm:$0xff] }
  0x98   : > { %436 = vmatprep.subr.mxu0 %v4755_v34  ;;  %505 = vmatprep.subr.mxu1 %v4776_v41  ;;  %6629 = vst [vmem:[#allocation26_spill] sm:$0xff] %v4818_v55  ;;  %6630 = vst [vmem:[#allocation27_spill] sm:$0xff] %v4821_v56  ;;  %v4824_v57 = vld [vmem:[#allocation9 + $0x78] sm:$0xff]  ;;  %v4827_v58 = vld [vmem:[#allocation9 + $0x8] sm:$0xff] }
  0x99   : > { %437 = vmatpush1.msra.mxu0 %v4761_v36  ;;  %506 = vmatpush1.msra.mxu1 %v4782_v43  ;;  %6631 = vst [vmem:[#allocation28_spill] sm:$0xff] %v4824_v57  ;;  %6632 = vst [vmem:[#allocation29_spill] sm:$0xff] %v4827_v58  ;;  %v4830_v59 = vld [vmem:[#allocation9 + $0x70] sm:$0xff]  ;;  %v4833_v60 = vld [vmem:[#allocation9] sm:$0xff] }
  0x9a   : > { %438 = vmatprep.subr.mxu0 %v4767_v38  ;;  %507 = vmatprep.subr.mxu1 %v4788_v45  ;;  %6633 = vst [vmem:[#allocation30_spill] sm:$0xff] %v4830_v59  ;;  %6634 = vst [vmem:[#allocation31_spill] sm:$0xff] %v4833_v60  ;;  %v4836_v61 = vld [vmem:[#allocation9 + $0x58] sm:$0xff]  ;;  %v412_v62 = vld [vmem:[#allocation2] sm:$0xff] }
  0x9b   : > { %439 = vmatpush1.msra.mxu0 %v4773_v40  ;;  %508 = vmatpush1.msra.mxu1 %v4794_v47  ;;  %6635 = vst [vmem:[#allocation32_spill] sm:$0xff] %v4836_v61  ;;  %v4840_v63 = vld [vmem:[#allocation9 + $0x50] sm:$0xff]  ;;  %v4844_v0 = vld [vmem:[#allocation9 + $0x38] sm:$0xff] }
  0x9c   : > { %440 = vmatprep.subr.mxu0 %v4779_v42  ;;  %509 = vmatprep.subr.mxu1 %v4800_v49  ;;  %6636 = vst [vmem:[#allocation33_spill] sm:$0xff] %v4840_v63  ;;  %6637 = vst [vmem:[#allocation34_spill] sm:$0xff] %v4844_v0  ;;  %v4848_v1 = vld [vmem:[#allocation9 + $0x30] sm:$0xff]  ;;  %v4851_v6 = vld [vmem:[#allocation9 + $0x18] sm:$0xff] }
  0x9d   : > { %441 = vmatpush1.msra.mxu0 %v4785_v44  ;;  %510 = vmatpush1.msra.mxu1 %v4806_v51  ;;  %6638 = vst [vmem:[#allocation35_spill] sm:$0xff] %v4848_v1  ;;  %6639 = vst [vmem:[#allocation36_spill] sm:$0xff] %v4851_v6 }
  0x9e   : > { %442 = vmatprep.subr.mxu0 %v4791_v46  ;;  %511 = vmatprep.subr.mxu1 %v4812_v53 }
  0x9f   : > { %443 = vmatpush1.msra.mxu0 %v4797_v48  ;;  %512 = vmatpush1.msra.mxu1 %v4818_v55 }
  0xa0   : > { %444 = vmatprep.subr.mxu0 %v4803_v50  ;;  %513 = vmatprep.subr.mxu1 %v4824_v57 }
  0xa1   : > { %445 = vmatpush1.msra.mxu0 %v4809_v52  ;;  %514 = vmatpush1.msra.mxu1 %v4830_v59 }
  0xa2   : > { %446 = vmatprep.subr.mxu0 %v4815_v54  ;;  %515 = vmatprep.subr.mxu1 %v4836_v61 }
  0xa3   : > { %447 = vmatpush1.msra.mxu0 %v4821_v56  ;;  %516 = vmatpush1.msra.mxu1 %v4840_v63  ;;  %v4854_v56 = vld [vmem:[#allocation9 + $0x10] sm:$0xff] }
  0xa4   : > { %448 = vmatprep.subr.mxu0 %v4827_v58  ;;  %517 = vmatprep.subr.mxu1 %v4844_v0  ;;  %6640 = vst [vmem:[#allocation37_spill] sm:$0xff] %v4854_v56 }
  0xa5   : > { %449 = vmatpush1.msra.mxu0 %v4833_v60  ;;  %518 = vmatpush1.msra.mxu1 %v4848_v1 }
  0xa6   : > { %483 = vmatmul.mubr.f32.vlgmr.msra.gmra.mxu0 %v412_v62  ;;  %593 = vmatprep.subr.mxu0 %v4665_v2 }
  0xa7   : > { %594 = vmatpush1.msra.mxu0 %v4667_v3  ;;  %519 = vmatprep.subr.mxu1 %v4851_v6 }
  0xa8   : > { %595 = vmatprep.subr.mxu0 %v4669_v4  ;;  %520 = vmatpush1.msra.mxu1 %v4854_v56 }
  0xa9   : > { %596 = vmatpush1.msra.mxu0 %v4672_v5  ;;  %554 = vmatmul.mubr.f32.vlgmr.msra.gmra.mxu1 %v412_v62  ;;  %v6641_v62 = vld [vmem:[#allocation27_spill] sm:$0xff] }
  0xaa   : > { %664 = vmatprep.subr.mxu1 %v4688_v11  ;;  %597 = vmatprep.subr.mxu0 %v4676_v7 }
  0xab   : > { %665 = vmatpush1.msra.mxu1 %v4694_v13  ;;  %598 = vmatpush1.msra.mxu0 %v4680_v8 }
  0xac   : > { %666 = vmatprep.subr.mxu1 %v4700_v15  ;;  %599 = vmatprep.subr.mxu0 %v4683_v9 }
  0xad   : > { %667 = vmatpush1.msra.mxu1 %v4702_v16  ;;  %600 = vmatpush1.msra.mxu0 %v4686_v10 }
  0xae   : > { %668 = vmatprep.subr.mxu1 %v4708_v18  ;;  %601 = vmatprep.subr.mxu0 %v4691_v12 }
  0xaf   : > { %669 = vmatpush1.msra.mxu1 %v4714_v20  ;;  %602 = vmatpush1.msra.mxu0 %v4697_v14 }
  0xb0   : > { %670 = vmatprep.subr.mxu1 %v4716_v21  ;;  %603 = vmatprep.subr.mxu0 %v4705_v17 }
  0xb1   : > { %671 = vmatpush1.msra.mxu1 %v4722_v23  ;;  %604 = vmatpush1.msra.mxu0 %v4711_v19 }
  0xb2   : > { %672 = vmatprep.subr.mxu1 %v4728_v25  ;;  %605 = vmatprep.subr.mxu0 %v4719_v22 }
  0xb3   : > { %673 = vmatpush1.msra.mxu1 %v4734_v27  ;;  %606 = vmatpush1.msra.mxu0 %v4725_v24 }
  0xb4   : > { %674 = vmatprep.subr.mxu1 %v4740_v29  ;;  %607 = vmatprep.subr.mxu0 %v4731_v26 }
  0xb5   : > { %675 = vmatpush1.msra.mxu1 %v4746_v31  ;;  %608 = vmatpush1.msra.mxu0 %v4737_v28 }
  0xb6   : > { %676 = vmatprep.subr.mxu1 %v4752_v33  ;;  %609 = vmatprep.subr.mxu0 %v4743_v30 }
  0xb7   : > { %677 = vmatpush1.msra.mxu1 %v4758_v35  ;;  %610 = vmatpush1.msra.mxu0 %v4749_v32 }
  0xb8   : > { %678 = vmatprep.subr.mxu1 %v4764_v37  ;;  %611 = vmatprep.subr.mxu0 %v4755_v34 }
  0xb9   : > { %679 = vmatpush1.msra.mxu1 %v4770_v39  ;;  %612 = vmatpush1.msra.mxu0 %v4761_v36 }
  0xba   : > { %680 = vmatprep.subr.mxu1 %v4776_v41  ;;  %613 = vmatprep.subr.mxu0 %v4767_v38 }
  0xbb   : > { %681 = vmatpush1.msra.mxu1 %v4782_v43  ;;  %614 = vmatpush1.msra.mxu0 %v4773_v40 }
  0xbc   : > { %682 = vmatprep.subr.mxu1 %v4788_v45  ;;  %615 = vmatprep.subr.mxu0 %v4779_v42 }
  0xbd   : > { %683 = vmatpush1.msra.mxu1 %v4794_v47  ;;  %616 = vmatpush1.msra.mxu0 %v4785_v44 }
  0xbe   : > { %684 = vmatprep.subr.mxu1 %v4800_v49  ;;  %617 = vmatprep.subr.mxu0 %v4791_v46 }
  0xbf   : > { %685 = vmatpush1.msra.mxu1 %v4806_v51  ;;  %618 = vmatpush1.msra.mxu0 %v4797_v48 }
  0xc0   : > { %686 = vmatprep.subr.mxu1 %v4812_v53  ;;  %619 = vmatprep.subr.mxu0 %v4803_v50  ;;  %v417_v50 = vld [vmem:[%s4634_s10 + $0x18] sm:$0xff] }
  0xc1   : > { %687 = vmatpush1.msra.mxu1 %v4818_v55  ;;  %620 = vmatpush1.msra.mxu0 %v4809_v52  ;;  %v6642_v52 = vmov 0.0  }
  0xc2   : > { %688 = vmatprep.subr.mxu1 %v4824_v57  ;;  %621 = vmatprep.subr.mxu0 %v4815_v54 }
  0xc3   : > { %689 = vmatpush1.msra.mxu1 %v4830_v59  ;;  %622 = vmatpush1.msra.mxu0 %v6641_v62  ;;  %v416_v59 = vld [vmem:[%s4634_s10 + $0x10] sm:$0xff] }
  0xc4   : > { %690 = vmatprep.subr.mxu1 %v4836_v61  ;;  %623 = vmatprep.subr.mxu0 %v4827_v58  ;;  %v414_v58 = vld [vmem:[%s4634_s10] sm:$0xff] }
  0xc5   : > { %691 = vmatpush1.msra.mxu1 %v4840_v63  ;;  %624 = vmatpush1.msra.mxu0 %v4833_v60 }
  0xc6   : > { %692 = vmatprep.subr.mxu1 %v4844_v0  ;;  %657 = vmatprep.mubr.f32.mxu0 %v6642_v52  ;;  %v415_v0 = vld [vmem:[%s4634_s10 + $0x8] sm:$0xff] }
  0xc7   : > { %693 = vmatpush1.msra.mxu1 %v4848_v1  ;;  %728 = vmatprep.mubr.f32.mxu1 %v6642_v52 }
  0xc8   : > { %694 = vmatprep.subr.mxu1 %v4851_v6  ;;  %768 = vmatprep.subr.mxu0 %v4665_v2 }
  0xc9   : > { %695 = vmatpush1.msra.mxu1 %v4854_v56 }
  0xca   : > { %839 = vmatprep.subr.mxu1 %v4688_v11 }
 0x166   : > { %v484_v62 = vpop.f32.mrf.mxu0 }
 0x167   : > { %v560_v60 = vadd.f32 %v484_v62, %v414_v58 }
 0x168   : > { %v486_v54 = vpop.f32.mrf.mxu0 }
 0x169   : > { %v3618_v1 = vmul.f32 -1.442695, %v560_v60  ;;  %v561_v63 = vadd.f32 %v486_v54, %v415_v0  ;;  %v555_v6 = vpop.f32.mrf.mxu1 }
 0x16a   : > { %v562_v48 = vadd.f32 %v555_v6, %v416_v59  ;;  %v6650_v59 = vld [vmem:[#allocation32_spill] sm:$0xff] }
 0x16b   : > { %3839 = vpow2.f32 %v3618_v1  ;;  %v3619_v61 = vmul.f32 -1.442695, %v561_v63  ;;  %v557_v52 = vpop.f32.mrf.mxu1  ;;  %v413_v63 = vld [vmem:[#allocation3] sm:$0xff] }
 0x16c   : > { %v563_v56 = vadd.f32 %v557_v52, %v417_v50  ;;  %v6645_v50 = vld [vmem:[#allocation21_spill] sm:$0xff]  ;;  %v6646_v52 = vld [vmem:[#allocation28_spill] sm:$0xff] }
 0x16d   : > { %3841 = vpow2.f32 %v3619_v61 }
 0x16e   : > { %v3620_v57 = vmul.f32 -1.442695, %v563_v56  ;;  %3843 = vtanh.f32 %v562_v48  ;;  %v6648_v56 = vld [vmem:[#allocation30_spill] sm:$0xff] }
 0x170   : > { %3845 = vpow2.f32 %v3620_v57  ;;  %v6649_v57 = vld [vmem:[#allocation23_spill] sm:$0xff] }
 0x178   : > { %v3840_v2 = vpop.eup %3839 }
 0x179   : > { %v567_v46 = vadd.f32 1.0, %v3840_v2 }
 0x17a   : > { %v3842_v11 = vpop.eup %3841 }
 0x17b   : > { %3847 = vrcp.f32 %v567_v46  ;;  %v573_v58 = vadd.f32 1.0, %v3842_v11  ;;  %v3844_v60 = vpop.eup %3843  ;;  %v6643_v11 = vld [vmem:[#allocation20_spill] sm:$0xff]  ;;  %v6644_v46 = vld [vmem:[#allocation26_spill] sm:$0xff] }
 0x17d   : > { %3849 = vrcp.f32 %v573_v58  ;;  %v3846_v54 = vpop.eup %3845  ;;  %v6651_v58 = vld [vmem:[#allocation24_spill] sm:$0xff] }
 0x17e   : > { %v580_v61 = vadd.f32 1.0, %v3846_v54  ;;  %v6653_v54 = vld [vmem:[#allocation25_spill] sm:$0xff] }
 0x180   : > { %3851 = vrcp.f32 %v580_v61  ;;  %v6657_v61 = vld [vmem:[#allocation29_spill] sm:$0xff] }
 0x188   : > { %v3848_v0 = vpop.eup %3847 }
 0x189   : > { %v584_v55 = vmul.f32 %v3848_v0, %v3844_v60  ;;  %v6652_v60 = vld [vmem:[#allocation33_spill] sm:$0xff]  ;;  %v6654_v0 = vld [vmem:[#allocation34_spill] sm:$0xff] }
 0x18a   : > { %v3850_v1 = vpop.eup %3849 }
 0x18b   : > { %v583_v62 = vmul.f32 %v3850_v1, %v413_v63  ;;  %v6655_v63 = vld [vmem:[#allocation27_spill] sm:$0xff] }
 0x18c   : > { %v6656_v1 = vld [vmem:[#allocation35_spill] sm:$0xff] }
 0x18d   : > { %v4931_v44 = vadd.f32 %v584_v55, %v583_v62  ;;  %v3852_v2 = vpop.eup %3851  ;;  %v6647_v55 = vld [vmem:[#allocation22_spill] sm:$0xff]  ;;  %v6658_v62 = vld [vmem:[#allocation36_spill] sm:$0xff] }
 0x18f   : > { %3853 = vtanh.f32 %v4931_v44 }
 0x19c   : > { %v3854_v6 = vpop.eup %3853 }
 0x19d   : > { %v587_v48 = vmul.f32 %v3854_v6, %v3852_v2  ;;  %v6659_v2 = vld [vmem:[#allocation31_spill] sm:$0xff]  ;;  %v6660_v6 = vmov 0.0  }
 0x19f   : > { %658 = vmatmul.mubr.f32.vlgmr.msra.gmra.mxu0 %v587_v48  ;;  %729 = vmatmul.mubr.f32.vlgmr.msra.gmra.mxu1 %v587_v48  ;;  %v6661_v48 = vld [vmem:[#allocation37_spill] sm:$0xff] }
 0x1a0   : > { %769 = vmatpush1.msra.mxu0 %v4667_v3  ;;  %840 = vmatpush1.msra.mxu1 %v4694_v13 }
 0x1a1   : > { %770 = vmatprep.subr.mxu0 %v4669_v4  ;;  %841 = vmatprep.subr.mxu1 %v4700_v15 }
 0x1a2   : > { %771 = vmatpush1.msra.mxu0 %v4672_v5  ;;  %842 = vmatpush1.msra.mxu1 %v4702_v16 }
 0x1a3   : > { %772 = vmatprep.subr.mxu0 %v4676_v7  ;;  %843 = vmatprep.subr.mxu1 %v4708_v18 }
 0x1a4   : > { %773 = vmatpush1.msra.mxu0 %v4680_v8  ;;  %844 = vmatpush1.msra.mxu1 %v4714_v20 }
 0x1a5   : > { %774 = vmatprep.subr.mxu0 %v4683_v9  ;;  %845 = vmatprep.subr.mxu1 %v4716_v21 }
 0x1a6   : > { %775 = vmatpush1.msra.mxu0 %v4686_v10  ;;  %846 = vmatpush1.msra.mxu1 %v4722_v23 }
 0x1a7   : > { %776 = vmatprep.subr.mxu0 %v4691_v12  ;;  %847 = vmatprep.subr.mxu1 %v4728_v25 }
 0x1a8   : > { %777 = vmatpush1.msra.mxu0 %v4697_v14  ;;  %848 = vmatpush1.msra.mxu1 %v4734_v27 }
 0x1a9   : > { %778 = vmatprep.subr.mxu0 %v4705_v17  ;;  %849 = vmatprep.subr.mxu1 %v4740_v29 }
 0x1aa   : > { %779 = vmatpush1.msra.mxu0 %v4711_v19  ;;  %850 = vmatpush1.msra.mxu1 %v4746_v31 }
 0x1ab   : > { %780 = vmatprep.subr.mxu0 %v4719_v22  ;;  %851 = vmatprep.subr.mxu1 %v4752_v33 }
 0x1ac   : > { %781 = vmatpush1.msra.mxu0 %v4725_v24  ;;  %852 = vmatpush1.msra.mxu1 %v4758_v35 }
 0x1ad   : > { %782 = vmatprep.subr.mxu0 %v4731_v26  ;;  %853 = vmatprep.subr.mxu1 %v4764_v37 }
 0x1ae   : > { %783 = vmatpush1.msra.mxu0 %v4737_v28  ;;  %854 = vmatpush1.msra.mxu1 %v4770_v39 }
 0x1af   : > { %784 = vmatprep.subr.mxu0 %v4743_v30  ;;  %855 = vmatprep.subr.mxu1 %v4776_v41 }
 0x1b0   : > { %785 = vmatpush1.msra.mxu0 %v4749_v32  ;;  %856 = vmatpush1.msra.mxu1 %v4782_v43 }
 0x1b1   : > { %786 = vmatprep.subr.mxu0 %v4755_v34  ;;  %857 = vmatprep.subr.mxu1 %v4788_v45 }
 0x1b2   : > { %787 = vmatpush1.msra.mxu0 %v4761_v36  ;;  %858 = vmatpush1.msra.mxu1 %v4794_v47 }
 0x1b3   : > { %788 = vmatprep.subr.mxu0 %v4767_v38  ;;  %859 = vmatprep.subr.mxu1 %v4800_v49 }
 0x1b4   : > { %789 = vmatpush1.msra.mxu0 %v4773_v40  ;;  %860 = vmatpush1.msra.mxu1 %v4806_v51 }
 0x1b5   : > { %790 = vmatprep.subr.mxu0 %v4779_v42  ;;  %861 = vmatprep.subr.mxu1 %v4812_v53 }
 0x1b6   : > { %791 = vmatpush1.msra.mxu0 %v6643_v11  ;;  %862 = vmatpush1.msra.mxu1 %v6644_v46 }
 0x1b7   : > { %792 = vmatprep.subr.mxu0 %v6645_v50  ;;  %863 = vmatprep.subr.mxu1 %v6646_v52 }
 0x1b8   : > { %793 = vmatpush1.msra.mxu0 %v6647_v55  ;;  %864 = vmatpush1.msra.mxu1 %v6648_v56  ;;  %v3624_v56 = vld [vmem:[%s4634_s10 + $0x38] sm:$0xff] }
 0x1b9   : > { %794 = vmatprep.subr.mxu0 %v6649_v57  ;;  %865 = vmatprep.subr.mxu1 %v6650_v59 }
 0x1ba   : > { %795 = vmatpush1.msra.mxu0 %v6651_v58  ;;  %866 = vmatpush1.msra.mxu1 %v6652_v60  ;;  %v3622_v60 = vld [vmem:[%s4634_s10 + $0x28] sm:$0xff] }
 0x1bb   : > { %796 = vmatprep.subr.mxu0 %v6653_v54  ;;  %867 = vmatprep.subr.mxu1 %v6654_v0  ;;  %v6662_v54 = vld [vmem:[#allocation18_spill] sm:$0xff]  ;;  %v6663_v0 = vld [vmem:[#allocation19_spill] sm:$0xff] }
 0x1bc   : > { %797 = vmatpush1.msra.mxu0 %v6655_v63  ;;  %868 = vmatpush1.msra.mxu1 %v6656_v1  ;;  %v3621_v63 = vld [vmem:[%s4634_s10 + $0x20] sm:$0xff] }
 0x1bd   : > { %798 = vmatprep.subr.mxu0 %v6657_v61  ;;  %869 = vmatprep.subr.mxu1 %v6658_v62 }
 0x1be   : > { %799 = vmatpush1.msra.mxu0 %v6659_v2  ;;  %832 = vmatprep.mubr.f32.mxu0 %v6660_v6 }
 0x1bf   : > { %870 = vmatpush1.msra.mxu1 %v6661_v48  ;;  %903 = vmatprep.mubr.f32.mxu1 %v6660_v6  ;;  %v3623_v6 = vld [vmem:[%s4634_s10 + $0x30] sm:$0xff] }
 0x1c0   : > { %943 = vmatprep.subr.mxu0 %v6662_v54  ;;  %1014 = vmatprep.subr.mxu1 %v6663_v0 }
 0x25f   : > { %v659_v1 = vpop.f32.mrf.mxu0  ;;  %v730_v2 = vpop.f32.mrf.mxu1 }
 0x260   : > { %v735_v61 = vadd.f32 %v3621_v63, %v659_v1  ;;  %v737_v50 = vadd.f32 %v3623_v6, %v730_v2  ;;  %v6670_v2 = vld [vmem:[#allocation23_spill] sm:$0xff]  ;;  %v6671_v6 = vld [vmem:[#allocation32_spill] sm:$0xff] }
 0x261   : > { %v661_v58 = vpop.f32.mrf.mxu0  ;;  %v732_v48 = vpop.f32.mrf.mxu1 }
 0x262   : > { %v3625_v62 = vmul.f32 -1.442695, %v735_v61  ;;  %v736_v59 = vadd.f32 %v3622_v60, %v661_v58  ;;  %v738_v55 = vadd.f32 %v3624_v56, %v732_v48  ;;  %v6672_v48 = vld [vmem:[#allocation24_spill] sm:$0xff] }
 0x264   : > { %3855 = vpow2.f32 %v3625_v62  ;;  %v3626_v57 = vmul.f32 -1.442695, %v736_v59  ;;  %v3627_v52 = vmul.f32 -1.442695, %v738_v55  ;;  %v6669_v62 = vld [vmem:[#allocation30_spill] sm:$0xff] }
 0x266   : > { %3857 = vpow2.f32 %v3626_v57 }
 0x267   : > { %3859 = vpow2.f32 %v3627_v52 }
 0x271   : > { %v3856_v54 = vpop.eup %3855 }
 0x272   : > { %v742_v46 = vadd.f32 1.0, %v3856_v54 }
 0x273   : > { %v3858_v0 = vpop.eup %3857 }
 0x274   : > { %3861 = vrcp.f32 %v742_v46  ;;  %v748_v11 = vadd.f32 1.0, %v3858_v0  ;;  %v3860_v63 = vpop.eup %3859  ;;  %v6666_v46 = vld [vmem:[#allocation21_spill] sm:$0xff]  ;;  %v6668_v0 = vld [vmem:[#allocation22_spill] sm:$0xff] }
 0x275   : > { %3863 = vtanh.f32 %v737_v50  ;;  %v755_v59 = vadd.f32 1.0, %v3860_v63  ;;  %v6667_v50 = vld [vmem:[#allocation28_spill] sm:$0xff]  ;;  %v6673_v63 = vld [vmem:[#allocation33_spill] sm:$0xff] }
 0x276   : > { %3865 = vrcp.f32 %v748_v11  ;;  %v6665_v11 = vld [vmem:[#allocation26_spill] sm:$0xff] }
 0x277   : > { %3867 = vrcp.f32 %v755_v59  ;;  %v6677_v59 = vld [vmem:[#allocation35_spill] sm:$0xff] }
 0x281   : > { %v3862_v58 = vpop.eup %3861 }
 0x282   : > { %v3864_v60 = vpop.eup %3863 }
 0x283   : > { %v3866_v1 = vpop.eup %3865  ;;  %v759_v57 = vmul.f32 %v3864_v60, %v3862_v58  ;;  %v6674_v58 = vld [vmem:[#allocation25_spill] sm:$0xff]  ;;  %v6675_v60 = vld [vmem:[#allocation34_spill] sm:$0xff] }
 0x284   : > { %v758_v61 = vmul.f32 %v3866_v1, %v4931_v44  ;;  %v3868_v55 = vpop.eup %3867  ;;  %v6664_v44 = vld [vmem:[#allocation20_spill] sm:$0xff]  ;;  %v6676_v1 = vld [vmem:[#allocation27_spill] sm:$0xff] }
 0x286   : > { %v5005_v56 = vadd.f32 %v759_v57, %v758_v61  ;;  %v6678_v57 = vld [vmem:[#allocation29_spill] sm:$0xff]  ;;  %v6679_v61 = vld [vmem:[#allocation36_spill] sm:$0xff] }
 0x288   : > { %3869 = vtanh.f32 %v5005_v56 }
 0x295   : > { %v3870_v54 = vpop.eup %3869 }
 0x296   : > { %v762_v52 = vmul.f32 %v3870_v54, %v3868_v55  ;;  %v6680_v55 = vld [vmem:[#allocation31_spill] sm:$0xff]  ;;  %v6681_v54 = vmov 0.0  }
 0x298   : > { %833 = vmatmul.mubr.f32.vlgmr.msra.gmra.mxu0 %v762_v52  ;;  %904 = vmatmul.mubr.f32.vlgmr.msra.gmra.mxu1 %v762_v52  ;;  %v6682_v52 = vld [vmem:[#allocation37_spill] sm:$0xff] }
 0x299   : > { %944 = vmatpush1.msra.mxu0 %v4667_v3  ;;  %1015 = vmatpush1.msra.mxu1 %v4694_v13 }
 0x29a   : > { %945 = vmatprep.subr.mxu0 %v4669_v4  ;;  %1016 = vmatprep.subr.mxu1 %v4700_v15 }
 0x29b   : > { %946 = vmatpush1.msra.mxu0 %v4672_v5  ;;  %1017 = vmatpush1.msra.mxu1 %v4702_v16 }
 0x29c   : > { %947 = vmatprep.subr.mxu0 %v4676_v7  ;;  %1018 = vmatprep.subr.mxu1 %v4708_v18 }
 0x29d   : > { %948 = vmatpush1.msra.mxu0 %v4680_v8  ;;  %1019 = vmatpush1.msra.mxu1 %v4714_v20 }
 0x29e   : > { %949 = vmatprep.subr.mxu0 %v4683_v9  ;;  %1020 = vmatprep.subr.mxu1 %v4716_v21 }
 0x29f   : > { %950 = vmatpush1.msra.mxu0 %v4686_v10  ;;  %1021 = vmatpush1.msra.mxu1 %v4722_v23 }
 0x2a0   : > { %951 = vmatprep.subr.mxu0 %v4691_v12  ;;  %1022 = vmatprep.subr.mxu1 %v4728_v25 }
 0x2a1   : > { %952 = vmatpush1.msra.mxu0 %v4697_v14  ;;  %1023 = vmatpush1.msra.mxu1 %v4734_v27 }
 0x2a2   : > { %953 = vmatprep.subr.mxu0 %v4705_v17  ;;  %1024 = vmatprep.subr.mxu1 %v4740_v29 }
 0x2a3   : > { %954 = vmatpush1.msra.mxu0 %v4711_v19  ;;  %1025 = vmatpush1.msra.mxu1 %v4746_v31 }
 0x2a4   : > { %955 = vmatprep.subr.mxu0 %v4719_v22  ;;  %1026 = vmatprep.subr.mxu1 %v4752_v33 }
 0x2a5   : > { %956 = vmatpush1.msra.mxu0 %v4725_v24  ;;  %1027 = vmatpush1.msra.mxu1 %v4758_v35 }
 0x2a6   : > { %957 = vmatprep.subr.mxu0 %v4731_v26  ;;  %1028 = vmatprep.subr.mxu1 %v4764_v37 }
 0x2a7   : > { %958 = vmatpush1.msra.mxu0 %v4737_v28  ;;  %1029 = vmatpush1.msra.mxu1 %v4770_v39 }
 0x2a8   : > { %959 = vmatprep.subr.mxu0 %v4743_v30  ;;  %1030 = vmatprep.subr.mxu1 %v4776_v41 }
 0x2a9   : > { %960 = vmatpush1.msra.mxu0 %v4749_v32  ;;  %1031 = vmatpush1.msra.mxu1 %v4782_v43 }
 0x2aa   : > { %961 = vmatprep.subr.mxu0 %v4755_v34  ;;  %1032 = vmatprep.subr.mxu1 %v4788_v45 }
 0x2ab   : > { %962 = vmatpush1.msra.mxu0 %v4761_v36  ;;  %1033 = vmatpush1.msra.mxu1 %v4794_v47 }
 0x2ac   : > { %963 = vmatprep.subr.mxu0 %v4767_v38  ;;  %1034 = vmatprep.subr.mxu1 %v4800_v49 }
 0x2ad   : > { %964 = vmatpush1.msra.mxu0 %v4773_v40  ;;  %1035 = vmatpush1.msra.mxu1 %v4806_v51 }
 0x2ae   : > { %965 = vmatprep.subr.mxu0 %v4779_v42  ;;  %1036 = vmatprep.subr.mxu1 %v4812_v53 }
 0x2af   : > { %966 = vmatpush1.msra.mxu0 %v6664_v44  ;;  %1037 = vmatpush1.msra.mxu1 %v6665_v11 }
 0x2b0   : > { %967 = vmatprep.subr.mxu0 %v6666_v46  ;;  %1038 = vmatprep.subr.mxu1 %v6667_v50 }
 0x2b1   : > { %968 = vmatpush1.msra.mxu0 %v6668_v0  ;;  %1039 = vmatpush1.msra.mxu1 %v6669_v62  ;;  %v3631_v62 = vld [vmem:[%s4634_s10 + $0x58] sm:$0xff] }
 0x2b2   : > { %969 = vmatprep.subr.mxu0 %v6670_v2  ;;  %1040 = vmatprep.subr.mxu1 %v6671_v6 }
 0x2b3   : > { %970 = vmatpush1.msra.mxu0 %v6672_v48  ;;  %1041 = vmatpush1.msra.mxu1 %v6673_v63  ;;  %v3629_v63 = vld [vmem:[%s4634_s10 + $0x48] sm:$0xff] }
 0x2b4   : > { %971 = vmatprep.subr.mxu0 %v6674_v58  ;;  %1042 = vmatprep.subr.mxu1 %v6675_v60  ;;  %v6683_v58 = vld [vmem:[#allocation18_spill] sm:$0xff]  ;;  %v6684_v60 = vld [vmem:[#allocation19_spill] sm:$0xff] }
 0x2b5   : > { %972 = vmatpush1.msra.mxu0 %v6676_v1  ;;  %1043 = vmatpush1.msra.mxu1 %v6677_v59  ;;  %v3628_v1 = vld [vmem:[%s4634_s10 + $0x40] sm:$0xff] }
 0x2b6   : > { %973 = vmatprep.subr.mxu0 %v6678_v57  ;;  %1044 = vmatprep.subr.mxu1 %v6679_v61 }
 0x2b7   : > { %974 = vmatpush1.msra.mxu0 %v6680_v55  ;;  %1007 = vmatprep.mubr.f32.mxu0 %v6681_v54 }
 0x2b8   : > { %1045 = vmatpush1.msra.mxu1 %v6682_v52  ;;  %1078 = vmatprep.mubr.f32.mxu1 %v6681_v54  ;;  %v3630_v54 = vld [vmem:[%s4634_s10 + $0x50] sm:$0xff] }
 0x2b9   : > { %1118 = vmatprep.subr.mxu0 %v6683_v58  ;;  %1189 = vmatprep.subr.mxu1 %v6684_v60 }
 0x358   : > { %v834_v59 = vpop.f32.mrf.mxu0  ;;  %v905_v55 = vpop.f32.mrf.mxu1 }
 0x359   : > { %v910_v57 = vadd.f32 %v3628_v1, %v834_v59  ;;  %v912_v46 = vadd.f32 %v3630_v54, %v905_v55 }
 0x35a   : > { %v836_v48 = vpop.f32.mrf.mxu0  ;;  %v907_v52 = vpop.f32.mrf.mxu1 }
 0x35b   : > { %v3632_v61 = vmul.f32 -1.442695, %v910_v57  ;;  %v911_v6 = vadd.f32 %v3629_v63, %v836_v48  ;;  %v913_v0 = vadd.f32 %v3631_v62, %v907_v52 }
 0x35d   : > { %3871 = vpow2.f32 %v3632_v61  ;;  %v3633_v2 = vmul.f32 -1.442695, %v911_v6  ;;  %v3634_v50 = vmul.f32 -1.442695, %v913_v0 }
 0x35f   : > { %3873 = vpow2.f32 %v3633_v2 }
 0x360   : > { %3875 = vpow2.f32 %v3634_v50 }
 0x36a   : > { %v3872_v58 = vpop.eup %3871 }
 0x36b   : > { %v917_v11 = vadd.f32 1.0, %v3872_v58 }
 0x36c   : > { %v3874_v60 = vpop.eup %3873 }
 0x36d   : > { %3877 = vrcp.f32 %v917_v11  ;;  %v923_v44 = vadd.f32 1.0, %v3874_v60  ;;  %v3876_v1 = vpop.eup %3875 }
 0x36e   : > { %3879 = vtanh.f32 %v912_v46  ;;  %v930_v6 = vadd.f32 1.0, %v3876_v1 }
 0x36f   : > { %3881 = vrcp.f32 %v923_v44 }
 0x370   : > { %3883 = vrcp.f32 %v930_v6  ;;  %v5167_v6 = vld [vmem:[#allocation9 + $0x1d8] sm:$0xff] }
 0x37a   : > { %v3878_v48 = vpop.eup %3877 }
 0x37b   : > { %v3880_v63 = vpop.eup %3879 }
 0x37c   : > { %v3882_v59 = vpop.eup %3881  ;;  %v934_v2 = vmul.f32 %v3880_v63, %v3878_v48  ;;  %v5158_v48 = vld [vmem:[#allocation9 + $0x1e0] sm:$0xff]  ;;  %v5161_v63 = vld [vmem:[#allocation9 + $0x1f0] sm:$0xff] }
 0x37d   : > { %v933_v57 = vmul.f32 %v3882_v59, %v5005_v56  ;;  %v3884_v0 = vpop.eup %3883  ;;  %v5164_v59 = vld [vmem:[#allocation9 + $0x1c8] sm:$0xff] }
 0x37f   : > { %v5079_v62 = vadd.f32 %v934_v2, %v933_v57  ;;  %v5170_v2 = vld [vmem:[#allocation9 + $0x1c0] sm:$0xff]  ;;  %v5173_v57 = vld [vmem:[#allocation9 + $0x1d0] sm:$0xff] }
 0x381   : > { %3885 = vtanh.f32 %v5079_v62 }
 0x38e   : > { %v3886_v61 = vpop.eup %3885 }
 0x38f   : > { %v937_v50 = vmul.f32 %v3886_v61, %v3884_v0  ;;  %v5179_v0 = vld [vmem:[#allocation9 + $0x1b8] sm:$0xff]  ;;  %v5182_v61 = vld [vmem:[#allocation9 + $0x1a0] sm:$0xff] }
 0x391   : > { %1008 = vmatmul.mubr.f32.vlgmr.msra.gmra.mxu0 %v937_v50  ;;  %1079 = vmatmul.mubr.f32.vlgmr.msra.gmra.mxu1 %v937_v50  ;;  %v5185_v50 = vld [vmem:[#allocation9 + $0x1b0] sm:$0xff] }
 0x392   : > { %1119 = vmatpush1.msra.mxu0 %v4667_v3  ;;  %1190 = vmatpush1.msra.mxu1 %v4694_v13  ;;  %v6685_v3 = vld [vmem:[#allocation20_spill] sm:$0xff] }
 0x393   : > { %1120 = vmatprep.subr.mxu0 %v4669_v4  ;;  %1191 = vmatprep.subr.mxu1 %v4700_v15  ;;  %v6686_v4 = vld [vmem:[#allocation26_spill] sm:$0xff]  ;;  %v6693_v13 = vld [vmem:[#allocation24_spill] sm:$0xff]  ;;  %v6695_v15 = vld [vmem:[#allocation25_spill] sm:$0xff] }
 0x394   : > { %1121 = vmatpush1.msra.mxu0 %v4672_v5  ;;  %1192 = vmatpush1.msra.mxu1 %v4702_v16  ;;  %v6687_v5 = vld [vmem:[#allocation21_spill] sm:$0xff]  ;;  %v6696_v16 = vld [vmem:[#allocation34_spill] sm:$0xff] }
 0x395   : > { %1122 = vmatprep.subr.mxu0 %v4676_v7  ;;  %1193 = vmatprep.subr.mxu1 %v4708_v18  ;;  %v6688_v7 = vld [vmem:[#allocation28_spill] sm:$0xff]  ;;  %v6698_v18 = vld [vmem:[#allocation35_spill] sm:$0xff] }
 0x396   : > { %1123 = vmatpush1.msra.mxu0 %v4680_v8  ;;  %1194 = vmatpush1.msra.mxu1 %v4714_v20  ;;  %v6689_v8 = vld [vmem:[#allocation22_spill] sm:$0xff]  ;;  %v6700_v20 = vld [vmem:[#allocation36_spill] sm:$0xff] }
 0x397   : > { %1124 = vmatprep.subr.mxu0 %v4683_v9  ;;  %1195 = vmatprep.subr.mxu1 %v4716_v21  ;;  %v6690_v9 = vld [vmem:[#allocation30_spill] sm:$0xff]  ;;  %v6701_v21 = vld [vmem:[#allocation31_spill] sm:$0xff] }
 0x398   : > { %1125 = vmatpush1.msra.mxu0 %v4686_v10  ;;  %1196 = vmatpush1.msra.mxu1 %v4722_v23  ;;  %v6691_v10 = vld [vmem:[#allocation23_spill] sm:$0xff]  ;;  %v6703_v23 = vld [vmem:[#allocation37_spill] sm:$0xff] }
 0x399   : > { %1126 = vmatprep.subr.mxu0 %v4691_v12  ;;  %1197 = vmatprep.subr.mxu1 %v4728_v25  ;;  %v6692_v12 = vld [vmem:[#allocation32_spill] sm:$0xff]  ;;  %v6705_v25 = vld [vmem:[#allocation19_spill] sm:$0xff] }
 0x39a   : > { %1127 = vmatpush1.msra.mxu0 %v4697_v14  ;;  %1198 = vmatpush1.msra.mxu1 %v4734_v27  ;;  %v6694_v14 = vld [vmem:[#allocation33_spill] sm:$0xff] }
 0x39b   : > { %1128 = vmatprep.subr.mxu0 %v4705_v17  ;;  %1199 = vmatprep.subr.mxu1 %v4740_v29  ;;  %v6697_v17 = vld [vmem:[#allocation27_spill] sm:$0xff] }
 0x39c   : > { %1129 = vmatpush1.msra.mxu0 %v4711_v19  ;;  %1200 = vmatpush1.msra.mxu1 %v4746_v31  ;;  %v6699_v19 = vld [vmem:[#allocation29_spill] sm:$0xff] }
 0x39d   : > { %1130 = vmatprep.subr.mxu0 %v4719_v22  ;;  %1201 = vmatprep.subr.mxu1 %v4752_v33  ;;  %v6702_v22 = vmov 0.0  }
 0x39e   : > { %1131 = vmatpush1.msra.mxu0 %v4725_v24  ;;  %1202 = vmatpush1.msra.mxu1 %v4758_v35  ;;  %v5146_v24 = vld [vmem:[#allocation9 + $0x1e8] sm:$0xff]  ;;  %v3638_v35 = vld [vmem:[%s4634_s10 + $0x78] sm:$0xff] }
 0x39f   : > { %1132 = vmatprep.subr.mxu0 %v4731_v26  ;;  %1203 = vmatprep.subr.mxu1 %v4764_v37  ;;  %6704 = vst [vmem:[#allocation18_spill] sm:$0xff] %v5146_v24  ;;  %v3635_v26 = vld [vmem:[%s4634_s10 + $0x60] sm:$0xff] }
 0x3a0   : > { %1133 = vmatpush1.msra.mxu0 %v4737_v28  ;;  %1204 = vmatpush1.msra.mxu1 %v4770_v39  ;;  %v3636_v28 = vld [vmem:[%s4634_s10 + $0x68] sm:$0xff] }
 0x3a1   : > { %1134 = vmatprep.subr.mxu0 %v4743_v30  ;;  %1205 = vmatprep.subr.mxu1 %v4776_v41 }
 0x3a2   : > { %1135 = vmatpush1.msra.mxu0 %v4749_v32  ;;  %1206 = vmatpush1.msra.mxu1 %v4782_v43 }
 0x3a3   : > { %1136 = vmatprep.subr.mxu0 %v4755_v34  ;;  %1207 = vmatprep.subr.mxu1 %v4788_v45 }
 0x3a4   : > { %1137 = vmatpush1.msra.mxu0 %v4761_v36  ;;  %1208 = vmatpush1.msra.mxu1 %v4794_v47 }
 0x3a5   : > { %1138 = vmatprep.subr.mxu0 %v4767_v38  ;;  %1209 = vmatprep.subr.mxu1 %v4800_v49  ;;  %v3637_v38 = vld [vmem:[%s4634_s10 + $0x70] sm:$0xff] }
 0x3a6   : > { %1139 = vmatpush1.msra.mxu0 %v4773_v40  ;;  %1210 = vmatpush1.msra.mxu1 %v4806_v51 }
 0x3a7   : > { %1140 = vmatprep.subr.mxu0 %v4779_v42  ;;  %1211 = vmatprep.subr.mxu1 %v4812_v53 }
 0x3a8   : > { %1141 = vmatpush1.msra.mxu0 %v6685_v3  ;;  %1212 = vmatpush1.msra.mxu1 %v6686_v4  ;;  %v5188_v3 = vld [vmem:[#allocation9 + $0x188] sm:$0xff] }
 0x3a9   : > { %1142 = vmatprep.subr.mxu0 %v6687_v5  ;;  %1213 = vmatprep.subr.mxu1 %v6688_v7  ;;  %v5191_v5 = vld [vmem:[#allocation9 + $0x198] sm:$0xff] }
 0x3aa   : > { %1143 = vmatpush1.msra.mxu0 %v6689_v8  ;;  %1214 = vmatpush1.msra.mxu1 %v6690_v9  ;;  %v5194_v8 = vld [vmem:[#allocation9 + $0x180] sm:$0xff] }
 0x3ab   : > { %1144 = vmatprep.subr.mxu0 %v6691_v10  ;;  %1215 = vmatprep.subr.mxu1 %v6692_v12  ;;  %v5197_v10 = vld [vmem:[#allocation9 + $0x190] sm:$0xff] }
 0x3ac   : > { %1145 = vmatpush1.msra.mxu0 %v6693_v13  ;;  %1216 = vmatpush1.msra.mxu1 %v6694_v14  ;;  %v5200_v13 = vld [vmem:[#allocation9 + $0x168] sm:$0xff] }
 0x3ad   : > { %1146 = vmatprep.subr.mxu0 %v6695_v15  ;;  %1217 = vmatprep.subr.mxu1 %v6696_v16  ;;  %v5203_v15 = vld [vmem:[#allocation9 + $0x178] sm:$0xff] }
 0x3ae   : > { %1147 = vmatpush1.msra.mxu0 %v6697_v17  ;;  %1218 = vmatpush1.msra.mxu1 %v6698_v18  ;;  %v5206_v17 = vld [vmem:[#allocation9 + $0x160] sm:$0xff] }
 0x3af   : > { %1148 = vmatprep.subr.mxu0 %v6699_v19  ;;  %1219 = vmatprep.subr.mxu1 %v6700_v20 }
 0x3b0   : > { %1149 = vmatpush1.msra.mxu0 %v6701_v21  ;;  %1182 = vmatprep.mubr.f32.mxu0 %v6702_v22 }
 0x3b1   : > { %1220 = vmatpush1.msra.mxu1 %v6703_v23  ;;  %1253 = vmatprep.mubr.f32.mxu1 %v6702_v22 }
 0x3b2   : > { %1293 = vmatprep.subr.mxu0 %v5146_v24  ;;  %1364 = vmatprep.subr.mxu1 %v6705_v25  ;;  %v5209_v25 = vld [vmem:[#allocation9 + $0x170] sm:$0xff] }
 0x451   : > { %v1009_v27 = vpop.f32.mrf.mxu0  ;;  %v1080_v33 = vpop.f32.mrf.mxu1 }
 0x452   : > { %v1085_v29 = vadd.f32 %v3635_v26, %v1009_v27  ;;  %v1087_v41 = vadd.f32 %v3637_v38, %v1080_v33  ;;  %v5212_v26 = vld [vmem:[#allocation9 + $0x148] sm:$0xff]  ;;  %v5215_v27 = vld [vmem:[#allocation9 + $0x158] sm:$0xff]  ;;  %v5233_v33 = vld [vmem:[#allocation9 + $0x130] sm:$0xff] }
 0x453   : > { %v1011_v30 = vpop.f32.mrf.mxu0  ;;  %v1082_v36 = vpop.f32.mrf.mxu1  ;;  %v5248_v38 = vld [vmem:[#allocation9 + $0xe8] sm:$0xff] }
 0x454   : > { %v3639_v31 = vmul.f32 -1.442695, %v1085_v29  ;;  %v1086_v32 = vadd.f32 %v3636_v28, %v1011_v30  ;;  %v1088_v37 = vadd.f32 %v3638_v35, %v1082_v36  ;;  %v5218_v28 = vld [vmem:[#allocation9 + $0x140] sm:$0xff]  ;;  %v5221_v29 = vld [vmem:[#allocation9 + $0x150] sm:$0xff]  ;;  %v5224_v30 = vld [vmem:[#allocation9 + $0x128] sm:$0xff] }
 0x455   : > { %v5239_v35 = vld [vmem:[#allocation9 + $0x118] sm:$0xff]  ;;  %v5242_v36 = vld [vmem:[#allocation9 + $0x100] sm:$0xff] }
 0x456   : > { %3887 = vpow2.f32 %v3639_v31  ;;  %v3640_v34 = vmul.f32 -1.442695, %v1086_v32  ;;  %v3641_v39 = vmul.f32 -1.442695, %v1088_v37  ;;  %v5227_v31 = vld [vmem:[#allocation9 + $0x138] sm:$0xff]  ;;  %v5230_v32 = vld [vmem:[#allocation9 + $0x120] sm:$0xff] }
 0x457   : > { %v5245_v37 = vld [vmem:[#allocation9 + $0x110] sm:$0xff] }
 0x458   : > { %3889 = vpow2.f32 %v3640_v34  ;;  %v5236_v34 = vld [vmem:[#allocation9 + $0x108] sm:$0xff] }
 0x459   : > { %3891 = vpow2.f32 %v3641_v39  ;;  %v5251_v39 = vld [vmem:[#allocation9 + $0xf8] sm:$0xff] }
 0x463   : > { %v3888_v40 = vpop.eup %3887 }
 0x464   : > { %v1092_v42 = vadd.f32 1.0, %v3888_v40  ;;  %v5254_v40 = vld [vmem:[#allocation9 + $0xe0] sm:$0xff] }
 0x465   : > { %v3890_v43 = vpop.eup %3889 }
 0x466   : > { %3893 = vrcp.f32 %v1092_v42  ;;  %v1098_v45 = vadd.f32 1.0, %v3890_v43  ;;  %v3892_v47 = vpop.eup %3891  ;;  %v5260_v42 = vld [vmem:[#allocation9 + $0xc8] sm:$0xff]  ;;  %v5263_v43 = vld [vmem:[#allocation9 + $0xd8] sm:$0xff] }
 0x467   : > { %3895 = vtanh.f32 %v1087_v41  ;;  %v1105_v46 = vadd.f32 1.0, %v3892_v47  ;;  %v5257_v41 = vld [vmem:[#allocation9 + $0xf0] sm:$0xff] }
 0x468   : > { %3897 = vrcp.f32 %v1098_v45  ;;  %v5266_v45 = vld [vmem:[#allocation9 + $0xc0] sm:$0xff]  ;;  %v5269_v47 = vld [vmem:[#allocation9 + $0xd0] sm:$0xff] }
 0x469   : > { %3899 = vrcp.f32 %v1105_v46  ;;  %v5284_v46 = vld [vmem:[#allocation9 + $0x80] sm:$0xff] }
 0x46a   : > { %6706 = vst [vmem:[#allocation20_spill] sm:$0xff] %v5284_v46 }
 0x473   : > { %v3894_v56 = vpop.eup %3893 }
 0x474   : > { %v3896_v44 = vpop.eup %3895 }
 0x475   : > { %v3898_v11 = vpop.eup %3897  ;;  %v1109_v60 = vmul.f32 %v3896_v44, %v3894_v56  ;;  %v5272_v56 = vld [vmem:[#allocation9 + $0xa8] sm:$0xff]  ;;  %v5276_v44 = vld [vmem:[#allocation9 + $0xa0] sm:$0xff] }
 0x476   : > { %v1108_v55 = vmul.f32 %v3898_v11, %v5079_v62  ;;  %v3900_v52 = vpop.eup %3899  ;;  %v5176_v62 = vld [vmem:[#allocation9 + $0x1a8] sm:$0xff] }
 0x477   : > { %v5280_v11 = vld [vmem:[#allocation9 + $0x88] sm:$0xff] }
 0x478   : > { %v5155_v54 = vadd.f32 %v1109_v60, %v1108_v55  ;;  %v5288_v60 = vld [vmem:[#allocation9 + $0x68] sm:$0xff] }
 0x479   : > { %6707 = vst [vmem:[#allocation26_spill] sm:$0xff] %v5288_v60 }
 0x47a   : > { %3901 = vtanh.f32 %v5155_v54 }
 0x487   : > { %v3902_v58 = vpop.eup %3901 }
 0x488   : > { %v1112_v1 = vmul.f32 %v3902_v58, %v3900_v52  ;;  %v3645_v52 = vld [vmem:[%s4634_s10 + $0x98] sm:$0xff] }
 0x48a   : > { %1183 = vmatmul.mubr.f32.vlgmr.msra.gmra.mxu0 %v1112_v1  ;;  %1254 = vmatmul.mubr.f32.vlgmr.msra.gmra.mxu1 %v1112_v1 }
 0x48b   : > { %1294 = vmatpush1.msra.mxu0 %v5158_v48  ;;  %1365 = vmatpush1.msra.mxu1 %v5161_v63 }
 0x48c   : > { %1295 = vmatprep.subr.mxu0 %v5164_v59  ;;  %1366 = vmatprep.subr.mxu1 %v5167_v6 }
 0x48d   : > { %1296 = vmatpush1.msra.mxu0 %v5170_v2  ;;  %1367 = vmatpush1.msra.mxu1 %v5173_v57 }
 0x48e   : > { %1297 = vmatprep.subr.mxu0 %v5176_v62  ;;  %1368 = vmatprep.subr.mxu1 %v5179_v0 }
 0x48f   : > { %1298 = vmatpush1.msra.mxu0 %v5182_v61  ;;  %1369 = vmatpush1.msra.mxu1 %v5185_v50 }
 0x490   : > { %1299 = vmatprep.subr.mxu0 %v5188_v3  ;;  %1370 = vmatprep.subr.mxu1 %v5191_v5 }
 0x491   : > { %1300 = vmatpush1.msra.mxu0 %v5194_v8  ;;  %1371 = vmatpush1.msra.mxu1 %v5197_v10 }
 0x492   : > { %1301 = vmatprep.subr.mxu0 %v5200_v13  ;;  %1372 = vmatprep.subr.mxu1 %v5203_v15 }
 0x493   : > { %1302 = vmatpush1.msra.mxu0 %v5206_v17  ;;  %1373 = vmatpush1.msra.mxu1 %v5209_v25 }
 0x494   : > { %1303 = vmatprep.subr.mxu0 %v5212_v26  ;;  %1374 = vmatprep.subr.mxu1 %v5215_v27 }
 0x495   : > { %1304 = vmatpush1.msra.mxu0 %v5218_v28  ;;  %1375 = vmatpush1.msra.mxu1 %v5221_v29 }
 0x496   : > { %1305 = vmatprep.subr.mxu0 %v5224_v30  ;;  %1376 = vmatprep.subr.mxu1 %v5227_v31 }
 0x497   : > { %1306 = vmatpush1.msra.mxu0 %v5230_v32  ;;  %1377 = vmatpush1.msra.mxu1 %v5233_v33 }
 0x498   : > { %1307 = vmatprep.subr.mxu0 %v5236_v34  ;;  %1378 = vmatprep.subr.mxu1 %v5239_v35 }
 0x499   : > { %1308 = vmatpush1.msra.mxu0 %v5242_v36  ;;  %1379 = vmatpush1.msra.mxu1 %v5245_v37 }
 0x49a   : > { %1309 = vmatprep.subr.mxu0 %v5248_v38  ;;  %1380 = vmatprep.subr.mxu1 %v5251_v39 }
 0x49b   : > { %1310 = vmatpush1.msra.mxu0 %v5254_v40  ;;  %1381 = vmatpush1.msra.mxu1 %v5257_v41 }
 0x49c   : > { %1311 = vmatprep.subr.mxu0 %v5260_v42  ;;  %1382 = vmatprep.subr.mxu1 %v5263_v43 }
 0x49d   : > { %1312 = vmatpush1.msra.mxu0 %v5266_v45  ;;  %1383 = vmatpush1.msra.mxu1 %v5269_v47 }
 0x49e   : > { %1313 = vmatprep.subr.mxu0 %v5272_v56  ;;  %1384 = vmatprep.subr.mxu1 %v4800_v49  ;;  %v5292_v49 = vld [vmem:[#allocation9 + $0x60] sm:$0xff] }
 0x49f   : > { %1314 = vmatpush1.msra.mxu0 %v5276_v44  ;;  %1385 = vmatpush1.msra.mxu1 %v4806_v51  ;;  %6708 = vst [vmem:[#allocation21_spill] sm:$0xff] %v5292_v49  ;;  %v5296_v51 = vld [vmem:[#allocation9 + $0x48] sm:$0xff] }
 0x4a0   : > { %1315 = vmatprep.subr.mxu0 %v5280_v11  ;;  %1386 = vmatprep.subr.mxu1 %v4812_v53  ;;  %6709 = vst [vmem:[#allocation28_spill] sm:$0xff] %v5296_v51  ;;  %v5300_v53 = vld [vmem:[#allocation9 + $0x40] sm:$0xff] }
 0x4a1   : > { %1316 = vmatpush1.msra.mxu0 %v5284_v46  ;;  %1387 = vmatpush1.msra.mxu1 %v6686_v4  ;;  %6710 = vst [vmem:[#allocation22_spill] sm:$0xff] %v5300_v53  ;;  %v5304_v4 = vld [vmem:[#allocation9 + $0x28] sm:$0xff] }
 0x4a2   : > { %1317 = vmatprep.subr.mxu0 %v5288_v60  ;;  %1388 = vmatprep.subr.mxu1 %v6688_v7  ;;  %6711 = vst [vmem:[#allocation30_spill] sm:$0xff] %v5304_v4  ;;  %v5308_v7 = vld [vmem:[#allocation9 + $0x20] sm:$0xff] }
 0x4a3   : > { %1318 = vmatpush1.msra.mxu0 %v5292_v49  ;;  %1389 = vmatpush1.msra.mxu1 %v6690_v9  ;;  %6712 = vst [vmem:[#allocation23_spill] sm:$0xff] %v5308_v7  ;;  %v5319_v9 = vld [vmem:[#allocation9 + $0x1f8] sm:$0xff] }
 0x4a4   : > { %1319 = vmatprep.subr.mxu0 %v5296_v51  ;;  %1390 = vmatprep.subr.mxu1 %v6692_v12  ;;  %6713 = vst [vmem:[#allocation32_spill] sm:$0xff] %v5319_v9  ;;  %v3642_v12 = vld [vmem:[%s4634_s10 + $0x80] sm:$0xff] }
 0x4a5   : > { %1320 = vmatpush1.msra.mxu0 %v5300_v53  ;;  %1391 = vmatpush1.msra.mxu1 %v6694_v14 }
 0x4a6   : > { %1321 = vmatprep.subr.mxu0 %v5304_v4  ;;  %1392 = vmatprep.subr.mxu1 %v6696_v16  ;;  %v3643_v16 = vld [vmem:[%s4634_s10 + $0x88] sm:$0xff] }
 0x4a7   : > { %1322 = vmatpush1.msra.mxu0 %v5308_v7  ;;  %1393 = vmatpush1.msra.mxu1 %v6698_v18 }
 0x4a8   : > { %1323 = vmatprep.subr.mxu0 %v6699_v19  ;;  %1394 = vmatprep.subr.mxu1 %v6700_v20 }
 0x4a9   : > { %1324 = vmatpush1.msra.mxu0 %v6701_v21  ;;  %1357 = vmatprep.mubr.f32.mxu0 %v6702_v22 }
 0x4aa   : > { %1395 = vmatpush1.msra.mxu1 %v6703_v23  ;;  %1428 = vmatprep.mubr.f32.mxu1 %v6702_v22 }
 0x4ab   : > { %1468 = vmatprep.subr.mxu0 %v5146_v24  ;;  %1539 = vmatprep.subr.mxu1 %v5319_v9  ;;  %v3644_v24 = vld [vmem:[%s4634_s10 + $0x90] sm:$0xff] }
 0x54a   : > { %v1184_v14 = vpop.f32.mrf.mxu0  ;;  %v1255_v55 = vpop.f32.mrf.mxu1 }
 0x54b   : > { %v1260_v18 = vadd.f32 %v3642_v12, %v1184_v14  ;;  %v1262_v4 = vadd.f32 %v3644_v24, %v1255_v55  ;;  %v5389_v55 = vld [vmem:[#allocation9 + $0x70] sm:$0xff] }
 0x54c   : > { %v1186_v19 = vpop.f32.mrf.mxu0  ;;  %v1257_v58 = vpop.f32.mrf.mxu1  ;;  %6716 = vst [vmem:[#allocation25_spill] sm:$0xff] %v5389_v55 }
 0x54d   : > { %v3646_v20 = vmul.f32 -1.442695, %v1260_v18  ;;  %v1261_v21 = vadd.f32 %v3643_v16, %v1186_v19  ;;  %v1263_v1 = vadd.f32 %v3645_v52, %v1257_v58  ;;  %v6717_v52 = vld [vmem:[#allocation28_spill] sm:$0xff]  ;;  %v5393_v58 = vld [vmem:[#allocation9 + $0x58] sm:$0xff] }
 0x54e   : > { %6718 = vst [vmem:[#allocation34_spill] sm:$0xff] %v5393_v58 }
 0x54f   : > { %3903 = vpow2.f32 %v3646_v20  ;;  %v3647_v23 = vmul.f32 -1.442695, %v1261_v21  ;;  %v3648_v22 = vmul.f32 -1.442695, %v1263_v1  ;;  %v6719_v1 = vld [vmem:[#allocation22_spill] sm:$0xff] }
 0x551   : > { %3905 = vpow2.f32 %v3647_v23 }
 0x552   : > { %3907 = vpow2.f32 %v3648_v22 }
 0x55c   : > { %v3904_v7 = vpop.eup %3903 }
 0x55d   : > { %v1267_v53 = vadd.f32 1.0, %v3904_v7 }
 0x55e   : > { %v3906_v9 = vpop.eup %3905 }
 0x55f   : > { %3909 = vrcp.f32 %v1267_v53  ;;  %v1273_v51 = vadd.f32 1.0, %v3906_v9  ;;  %v3908_v12 = vpop.eup %3907  ;;  %v5377_v53 = vld [vmem:[#allocation9 + $0x98] sm:$0xff] }
 0x560   : > { %3911 = vtanh.f32 %v1262_v4  ;;  %v1280_v19 = vadd.f32 1.0, %v3908_v12  ;;  %v5381_v4 = vld [vmem:[#allocation9 + $0x90] sm:$0xff]  ;;  %v5385_v9 = vld [vmem:[#allocation9 + $0x78] sm:$0xff] }
 0x561   : > { %3913 = vrcp.f32 %v1273_v51  ;;  %v5373_v51 = vld [vmem:[#allocation9 + $0xb0] sm:$0xff]  ;;  %6714 = vst [vmem:[#allocation24_spill] sm:$0xff] %v5381_v4  ;;  %6715 = vst [vmem:[#allocation33_spill] sm:$0xff] %v5385_v9 }
 0x562   : > { %3915 = vrcp.f32 %v1280_v19  ;;  %v5397_v12 = vld [vmem:[#allocation9 + $0x50] sm:$0xff] }
 0x563   : > { %6720 = vst [vmem:[#allocation27_spill] sm:$0xff] %v5397_v12  ;;  %v5405_v19 = vld [vmem:[#allocation9 + $0x30] sm:$0xff] }
 0x564   : > { %6724 = vst [vmem:[#allocation29_spill] sm:$0xff] %v5405_v19 }
 0x56c   : > { %v3910_v14 = vpop.eup %3909 }
 0x56d   : > { %v3912_v16 = vpop.eup %3911 }
 0x56e   : > { %v3914_v18 = vpop.eup %3913  ;;  %v1284_v20 = vmul.f32 %v3912_v16, %v3910_v14  ;;  %v6721_v14 = vld [vmem:[#allocation30_spill] sm:$0xff]  ;;  %v5401_v16 = vld [vmem:[#allocation9 + $0x38] sm:$0xff] }
 0x56f   : > { %v1283_v21 = vmul.f32 %v3914_v18, %v5155_v54  ;;  %v3916_v24 = vpop.eup %3915  ;;  %v5369_v54 = vld [vmem:[#allocation9 + $0xb8] sm:$0xff]  ;;  %6722 = vst [vmem:[#allocation35_spill] sm:$0xff] %v5401_v16  ;;  %v6723_v18 = vld [vmem:[#allocation23_spill] sm:$0xff] }
 0x571   : > { %v5327_v23 = vadd.f32 %v1284_v20, %v1283_v21  ;;  %v5408_v20 = vld [vmem:[#allocation9 + $0x8] sm:$0xff]  ;;  %v5411_v21 = vld [vmem:[#allocation9 + $0x18] sm:$0xff] }
 0x572   : > { %6725 = vst [vmem:[#allocation36_spill] sm:$0xff] %v5408_v20  ;;  %6726 = vst [vmem:[#allocation31_spill] sm:$0xff] %v5411_v21 }
 0x573   : > { %3917 = vtanh.f32 %v5327_v23 }
 0x580   : > { %v3918_v7 = vpop.eup %3917 }
 0x581   : > { %v1287_v22 = vmul.f32 %v3918_v7, %v3916_v24  ;;  %v5414_v24 = vld [vmem:[#allocation9] sm:$0xff]  ;;  %v6728_v7 = vmov 0.0  }
 0x582   : > { %6727 = vst [vmem:[#allocation37_spill] sm:$0xff] %v5414_v24 }
 0x583   : > { %1358 = vmatmul.mubr.f32.vlgmr.msra.gmra.mxu0 %v1287_v22  ;;  %1429 = vmatmul.mubr.f32.vlgmr.msra.gmra.mxu1 %v1287_v22  ;;  %v5418_v22 = vld [vmem:[#allocation9 + $0x10] sm:$0xff] }
 0x584   : > { %1469 = vmatpush1.msra.mxu0 %v5158_v48  ;;  %1540 = vmatpush1.msra.mxu1 %v5161_v63  ;;  %6729 = vst [vmem:[#allocation19_spill] sm:$0xff] %v5418_v22 }
 0x585   : > { %1470 = vmatprep.subr.mxu0 %v5164_v59  ;;  %1541 = vmatprep.subr.mxu1 %v5167_v6 }
 0x586   : > { %1471 = vmatpush1.msra.mxu0 %v5170_v2  ;;  %1542 = vmatpush1.msra.mxu1 %v5173_v57 }
 0x587   : > { %1472 = vmatprep.subr.mxu0 %v5176_v62  ;;  %1543 = vmatprep.subr.mxu1 %v5179_v0 }
 0x588   : > { %1473 = vmatpush1.msra.mxu0 %v5182_v61  ;;  %1544 = vmatpush1.msra.mxu1 %v5185_v50 }
 0x589   : > { %1474 = vmatprep.subr.mxu0 %v5188_v3  ;;  %1545 = vmatprep.subr.mxu1 %v5191_v5 }
 0x58a   : > { %1475 = vmatpush1.msra.mxu0 %v5194_v8  ;;  %1546 = vmatpush1.msra.mxu1 %v5197_v10 }
 0x58b   : > { %1476 = vmatprep.subr.mxu0 %v5200_v13  ;;  %1547 = vmatprep.subr.mxu1 %v5203_v15 }
 0x58c   : > { %1477 = vmatpush1.msra.mxu0 %v5206_v17  ;;  %1548 = vmatpush1.msra.mxu1 %v5209_v25 }
 0x58d   : > { %1478 = vmatprep.subr.mxu0 %v5212_v26  ;;  %1549 = vmatprep.subr.mxu1 %v5215_v27 }
 0x58e   : > { %1479 = vmatpush1.msra.mxu0 %v5218_v28  ;;  %1550 = vmatpush1.msra.mxu1 %v5221_v29 }
 0x58f   : > { %1480 = vmatprep.subr.mxu0 %v5224_v30  ;;  %1551 = vmatprep.subr.mxu1 %v5227_v31 }
 0x590   : > { %1481 = vmatpush1.msra.mxu0 %v5230_v32  ;;  %1552 = vmatpush1.msra.mxu1 %v5233_v33 }
 0x591   : > { %1482 = vmatprep.subr.mxu0 %v5236_v34  ;;  %1553 = vmatprep.subr.mxu1 %v5239_v35 }
 0x592   : > { %1483 = vmatpush1.msra.mxu0 %v5242_v36  ;;  %1554 = vmatpush1.msra.mxu1 %v5245_v37 }
 0x593   : > { %1484 = vmatprep.subr.mxu0 %v5248_v38  ;;  %1555 = vmatprep.subr.mxu1 %v5251_v39 }
 0x594   : > { %1485 = vmatpush1.msra.mxu0 %v5254_v40  ;;  %1556 = vmatpush1.msra.mxu1 %v5257_v41 }
 0x595   : > { %1486 = vmatprep.subr.mxu0 %v5260_v42  ;;  %1557 = vmatprep.subr.mxu1 %v5263_v43 }
 0x596   : > { %1487 = vmatpush1.msra.mxu0 %v5266_v45  ;;  %1558 = vmatpush1.msra.mxu1 %v5269_v47 }
 0x597   : > { %1488 = vmatprep.subr.mxu0 %v5272_v56  ;;  %1559 = vmatprep.subr.mxu1 %v5369_v54 }
 0x598   : > { %1489 = vmatpush1.msra.mxu0 %v5276_v44  ;;  %1560 = vmatpush1.msra.mxu1 %v5373_v51 }
 0x599   : > { %1490 = vmatprep.subr.mxu0 %v5280_v11  ;;  %1561 = vmatprep.subr.mxu1 %v5377_v53 }
 0x59a   : > { %1491 = vmatpush1.msra.mxu0 %v5284_v46  ;;  %1562 = vmatpush1.msra.mxu1 %v5381_v4 }
 0x59b   : > { %1492 = vmatprep.subr.mxu0 %v5288_v60  ;;  %1563 = vmatprep.subr.mxu1 %v5385_v9 }
 0x59c   : > { %1493 = vmatpush1.msra.mxu0 %v5292_v49  ;;  %1564 = vmatpush1.msra.mxu1 %v5389_v55  ;;  %v3652_v55 = vld [vmem:[%s4634_s10 + $0xb8] sm:$0xff] }
 0x59d   : > { %1494 = vmatprep.subr.mxu0 %v6717_v52  ;;  %1565 = vmatprep.subr.mxu1 %v5393_v58 }
 0x59e   : > { %1495 = vmatpush1.msra.mxu0 %v6719_v1  ;;  %1566 = vmatpush1.msra.mxu1 %v5397_v12 }
 0x59f   : > { %1496 = vmatprep.subr.mxu0 %v6721_v14  ;;  %1567 = vmatprep.subr.mxu1 %v5401_v16  ;;  %v3650_v16 = vld [vmem:[%s4634_s10 + $0xa8] sm:$0xff] }
 0x5a0   : > { %1497 = vmatpush1.msra.mxu0 %v6723_v18  ;;  %1568 = vmatpush1.msra.mxu1 %v5405_v19  ;;  %v6730_v19 = vld [vmem:[#allocation18_spill] sm:$0xff] }
 0x5a1   : > { %1498 = vmatprep.subr.mxu0 %v5408_v20  ;;  %1569 = vmatprep.subr.mxu1 %v5411_v21  ;;  %v6731_v20 = vld [vmem:[#allocation32_spill] sm:$0xff]  ;;  %v3649_v18 = vld [vmem:[%s4634_s10 + $0xa0] sm:$0xff] }
 0x5a2   : > { %1499 = vmatpush1.msra.mxu0 %v5414_v24  ;;  %1532 = vmatprep.mubr.f32.mxu0 %v6728_v7 }
 0x5a3   : > { %1570 = vmatpush1.msra.mxu1 %v5418_v22  ;;  %1603 = vmatprep.mubr.f32.mxu1 %v6728_v7  ;;  %v3651_v7 = vld [vmem:[%s4634_s10 + $0xb0] sm:$0xff] }
 0x5a4   : > { %1643 = vmatprep.subr.mxu0 %v6730_v19  ;;  %1714 = vmatprep.subr.mxu1 %v6731_v20 }
 0x643   : > { %v1359_v21 = vpop.f32.mrf.mxu0  ;;  %v1430_v58 = vpop.f32.mrf.mxu1 }
 0x644   : > { %v1435_v14 = vadd.f32 %v3649_v18, %v1359_v21  ;;  %v1437_v60 = vadd.f32 %v3651_v7, %v1430_v58  ;;  %v3663_v7 = vld [vmem:[%s4634_s10 + $0xe0] sm:$0xff] }
 0x645   : > { %v1361_v12 = vpop.f32.mrf.mxu0  ;;  %v1432_v22 = vpop.f32.mrf.mxu1 }
 0x646   : > { %v3653_v24 = vmul.f32 -1.442695, %v1435_v14  ;;  %v1436_v1 = vadd.f32 %v3650_v16, %v1361_v12  ;;  %v1438_v49 = vadd.f32 %v3652_v55, %v1432_v22 }
 0x648   : > { %3919 = vpow2.f32 %v3653_v24  ;;  %v3654_v52 = vmul.f32 -1.442695, %v1436_v1  ;;  %v3655_v9 = vmul.f32 -1.442695, %v1438_v49 }
 0x64a   : > { %3921 = vpow2.f32 %v3654_v52 }
 0x64b   : > { %3923 = vpow2.f32 %v3655_v9 }
 0x655   : > { %v3920_v19 = vpop.eup %3919 }
 0x656   : > { %v1442_v4 = vadd.f32 1.0, %v3920_v19  ;;  %v3664_v19 = vld [vmem:[%s4634_s10 + $0xe8] sm:$0xff] }
 0x657   : > { %v3922_v20 = vpop.eup %3921 }
 0x658   : > { %3925 = vrcp.f32 %v1442_v4  ;;  %v1448_v46 = vadd.f32 1.0, %v3922_v20  ;;  %v3924_v14 = vpop.eup %3923 }
 0x659   : > { %3927 = vtanh.f32 %v1437_v60  ;;  %v1455_v1 = vadd.f32 1.0, %v3924_v14 }
 0x65a   : > { %3929 = vrcp.f32 %v1448_v46 }
 0x65b   : > { %3931 = vrcp.f32 %v1455_v1 }
 0x665   : > { %v3926_v12 = vpop.eup %3925 }
 0x666   : > { %v3928_v16 = vpop.eup %3927 }
 0x667   : > { %v3930_v18 = vpop.eup %3929  ;;  %v1459_v52 = vmul.f32 %v3928_v16, %v3926_v12 }
 0x668   : > { %v1458_v21 = vmul.f32 %v3930_v18, %v5327_v23  ;;  %v3932_v49 = vpop.eup %3931 }
 0x66a   : > { %v5429_v55 = vadd.f32 %v1459_v52, %v1458_v21  ;;  %v3666_v52 = vld [vmem:[%s4634_s10 + $0xf8] sm:$0xff] }
 0x66c   : > { %3933 = vtanh.f32 %v5429_v55 }
 0x679   : > { %v3934_v58 = vpop.eup %3933 }
 0x67a   : > { %v1462_v9 = vmul.f32 %v3934_v58, %v3932_v49  ;;  %v3665_v49 = vld [vmem:[%s4634_s10 + $0xf0] sm:$0xff] }
 0x67c   : > { %1533 = vmatmul.mubr.f32.vlgmr.msra.gmra.mxu0 %v1462_v9  ;;  %1604 = vmatmul.mubr.f32.vlgmr.msra.gmra.mxu1 %v1462_v9 }
 0x67d   : > { %1644 = vmatpush1.msra.mxu0 %v5158_v48  ;;  %1715 = vmatpush1.msra.mxu1 %v5161_v63  ;;  %v6732_v48 = vld [vmem:[#allocation20_spill] sm:$0xff] }
 0x67e   : > { %1645 = vmatprep.subr.mxu0 %v5164_v59  ;;  %1716 = vmatprep.subr.mxu1 %v5167_v6  ;;  %v6733_v63 = vld [vmem:[#allocation24_spill] sm:$0xff]  ;;  %v6734_v59 = vld [vmem:[#allocation26_spill] sm:$0xff]  ;;  %v6735_v6 = vld [vmem:[#allocation33_spill] sm:$0xff] }
 0x67f   : > { %1646 = vmatpush1.msra.mxu0 %v5170_v2  ;;  %1717 = vmatpush1.msra.mxu1 %v5173_v57  ;;  %v6736_v2 = vld [vmem:[#allocation21_spill] sm:$0xff] }
 0x680   : > { %1647 = vmatprep.subr.mxu0 %v5176_v62  ;;  %1718 = vmatprep.subr.mxu1 %v5179_v0  ;;  %v6737_v57 = vld [vmem:[#allocation25_spill] sm:$0xff]  ;;  %v6738_v62 = vld [vmem:[#allocation28_spill] sm:$0xff]  ;;  %v6739_v0 = vld [vmem:[#allocation34_spill] sm:$0xff] }
 0x681   : > { %1648 = vmatpush1.msra.mxu0 %v5182_v61  ;;  %1719 = vmatpush1.msra.mxu1 %v5185_v50  ;;  %v6740_v61 = vld [vmem:[#allocation22_spill] sm:$0xff]  ;;  %v6741_v50 = vld [vmem:[#allocation27_spill] sm:$0xff] }
 0x682   : > { %1649 = vmatprep.subr.mxu0 %v5188_v3  ;;  %1720 = vmatprep.subr.mxu1 %v5191_v5  ;;  %v6742_v3 = vld [vmem:[#allocation30_spill] sm:$0xff]  ;;  %v6743_v5 = vld [vmem:[#allocation35_spill] sm:$0xff] }
 0x683   : > { %1650 = vmatpush1.msra.mxu0 %v5194_v8  ;;  %1721 = vmatpush1.msra.mxu1 %v5197_v10  ;;  %v6744_v8 = vld [vmem:[#allocation23_spill] sm:$0xff]  ;;  %v6745_v10 = vld [vmem:[#allocation29_spill] sm:$0xff] }
 0x684   : > { %1651 = vmatprep.subr.mxu0 %v5200_v13  ;;  %1722 = vmatprep.subr.mxu1 %v5203_v15  ;;  %v6746_v13 = vld [vmem:[#allocation36_spill] sm:$0xff]  ;;  %v6747_v15 = vld [vmem:[#allocation31_spill] sm:$0xff] }
 0x685   : > { %1652 = vmatpush1.msra.mxu0 %v5206_v17  ;;  %1723 = vmatpush1.msra.mxu1 %v5209_v25  ;;  %v6748_v17 = vld [vmem:[#allocation37_spill] sm:$0xff]  ;;  %v6749_v25 = vmov 0.0  }
 0x686   : > { %1653 = vmatprep.subr.mxu0 %v5212_v26  ;;  %1724 = vmatprep.subr.mxu1 %v5215_v27  ;;  %v6750_v26 = vld [vmem:[#allocation19_spill] sm:$0xff]  ;;  %v3656_v27 = vld [vmem:[%s4634_s10 + $0xc0] sm:$0xff] }
 0x687   : > { %1654 = vmatpush1.msra.mxu0 %v5218_v28  ;;  %1725 = vmatpush1.msra.mxu1 %v5221_v29  ;;  %v3657_v29 = vld [vmem:[%s4634_s10 + $0xc8] sm:$0xff] }
 0x688   : > { %1655 = vmatprep.subr.mxu0 %v5224_v30  ;;  %1726 = vmatprep.subr.mxu1 %v5227_v31 }
 0x689   : > { %1656 = vmatpush1.msra.mxu0 %v5230_v32  ;;  %1727 = vmatpush1.msra.mxu1 %v5233_v33 }
 0x68a   : > { %1657 = vmatprep.subr.mxu0 %v5236_v34  ;;  %1728 = vmatprep.subr.mxu1 %v5239_v35 }
 0x68b   : > { %1658 = vmatpush1.msra.mxu0 %v5242_v36  ;;  %1729 = vmatpush1.msra.mxu1 %v5245_v37  ;;  %v3659_v36 = vld [vmem:[%s4634_s10 + $0xd8] sm:$0xff] }
 0x68c   : > { %1659 = vmatprep.subr.mxu0 %v5248_v38  ;;  %1730 = vmatprep.subr.mxu1 %v5251_v39  ;;  %v3658_v39 = vld [vmem:[%s4634_s10 + $0xd0] sm:$0xff] }
 0x68d   : > { %1660 = vmatpush1.msra.mxu0 %v5254_v40  ;;  %1731 = vmatpush1.msra.mxu1 %v5257_v41 }
 0x68e   : > { %1661 = vmatprep.subr.mxu0 %v5260_v42  ;;  %1732 = vmatprep.subr.mxu1 %v5263_v43 }
 0x68f   : > { %1662 = vmatpush1.msra.mxu0 %v5266_v45  ;;  %1733 = vmatpush1.msra.mxu1 %v5269_v47 }
 0x690   : > { %1663 = vmatprep.subr.mxu0 %v5272_v56  ;;  %1734 = vmatprep.subr.mxu1 %v5369_v54 }
 0x691   : > { %1664 = vmatpush1.msra.mxu0 %v5276_v44  ;;  %1735 = vmatpush1.msra.mxu1 %v5373_v51 }
 0x692   : > { %1665 = vmatprep.subr.mxu0 %v5280_v11  ;;  %1736 = vmatprep.subr.mxu1 %v5377_v53 }
 0x693   : > { %1666 = vmatpush1.msra.mxu0 %v6732_v48  ;;  %1737 = vmatpush1.msra.mxu1 %v6733_v63 }
 0x694   : > { %1667 = vmatprep.subr.mxu0 %v6734_v59  ;;  %1738 = vmatprep.subr.mxu1 %v6735_v6 }
 0x695   : > { %1668 = vmatpush1.msra.mxu0 %v6736_v2  ;;  %1739 = vmatpush1.msra.mxu1 %v6737_v57 }
 0x696   : > { %1669 = vmatprep.subr.mxu0 %v6738_v62  ;;  %1740 = vmatprep.subr.mxu1 %v6739_v0 }
 0x697   : > { %1670 = vmatpush1.msra.mxu0 %v6740_v61  ;;  %1741 = vmatpush1.msra.mxu1 %v6741_v50 }
 0x698   : > { %1671 = vmatprep.subr.mxu0 %v6742_v3  ;;  %1742 = vmatprep.subr.mxu1 %v6743_v5 }
 0x699   : > { %1672 = vmatpush1.msra.mxu0 %v6744_v8  ;;  %1743 = vmatpush1.msra.mxu1 %v6745_v10 }
 0x69a   : > { %1673 = vmatprep.subr.mxu0 %v6746_v13  ;;  %1744 = vmatprep.subr.mxu1 %v6747_v15 }
 0x69b   : > { %1674 = vmatpush1.msra.mxu0 %v6748_v17  ;;  %1707 = vmatprep.mubr.f32.mxu0 %v6749_v25 }
 0x69c   : > { %1745 = vmatpush1.msra.mxu1 %v6750_v26  ;;  %1778 = vmatprep.mubr.f32.mxu1 %v6749_v25 }
 0x73c   : > { %v1534_v28 = vpop.f32.mrf.mxu0  ;;  %v1605_v34 = vpop.f32.mrf.mxu1 }
 0x73d   : > { %v1610_v30 = vadd.f32 %v3656_v27, %v1534_v28  ;;  %v1612_v42 = vadd.f32 %v3658_v39, %v1605_v34 }
 0x73e   : > { %v1536_v31 = vpop.f32.mrf.mxu0  ;;  %v1607_v37 = vpop.f32.mrf.mxu1 }
 0x73f   : > { %v3660_v32 = vmul.f32 -1.442695, %v1610_v30  ;;  %v1611_v33 = vadd.f32 %v3657_v29, %v1536_v31  ;;  %v1613_v38 = vadd.f32 %v3659_v36, %v1607_v37 }
 0x741   : > { %3935 = vpow2.f32 %v3660_v32  ;;  %v3661_v35 = vmul.f32 -1.442695, %v1611_v33  ;;  %v3662_v40 = vmul.f32 -1.442695, %v1613_v38 }
 0x743   : > { %3937 = vpow2.f32 %v3661_v35 }
 0x744   : > { %3939 = vpow2.f32 %v3662_v40 }
 0x74e   : > { %v3936_v41 = vpop.eup %3935 }
 0x74f   : > { %v1617_v43 = vadd.f32 1.0, %v3936_v41 }
 0x750   : > { %v3938_v45 = vpop.eup %3937 }
 0x751   : > { %3941 = vrcp.f32 %v1617_v43  ;;  %v1623_v47 = vadd.f32 1.0, %v3938_v45  ;;  %v3940_v56 = vpop.eup %3939 }
 0x752   : > { %3943 = vtanh.f32 %v1612_v42  ;;  %v1630_v60 = vadd.f32 1.0, %v3940_v56 }
 0x753   : > { %3945 = vrcp.f32 %v1623_v47 }
 0x754   : > { %3947 = vrcp.f32 %v1630_v60 }
 0x75e   : > { %v3942_v44 = vpop.eup %3941 }
 0x75f   : > { %v3944_v11 = vpop.eup %3943 }
 0x760   : > { %v3946_v46 = vpop.eup %3945  ;;  %v1634_v23 = vmul.f32 %v3944_v11, %v3942_v44 }
 0x761   : > { %v1633_v54 = vmul.f32 %v3946_v46, %v5429_v55  ;;  %v3948_v53 = vpop.eup %3947 }
 0x763   : > { %v1635_v51 = vadd.f32 %v1634_v23, %v1633_v54 }
 0x765   : > { %3949 = vtanh.f32 %v1635_v51 }
 0x772   : > { %v3950_v4 = vpop.eup %3949 }
 0x773   : > { %v1637_v24 = vmul.f32 %v3950_v4, %v3948_v53 }
 0x775   : > { %1708 = vmatmul.mubr.f32.vlgmr.msra.gmra.mxu0 %v1637_v24  ;;  %1779 = vmatmul.mubr.f32.vlgmr.msra.gmra.mxu1 %v1637_v24 }
 0x835   : > { %v1709_v22 = vpop.f32.mrf.mxu0  ;;  %v1780_v18 = vpop.f32.mrf.mxu1 }
 0x836   : > { %v1785_v20 = vadd.f32 %v3663_v7, %v1709_v22  ;;  %v1787_v48 = vadd.f32 %v3665_v49, %v1780_v18 }
 0x837   : > { %v1711_v14 = vpop.f32.mrf.mxu0  ;;  %v1782_v21 = vpop.f32.mrf.mxu1 }
 0x838   : > { %v3667_v12 = vmul.f32 -1.442695, %v1785_v20  ;;  %v1786_v16 = vadd.f32 %v3664_v19, %v1711_v14  ;;  %v1788_v55 = vadd.f32 %v3666_v52, %v1782_v21 }
 0x83a   : > { %3951 = vpow2.f32 %v3667_v12  ;;  %v3668_v1 = vmul.f32 -1.442695, %v1786_v16  ;;  %v3669_v58 = vmul.f32 -1.442695, %v1788_v55 }
 0x83c   : > { %3953 = vpow2.f32 %v3668_v1 }
 0x83d   : > { %3955 = vpow2.f32 %v3669_v58 }
 0x847   : > { %v3952_v9 = vpop.eup %3951 }
 0x848   : > { %v1792_v63 = vadd.f32 1.0, %v3952_v9 }
 0x849   : > { %v3954_v59 = vpop.eup %3953 }
 0x84a   : > { %3957 = vrcp.f32 %v1792_v63  ;;  %v1798_v6 = vadd.f32 1.0, %v3954_v59  ;;  %v3956_v2 = vpop.eup %3955 }
 0x84b   : > { %3959 = vtanh.f32 %v1787_v48  ;;  %v1805_v61 = vadd.f32 1.0, %v3956_v2 }
 0x84c   : > { %3961 = vrcp.f32 %v1798_v6 }
 0x84d   : > { %3963 = vrcp.f32 %v1805_v61 }
 0x857   : > { %v3958_v57 = vpop.eup %3957 }
 0x858   : > { %v3960_v62 = vpop.eup %3959 }
 0x859   : > { %v3962_v0 = vpop.eup %3961  ;;  %v1809_v50 = vmul.f32 %v3960_v62, %v3958_v57 }
 0x85a   : > { %v1808_v3 = vmul.f32 %v3962_v0, %v1635_v51  ;;  %v3964_v8 = vpop.eup %3963 }
 0x85c   : > { %v1810_v5 = vadd.f32 %v1809_v50, %v1808_v3 }
 0x85e   : > { %3965 = vtanh.f32 %v1810_v5  ;;  %1814 = vst [vmem:[#allocation3] sm:$0xff] %v1810_v5 }
 0x86b   : > { %v3966_v10 = vpop.eup %3965 }
 0x86c   : > { %v1812_v13 = vmul.f32 %v3966_v10, %v3964_v8 }
 0x86e   : > { %1813 = vst [vmem:[#allocation2] sm:$0xff] %v1812_v13 }
 0x86f PF: > { %p3670_p6 = scmp.lt.s32.totalorder %s4433_s19, 1 }
 0x871   : > { %1818 = sbr.rel (%p3670_p6) target bundleno = 4192 (0x1060), region = 68 }
 0x876   : > { %v5506_v15 = vld [vmem:[#allocation10 + $0x1e8] sm:$0xff]  ;;  %v5508_v17 = vld [vmem:[#allocation10 + $0x1e0] sm:$0xff]  ;;  %v6507_v27 = vmov 0.0   ;;  %v5529_v32 = vld [vmem:[#allocation10 + $0x1f8] sm:$0xff] }
 0x877   : > { %6751 = vst [vmem:[#allocation38_spill] sm:$0xff] %v5506_v15  ;;  %v5510_v25 = vld [vmem:[#allocation10 + $0x1c8] sm:$0xff]  ;;  %1886 = vmatprep.subr.mxu0 %v5506_v15  ;;  %v5513_v26 = vld [vmem:[#allocation10 + $0x1c0] sm:$0xff]  ;;  %1950 = vmatprep.mubr.f32.mxu0 %v6507_v27  ;;  %6752 = vst [vmem:[#allocation39_spill] sm:$0xff] %v5529_v32 }
 0x878   : > { %1887 = vmatpush1.msra.mxu0 %v5508_v17  ;;  %v5517_v28 = vld [vmem:[#allocation10 + $0x1a8] sm:$0xff]  ;;  %2021 = vmatprep.mubr.f32.mxu1 %v6507_v27  ;;  %v5521_v29 = vld [vmem:[#allocation10 + $0x1a0] sm:$0xff]  ;;  %v5535_v34 = vld [vmem:[#allocation10 + $0x1f0] sm:$0xff] }
 0x879   : > { %1888 = vmatprep.subr.mxu0 %v5510_v25  ;;  %v5524_v30 = vld [vmem:[#allocation10 + $0x188] sm:$0xff]  ;;  %v5527_v31 = vld [vmem:[#allocation10 + $0x180] sm:$0xff]  ;;  %1957 = vmatprep.subr.mxu1 %v5529_v32  ;;  %v5541_v36 = vld [vmem:[#allocation10 + $0x1d8] sm:$0xff] }
 0x87a   : > { %1889 = vmatpush1.msra.mxu0 %v5513_v26  ;;  %v5532_v33 = vld [vmem:[#allocation10 + $0x168] sm:$0xff]  ;;  %v5538_v35 = vld [vmem:[#allocation10 + $0x160] sm:$0xff]  ;;  %1958 = vmatpush1.msra.mxu1 %v5535_v34  ;;  %v5543_v37 = vld [vmem:[#allocation10 + $0x1d0] sm:$0xff] }
 0x87b   : > { %1890 = vmatprep.subr.mxu0 %v5517_v28  ;;  %v5546_v38 = vld [vmem:[#allocation10 + $0x148] sm:$0xff]  ;;  %1959 = vmatprep.subr.mxu1 %v5541_v36  ;;  %v5549_v39 = vld [vmem:[#allocation10 + $0x1b8] sm:$0xff]  ;;  %v5552_v40 = vld [vmem:[#allocation10 + $0x140] sm:$0xff] }
 0x87c   : > { %1891 = vmatpush1.msra.mxu0 %v5521_v29  ;;  %1960 = vmatpush1.msra.mxu1 %v5543_v37  ;;  %v5555_v41 = vld [vmem:[#allocation10 + $0x1b0] sm:$0xff]  ;;  %v5557_v42 = vld [vmem:[#allocation10 + $0x198] sm:$0xff]  ;;  %v5560_v43 = vld [vmem:[#allocation10 + $0x128] sm:$0xff] }
 0x87d   : > { %1892 = vmatprep.subr.mxu0 %v5524_v30  ;;  %1961 = vmatprep.subr.mxu1 %v5549_v39  ;;  %v5563_v45 = vld [vmem:[#allocation10 + $0x190] sm:$0xff]  ;;  %v5566_v47 = vld [vmem:[#allocation10 + $0x120] sm:$0xff]  ;;  %v5569_v56 = vld [vmem:[#allocation10 + $0x178] sm:$0xff] }
 0x87e   : > { %1893 = vmatpush1.msra.mxu0 %v5527_v31  ;;  %1962 = vmatpush1.msra.mxu1 %v5555_v41  ;;  %v5572_v44 = vld [vmem:[#allocation10 + $0x108] sm:$0xff]  ;;  %v5575_v11 = vld [vmem:[#allocation10 + $0x170] sm:$0xff]  ;;  %v5578_v46 = vld [vmem:[#allocation10 + $0x100] sm:$0xff] }
 0x87f   : > { %1894 = vmatprep.subr.mxu0 %v5532_v33  ;;  %1963 = vmatprep.subr.mxu1 %v5557_v42  ;;  %v5581_v60 = vld [vmem:[#allocation10 + $0x158] sm:$0xff]  ;;  %v5584_v23 = vld [vmem:[#allocation10 + $0xe8] sm:$0xff]  ;;  %v5587_v54 = vld [vmem:[#allocation10 + $0x150] sm:$0xff] }
 0x880   : > { %1895 = vmatpush1.msra.mxu0 %v5538_v35  ;;  %1964 = vmatpush1.msra.mxu1 %v5563_v45  ;;  %v5590_v51 = vld [vmem:[#allocation10 + $0xe0] sm:$0xff]  ;;  %v5593_v53 = vld [vmem:[#allocation10 + $0x138] sm:$0xff]  ;;  %v5596_v4 = vld [vmem:[#allocation10 + $0xc8] sm:$0xff] }
 0x881   : > { %1896 = vmatprep.subr.mxu0 %v5546_v38  ;;  %1965 = vmatprep.subr.mxu1 %v5569_v56  ;;  %v5599_v24 = vld [vmem:[#allocation10 + $0x130] sm:$0xff]  ;;  %v5602_v7 = vld [vmem:[#allocation10 + $0xc0] sm:$0xff]  ;;  %v5605_v22 = vld [vmem:[#allocation10 + $0x118] sm:$0xff] }
 0x882   : > { %1897 = vmatpush1.msra.mxu0 %v5552_v40  ;;  %1966 = vmatpush1.msra.mxu1 %v5575_v11  ;;  %v5608_v19 = vld [vmem:[#allocation10 + $0xa8] sm:$0xff]  ;;  %v5611_v20 = vld [vmem:[#allocation10 + $0x110] sm:$0xff]  ;;  %v5614_v14 = vld [vmem:[#allocation10 + $0xa0] sm:$0xff] }
 0x883   : > { %1898 = vmatprep.subr.mxu0 %v5560_v43  ;;  %1967 = vmatprep.subr.mxu1 %v5581_v60  ;;  %v5617_v12 = vld [vmem:[#allocation10 + $0xf8] sm:$0xff]  ;;  %v5620_v16 = vld [vmem:[#allocation10 + $0x88] sm:$0xff]  ;;  %v5623_v18 = vld [vmem:[#allocation10 + $0xf0] sm:$0xff] }
 0x884   : > { %1899 = vmatpush1.msra.mxu0 %v5566_v47  ;;  %1968 = vmatpush1.msra.mxu1 %v5587_v54  ;;  %6753 = vst [vmem:[#allocation40_spill] sm:$0xff] %v5620_v16  ;;  %v5626_v1 = vld [vmem:[#allocation10 + $0x80] sm:$0xff]  ;;  %v5629_v52 = vld [vmem:[#allocation10 + $0xd8] sm:$0xff]  ;;  %v5632_v21 = vld [vmem:[#allocation10 + $0x68] sm:$0xff] }
 0x885   : > { %1900 = vmatprep.subr.mxu0 %v5572_v44  ;;  %1969 = vmatprep.subr.mxu1 %v5593_v53  ;;  %6754 = vst [vmem:[#allocation41_spill] sm:$0xff] %v5626_v1  ;;  %6755 = vst [vmem:[#allocation42_spill] sm:$0xff] %v5632_v21  ;;  %v5635_v55 = vld [vmem:[#allocation10 + $0xd0] sm:$0xff]  ;;  %v5638_v49 = vld [vmem:[#allocation10 + $0x60] sm:$0xff] }
 0x886   : > { %1901 = vmatpush1.msra.mxu0 %v5578_v46  ;;  %1970 = vmatpush1.msra.mxu1 %v5599_v24  ;;  %6756 = vst [vmem:[#allocation43_spill] sm:$0xff] %v5638_v49  ;;  %v5641_v58 = vld [vmem:[#allocation10 + $0xb8] sm:$0xff]  ;;  %v5644_v9 = vld [vmem:[#allocation10 + $0x48] sm:$0xff]  ;;  %v5647_v48 = vld [vmem:[#allocation10 + $0xb0] sm:$0xff] }
 0x887   : > { %1902 = vmatprep.subr.mxu0 %v5584_v23  ;;  %1971 = vmatprep.subr.mxu1 %v5605_v22  ;;  %6757 = vst [vmem:[#allocation44_spill] sm:$0xff] %v5644_v9  ;;  %v5650_v63 = vld [vmem:[#allocation10 + $0x40] sm:$0xff]  ;;  %v5653_v59 = vld [vmem:[#allocation10 + $0x98] sm:$0xff]  ;;  %v5656_v6 = vld [vmem:[#allocation10 + $0x28] sm:$0xff] }
 0x888   : > { %1903 = vmatpush1.msra.mxu0 %v5590_v51  ;;  %1972 = vmatpush1.msra.mxu1 %v5611_v20  ;;  %6758 = vst [vmem:[#allocation45_spill] sm:$0xff] %v5650_v63  ;;  %6759 = vst [vmem:[#allocation46_spill] sm:$0xff] %v5653_v59  ;;  %v5659_v2 = vld [vmem:[#allocation10 + $0x90] sm:$0xff]  ;;  %v5662_v57 = vld [vmem:[#allocation10 + $0x20] sm:$0xff] }
 0x889   : > { %1904 = vmatprep.subr.mxu0 %v5596_v4  ;;  %1973 = vmatprep.subr.mxu1 %v5617_v12  ;;  %6760 = vst [vmem:[#allocation47_spill] sm:$0xff] %v5656_v6  ;;  %6761 = vst [vmem:[#allocation48_spill] sm:$0xff] %v5659_v2  ;;  %v5665_v62 = vld [vmem:[#allocation10 + $0x78] sm:$0xff]  ;;  %v5668_v0 = vld [vmem:[#allocation10 + $0x8] sm:$0xff] }
 0x88a   : > { %1905 = vmatpush1.msra.mxu0 %v5602_v7  ;;  %1974 = vmatpush1.msra.mxu1 %v5623_v18  ;;  %6762 = vst [vmem:[#allocation49_spill] sm:$0xff] %v5662_v57  ;;  %6763 = vst [vmem:[#allocation50_spill] sm:$0xff] %v5665_v62  ;;  %v5671_v61 = vld [vmem:[#allocation10 + $0x70] sm:$0xff]  ;;  %v5674_v50 = vld [vmem:[#allocation10] sm:$0xff] }
 0x88b   : > { %1906 = vmatprep.subr.mxu0 %v5608_v19  ;;  %1975 = vmatprep.subr.mxu1 %v5629_v52  ;;  %6764 = vst [vmem:[#allocation51_spill] sm:$0xff] %v5668_v0  ;;  %6765 = vst [vmem:[#allocation52_spill] sm:$0xff] %v5671_v61  ;;  %v5677_v3 = vld [vmem:[#allocation10 + $0x58] sm:$0xff]  ;;  %v1883_v5 = vld [vmem:[#allocation2] sm:$0xff] }
 0x88c   : > { %1907 = vmatpush1.msra.mxu0 %v5614_v14  ;;  %1976 = vmatpush1.msra.mxu1 %v5635_v55  ;;  %6766 = vst [vmem:[#allocation53_spill] sm:$0xff] %v5674_v50  ;;  %6767 = vst [vmem:[#allocation54_spill] sm:$0xff] %v5677_v3  ;;  %v5681_v8 = vld [vmem:[#allocation10 + $0x50] sm:$0xff]  ;;  %v5685_v10 = vld [vmem:[#allocation10 + $0x38] sm:$0xff] }
 0x88d   : > { %1908 = vmatprep.subr.mxu0 %v5620_v16  ;;  %1977 = vmatprep.subr.mxu1 %v5641_v58  ;;  %6768 = vst [vmem:[#allocation55_spill] sm:$0xff] %v5681_v8  ;;  %6769 = vst [vmem:[#allocation56_spill] sm:$0xff] %v5685_v10  ;;  %v5689_v13 = vld [vmem:[#allocation10 + $0x30] sm:$0xff]  ;;  %v5692_v27 = vld [vmem:[#allocation10 + $0x18] sm:$0xff] }
 0x88e   : > { %1909 = vmatpush1.msra.mxu0 %v5626_v1  ;;  %1978 = vmatpush1.msra.mxu1 %v5647_v48  ;;  %6770 = vst [vmem:[#allocation57_spill] sm:$0xff] %v5689_v13  ;;  %6771 = vst [vmem:[#allocation58_spill] sm:$0xff] %v5692_v27 }
 0x88f   : > { %1910 = vmatprep.subr.mxu0 %v5632_v21  ;;  %1979 = vmatprep.subr.mxu1 %v5653_v59 }
 0x890   : > { %1911 = vmatpush1.msra.mxu0 %v5638_v49  ;;  %1980 = vmatpush1.msra.mxu1 %v5659_v2 }
 0x891   : > { %1912 = vmatprep.subr.mxu0 %v5644_v9  ;;  %1981 = vmatprep.subr.mxu1 %v5665_v62 }
 0x892   : > { %1913 = vmatpush1.msra.mxu0 %v5650_v63  ;;  %1982 = vmatpush1.msra.mxu1 %v5671_v61 }
 0x893   : > { %1914 = vmatprep.subr.mxu0 %v5656_v6  ;;  %1983 = vmatprep.subr.mxu1 %v5677_v3 }
 0x894   : > { %1915 = vmatpush1.msra.mxu0 %v5662_v57  ;;  %1984 = vmatpush1.msra.mxu1 %v5681_v8  ;;  %v5695_v57 = vld [vmem:[#allocation10 + $0x10] sm:$0xff] }
 0x895   : > { %1916 = vmatprep.subr.mxu0 %v5668_v0  ;;  %1985 = vmatprep.subr.mxu1 %v5685_v10  ;;  %6772 = vst [vmem:[#allocation59_spill] sm:$0xff] %v5695_v57 }
 0x896   : > { %1917 = vmatpush1.msra.mxu0 %v5674_v50  ;;  %1986 = vmatpush1.msra.mxu1 %v5689_v13 }
 0x897   : > { %1951 = vmatmul.mubr.f32.vlgmr.msra.gmra.mxu0 %v1883_v5  ;;  %2080 = vmatprep.subr.mxu0 %v5506_v15 }
 0x898   : > { %2081 = vmatpush1.msra.mxu0 %v5508_v17  ;;  %1987 = vmatprep.subr.mxu1 %v5692_v27 }
 0x899   : > { %2082 = vmatprep.subr.mxu0 %v5510_v25  ;;  %1988 = vmatpush1.msra.mxu1 %v5695_v57 }
 0x89a   : > { %2083 = vmatpush1.msra.mxu0 %v5513_v26  ;;  %2022 = vmatmul.mubr.f32.vlgmr.msra.gmra.mxu1 %v1883_v5  ;;  %v6773_v5 = vld [vmem:[#allocation49_spill] sm:$0xff] }
 0x89b   : > { %2151 = vmatprep.subr.mxu1 %v5529_v32  ;;  %2084 = vmatprep.subr.mxu0 %v5517_v28 }
 0x89c   : > { %2152 = vmatpush1.msra.mxu1 %v5535_v34  ;;  %2085 = vmatpush1.msra.mxu0 %v5521_v29 }
 0x89d   : > { %2153 = vmatprep.subr.mxu1 %v5541_v36  ;;  %2086 = vmatprep.subr.mxu0 %v5524_v30 }
 0x89e   : > { %2154 = vmatpush1.msra.mxu1 %v5543_v37  ;;  %2087 = vmatpush1.msra.mxu0 %v5527_v31 }
 0x89f   : > { %2155 = vmatprep.subr.mxu1 %v5549_v39  ;;  %2088 = vmatprep.subr.mxu0 %v5532_v33 }
 0x8a0   : > { %2156 = vmatpush1.msra.mxu1 %v5555_v41  ;;  %2089 = vmatpush1.msra.mxu0 %v5538_v35 }
 0x8a1   : > { %2157 = vmatprep.subr.mxu1 %v5557_v42  ;;  %2090 = vmatprep.subr.mxu0 %v5546_v38 }
 0x8a2   : > { %2158 = vmatpush1.msra.mxu1 %v5563_v45  ;;  %2091 = vmatpush1.msra.mxu0 %v5552_v40 }
 0x8a3   : > { %2159 = vmatprep.subr.mxu1 %v5569_v56  ;;  %2092 = vmatprep.subr.mxu0 %v5560_v43 }
 0x8a4   : > { %2160 = vmatpush1.msra.mxu1 %v5575_v11  ;;  %2093 = vmatpush1.msra.mxu0 %v5566_v47 }
 0x8a5   : > { %2161 = vmatprep.subr.mxu1 %v5581_v60  ;;  %2094 = vmatprep.subr.mxu0 %v5572_v44 }
 0x8a6   : > { %2162 = vmatpush1.msra.mxu1 %v5587_v54  ;;  %2095 = vmatpush1.msra.mxu0 %v5578_v46 }
 0x8a7   : > { %2163 = vmatprep.subr.mxu1 %v5593_v53  ;;  %2096 = vmatprep.subr.mxu0 %v5584_v23 }
 0x8a8   : > { %2164 = vmatpush1.msra.mxu1 %v5599_v24  ;;  %2097 = vmatpush1.msra.mxu0 %v5590_v51 }
 0x8a9   : > { %2165 = vmatprep.subr.mxu1 %v5605_v22  ;;  %2098 = vmatprep.subr.mxu0 %v5596_v4 }
 0x8aa   : > { %2166 = vmatpush1.msra.mxu1 %v5611_v20  ;;  %2099 = vmatpush1.msra.mxu0 %v5602_v7 }
 0x8ab   : > { %2167 = vmatprep.subr.mxu1 %v5617_v12  ;;  %2100 = vmatprep.subr.mxu0 %v5608_v19 }
 0x8ac   : > { %2168 = vmatpush1.msra.mxu1 %v5623_v18  ;;  %2101 = vmatpush1.msra.mxu0 %v5614_v14 }
 0x8ad   : > { %2169 = vmatprep.subr.mxu1 %v5629_v52  ;;  %2102 = vmatprep.subr.mxu0 %v5620_v16 }
 0x8ae   : > { %2170 = vmatpush1.msra.mxu1 %v5635_v55  ;;  %2103 = vmatpush1.msra.mxu0 %v5626_v1 }
 0x8af   : > { %2171 = vmatprep.subr.mxu1 %v5641_v58  ;;  %2104 = vmatprep.subr.mxu0 %v5632_v21 }
 0x8b0   : > { %2172 = vmatpush1.msra.mxu1 %v5647_v48  ;;  %2105 = vmatpush1.msra.mxu0 %v5638_v49 }
 0x8b1   : > { %2173 = vmatprep.subr.mxu1 %v5653_v59  ;;  %2106 = vmatprep.subr.mxu0 %v5644_v9 }
 0x8b2   : > { %2174 = vmatpush1.msra.mxu1 %v5659_v2  ;;  %2107 = vmatpush1.msra.mxu0 %v5650_v63  ;;  %v6774_v63 = vmov 0.0  }
 0x8b3   : > { %2175 = vmatprep.subr.mxu1 %v5665_v62  ;;  %2108 = vmatprep.subr.mxu0 %v5656_v6 }
 0x8b4   : > { %2176 = vmatpush1.msra.mxu1 %v5671_v61  ;;  %2109 = vmatpush1.msra.mxu0 %v6773_v5  ;;  %v2029_v5 = vlaneseq }
 0x8b5   : > { %2177 = vmatprep.subr.mxu1 %v5677_v3  ;;  %2110 = vmatprep.subr.mxu0 %v5668_v0 }
 0x8b6   : > { %2178 = vmatpush1.msra.mxu1 %v5681_v8  ;;  %2111 = vmatpush1.msra.mxu0 %v5674_v50  ;;  %v2030_v0 = vshrl.u32 %v2029_v5, 7 }
 0x8b7   : > { %2179 = vmatprep.subr.mxu1 %v5685_v10  ;;  %2144 = vmatprep.mubr.f32.mxu0 %v6774_v63  ;;  %v1885_v10 = vld [vmem:[%s4645_s25] ss:$8 sm:$0xf] }
 0x8b8   : > { %2180 = vmatpush1.msra.mxu1 %v5689_v13  ;;  %2215 = vmatprep.mubr.f32.mxu1 %v6774_v63  ;;  %v5768_v6 = vsub.s32 0, %v2030_v0  ;;  %v5771_v50 = vsub.s32 1, %v2030_v0  ;;  %v5775_v61 = vsub.s32 3, %v2030_v0  ;;  %v5777_v5 = vsub.s32 2, %v2030_v0 }
 0x8b9   : > { %2181 = vmatprep.subr.mxu1 %v5692_v27  ;;  %2275 = vmatprep.subr.mxu0 %v5506_v15 }
 0x8ba   : > { %2182 = vmatpush1.msra.mxu1 %v5695_v57  ;;  %6775 = vst [vmem:[#allocation60_spill] sm:$0xff] %v5768_v6  ;;  %6776 = vst [vmem:[#allocation61_spill] sm:$0xff] %v5771_v50  ;;  %v2032_v13 = vrot.slane %v1885_v10, %v5768_v6  ;;  %v2036_v8 = vrot.slane %v1885_v10, %v5771_v50  ;;  %v2044_v49 = vrot.slane %v1885_v10, %v5775_v61 }
 0x8bb   : > { %2346 = vmatprep.subr.mxu1 %v5529_v32  ;;  %6777 = vst [vmem:[#allocation62_spill] sm:$0xff] %v5775_v61  ;;  %v2040_v6 = vrot.slane %v1885_v10, %v5777_v5 }
 0x957   : > { %v1952_v27 = vpop.f32.mrf.mxu0 }
 0x958   : > { %v2049_v3 = vadd.f32 %v2032_v13, %v1952_v27 }
 0x959   : > { %v1954_v63 = vpop.f32.mrf.mxu0 }
 0x95a   : > { %v3671_v9 = vmul.f32 -1.442695, %v2049_v3  ;;  %v2050_v57 = vadd.f32 %v2036_v8, %v1954_v63  ;;  %v2023_v15 = vpop.f32.mrf.mxu1  ;;  %v1884_v3 = vld [vmem:[#allocation3] sm:$0xff] }
 0x95b   : > { %v2051_v50 = vadd.f32 %v2040_v6, %v2023_v15 }
 0x95c   : > { %4031 = vpow2.f32 %v3671_v9  ;;  %v3672_v32 = vmul.f32 -1.442695, %v2050_v57  ;;  %v2025_v62 = vpop.f32.mrf.mxu1 }
 0x95d   : > { %v2052_v21 = vadd.f32 %v2044_v49, %v2025_v62  ;;  %v6780_v62 = vld [vmem:[#allocation42_spill] sm:$0xff] }
 0x95e   : > { %4033 = vpow2.f32 %v3672_v32 }
 0x95f   : > { %v3673_v2 = vmul.f32 -1.442695, %v2052_v21  ;;  %4035 = vtanh.f32 %v2051_v50  ;;  %v6782_v50 = vld [vmem:[#allocation43_spill] sm:$0xff] }
 0x961   : > { %4037 = vpow2.f32 %v3673_v2  ;;  %v6779_v2 = vld [vmem:[#allocation48_spill] sm:$0xff] }
 0x969   : > { %v4032_v27 = vpop.eup %4031 }
 0x96a   : > { %v2056_v13 = vadd.f32 1.0, %v4032_v27  ;;  %v6783_v27 = vld [vmem:[#allocation52_spill] sm:$0xff] }
 0x96b   : > { %v4034_v63 = vpop.eup %4033 }
 0x96c   : > { %4039 = vrcp.f32 %v2056_v13  ;;  %v2062_v9 = vadd.f32 1.0, %v4034_v63  ;;  %v4036_v32 = vpop.eup %4035  ;;  %v6784_v13 = vld [vmem:[#allocation44_spill] sm:$0xff]  ;;  %v6785_v63 = vld [vmem:[#allocation54_spill] sm:$0xff] }
 0x96e   : > { %4041 = vrcp.f32 %v2062_v9  ;;  %v4038_v57 = vpop.eup %4037  ;;  %v6786_v9 = vld [vmem:[#allocation45_spill] sm:$0xff] }
 0x96f   : > { %v2069_v61 = vadd.f32 1.0, %v4038_v57  ;;  %v6788_v57 = vld [vmem:[#allocation47_spill] sm:$0xff] }
 0x971   : > { %4043 = vrcp.f32 %v2069_v61  ;;  %v6781_v61 = vld [vmem:[#allocation50_spill] sm:$0xff] }
 0x979   : > { %v4040_v0 = vpop.eup %4039 }
 0x97a   : > { %v2073_v10 = vmul.f32 %v4040_v0, %v4036_v32  ;;  %v6787_v32 = vld [vmem:[#allocation55_spill] sm:$0xff]  ;;  %v6789_v0 = vld [vmem:[#allocation56_spill] sm:$0xff] }
 0x97b   : > { %v4042_v8 = vpop.eup %4041 }
 0x97c   : > { %v2072_v1 = vmul.f32 %v4042_v8, %v1884_v3  ;;  %v6790_v3 = vld [vmem:[#allocation49_spill] sm:$0xff] }
 0x97d   : > { %v6791_v8 = vld [vmem:[#allocation57_spill] sm:$0xff] }
 0x97e   : > { %v5781_v49 = vadd.f32 %v2073_v10, %v2072_v1  ;;  %v4044_v15 = vpop.eup %4043  ;;  %v6778_v1 = vld [vmem:[#allocation41_spill] sm:$0xff]  ;;  %v6792_v10 = vld [vmem:[#allocation51_spill] sm:$0xff] }
 0x980   : > { %4045 = vtanh.f32 %v5781_v49 }
 0x98d   : > { %v4046_v21 = vpop.eup %4045 }
 0x98e   : > { %v2076_v6 = vmul.f32 %v4046_v21, %v4044_v15  ;;  %v6793_v15 = vld [vmem:[#allocation58_spill] sm:$0xff]  ;;  %v6794_v21 = vld [vmem:[#allocation53_spill] sm:$0xff] }
 0x990   : > { %2077 = vst [vmem:[%s4660_s26] sm:$0xff] %v2076_v6  ;;  %2145 = vmatmul.mubr.f32.vlgmr.msra.gmra.mxu0 %v2076_v6  ;;  %2216 = vmatmul.mubr.f32.vlgmr.msra.gmra.mxu1 %v2076_v6  ;;  %v6795_v6 = vmov 0.0  }
 0x991   : > { %2276 = vmatpush1.msra.mxu0 %v5508_v17  ;;  %2347 = vmatpush1.msra.mxu1 %v5535_v34 }
 0x992   : > { %2277 = vmatprep.subr.mxu0 %v5510_v25  ;;  %2348 = vmatprep.subr.mxu1 %v5541_v36 }
 0x993   : > { %2278 = vmatpush1.msra.mxu0 %v5513_v26  ;;  %2349 = vmatpush1.msra.mxu1 %v5543_v37 }
 0x994   : > { %2279 = vmatprep.subr.mxu0 %v5517_v28  ;;  %2350 = vmatprep.subr.mxu1 %v5549_v39 }
 0x995   : > { %2280 = vmatpush1.msra.mxu0 %v5521_v29  ;;  %2351 = vmatpush1.msra.mxu1 %v5555_v41 }
 0x996   : > { %2281 = vmatprep.subr.mxu0 %v5524_v30  ;;  %2352 = vmatprep.subr.mxu1 %v5557_v42 }
 0x997   : > { %2282 = vmatpush1.msra.mxu0 %v5527_v31  ;;  %2353 = vmatpush1.msra.mxu1 %v5563_v45 }
 0x998   : > { %2283 = vmatprep.subr.mxu0 %v5532_v33  ;;  %2354 = vmatprep.subr.mxu1 %v5569_v56 }
 0x999   : > { %2284 = vmatpush1.msra.mxu0 %v5538_v35  ;;  %2355 = vmatpush1.msra.mxu1 %v5575_v11 }
 0x99a   : > { %2285 = vmatprep.subr.mxu0 %v5546_v38  ;;  %2356 = vmatprep.subr.mxu1 %v5581_v60 }
 0x99b   : > { %2286 = vmatpush1.msra.mxu0 %v5552_v40  ;;  %2357 = vmatpush1.msra.mxu1 %v5587_v54 }
 0x99c   : > { %2287 = vmatprep.subr.mxu0 %v5560_v43  ;;  %2358 = vmatprep.subr.mxu1 %v5593_v53 }
 0x99d   : > { %2288 = vmatpush1.msra.mxu0 %v5566_v47  ;;  %2359 = vmatpush1.msra.mxu1 %v5599_v24 }
 0x99e   : > { %2289 = vmatprep.subr.mxu0 %v5572_v44  ;;  %2360 = vmatprep.subr.mxu1 %v5605_v22 }
 0x99f   : > { %2290 = vmatpush1.msra.mxu0 %v5578_v46  ;;  %2361 = vmatpush1.msra.mxu1 %v5611_v20 }
 0x9a0   : > { %2291 = vmatprep.subr.mxu0 %v5584_v23  ;;  %2362 = vmatprep.subr.mxu1 %v5617_v12 }
 0x9a1   : > { %2292 = vmatpush1.msra.mxu0 %v5590_v51  ;;  %2363 = vmatpush1.msra.mxu1 %v5623_v18 }
 0x9a2   : > { %2293 = vmatprep.subr.mxu0 %v5596_v4  ;;  %2364 = vmatprep.subr.mxu1 %v5629_v52 }
 0x9a3   : > { %2294 = vmatpush1.msra.mxu0 %v5602_v7  ;;  %2365 = vmatpush1.msra.mxu1 %v5635_v55 }
 0x9a4   : > { %2295 = vmatprep.subr.mxu0 %v5608_v19  ;;  %2366 = vmatprep.subr.mxu1 %v5641_v58 }
 0x9a5   : > { %2296 = vmatpush1.msra.mxu0 %v5614_v14  ;;  %2367 = vmatpush1.msra.mxu1 %v5647_v48 }
 0x9a6   : > { %2297 = vmatprep.subr.mxu0 %v5620_v16  ;;  %2368 = vmatprep.subr.mxu1 %v5653_v59 }
 0x9a7   : > { %2298 = vmatpush1.msra.mxu0 %v6778_v1  ;;  %2369 = vmatpush1.msra.mxu1 %v6779_v2 }
 0x9a8   : > { %2299 = vmatprep.subr.mxu0 %v6780_v62  ;;  %2370 = vmatprep.subr.mxu1 %v6781_v61 }
 0x9a9   : > { %2300 = vmatpush1.msra.mxu0 %v6782_v50  ;;  %2371 = vmatpush1.msra.mxu1 %v6783_v27 }
 0x9aa   : > { %2301 = vmatprep.subr.mxu0 %v6784_v13  ;;  %2372 = vmatprep.subr.mxu1 %v6785_v63  ;;  %v6796_v63 = vld [vmem:[#allocation59_spill] sm:$0xff] }
 0x9ab   : > { %2302 = vmatpush1.msra.mxu0 %v6786_v9  ;;  %2373 = vmatpush1.msra.mxu1 %v6787_v32  ;;  %v6797_v32 = vld [vmem:[#allocation38_spill] sm:$0xff] }
 0x9ac   : > { %2303 = vmatprep.subr.mxu0 %v6788_v57  ;;  %2374 = vmatprep.subr.mxu1 %v6789_v0  ;;  %v6798_v57 = vld [vmem:[#allocation39_spill] sm:$0xff] }
 0x9ad   : > { %2304 = vmatpush1.msra.mxu0 %v6790_v3  ;;  %2375 = vmatpush1.msra.mxu1 %v6791_v8  ;;  %v3674_v0 = vld [vmem:[%s4645_s25 + $0x1] ss:$8 sm:$0xf] }
 0x9ae   : > { %2305 = vmatprep.subr.mxu0 %v6792_v10  ;;  %2376 = vmatprep.subr.mxu1 %v6793_v15  ;;  %v6799_v3 = vld [vmem:[#allocation60_spill] sm:$0xff]  ;;  %v6800_v8 = vld [vmem:[#allocation61_spill] sm:$0xff] }
 0x9af   : > { %2306 = vmatpush1.msra.mxu0 %v6794_v21  ;;  %2339 = vmatprep.mubr.f32.mxu0 %v6795_v6  ;;  %v2226_v9 = vrot.slane %v3674_v0, %v6799_v3  ;;  %v2230_v13 = vrot.slane %v3674_v0, %v6800_v8 }
 0x9b0   : > { %2377 = vmatpush1.msra.mxu1 %v6796_v63  ;;  %2410 = vmatprep.mubr.f32.mxu1 %v6795_v6  ;;  %v6801_v63 = vld [vmem:[#allocation62_spill] sm:$0xff] }
 0x9b1   : > { %2470 = vmatprep.subr.mxu0 %v6797_v32  ;;  %2541 = vmatprep.subr.mxu1 %v6798_v57  ;;  %v2238_v6 = vrot.slane %v3674_v0, %v6801_v63  ;;  %v2234_v57 = vrot.slane %v3674_v0, %v5777_v5 }
 0xa50   : > { %v2146_v10 = vpop.f32.mrf.mxu0  ;;  %v2217_v61 = vpop.f32.mrf.mxu1 }
 0xa51   : > { %v2243_v27 = vadd.f32 %v2226_v9, %v2146_v10  ;;  %v2245_v3 = vadd.f32 %v2234_v57, %v2217_v61  ;;  %v6803_v61 = vld [vmem:[#allocation46_spill] sm:$0xff]  ;;  %v6805_v57 = vld [vmem:[#allocation48_spill] sm:$0xff] }
 0xa52   : > { %v2148_v15 = vpop.f32.mrf.mxu0  ;;  %v2219_v2 = vpop.f32.mrf.mxu1 }
 0xa53   : > { %v3675_v50 = vmul.f32 -1.442695, %v2243_v27  ;;  %v2244_v21 = vadd.f32 %v2230_v13, %v2148_v15  ;;  %v2246_v32 = vadd.f32 %v2238_v6, %v2219_v2  ;;  %v6809_v6 = vld [vmem:[#allocation52_spill] sm:$0xff] }
 0xa55   : > { %4047 = vpow2.f32 %v3675_v50  ;;  %v3676_v62 = vmul.f32 -1.442695, %v2244_v21  ;;  %v3677_v1 = vmul.f32 -1.442695, %v2246_v32  ;;  %v6804_v32 = vld [vmem:[#allocation41_spill] sm:$0xff]  ;;  %v6808_v21 = vld [vmem:[#allocation43_spill] sm:$0xff] }
 0xa57   : > { %4049 = vpow2.f32 %v3676_v62 }
 0xa58   : > { %4051 = vpow2.f32 %v3677_v1 }
 0xa62   : > { %v4048_v59 = vpop.eup %4047 }
 0xa63   : > { %v2250_v16 = vadd.f32 1.0, %v4048_v59 }
 0xa64   : > { %v4050_v8 = vpop.eup %4049 }
 0xa65   : > { %4053 = vrcp.f32 %v2250_v16  ;;  %v2256_v9 = vadd.f32 1.0, %v4050_v8  ;;  %v4052_v50 = vpop.eup %4051  ;;  %v6807_v8 = vld [vmem:[#allocation50_spill] sm:$0xff] }
 0xa66   : > { %4055 = vtanh.f32 %v2245_v3  ;;  %v2263_v10 = vadd.f32 1.0, %v4052_v50  ;;  %v6806_v3 = vld [vmem:[#allocation42_spill] sm:$0xff] }
 0xa67   : > { %4057 = vrcp.f32 %v2256_v9  ;;  %v6810_v9 = vld [vmem:[#allocation44_spill] sm:$0xff]  ;;  %v6811_v50 = vld [vmem:[#allocation54_spill] sm:$0xff] }
 0xa68   : > { %4059 = vrcp.f32 %v2263_v10  ;;  %v6815_v10 = vld [vmem:[#allocation56_spill] sm:$0xff] }
 0xa72   : > { %v4054_v27 = vpop.eup %4053 }
 0xa73   : > { %v4056_v62 = vpop.eup %4055 }
 0xa74   : > { %v4058_v13 = vpop.eup %4057  ;;  %v2267_v15 = vmul.f32 %v4056_v62, %v4054_v27  ;;  %v6812_v27 = vld [vmem:[#allocation45_spill] sm:$0xff]  ;;  %v6813_v62 = vld [vmem:[#allocation55_spill] sm:$0xff] }
 0xa75   : > { %v2266_v2 = vmul.f32 %v4058_v13, %v5781_v49  ;;  %v4060_v59 = vpop.eup %4059  ;;  %v6802_v49 = vld [vmem:[#allocation40_spill] sm:$0xff]  ;;  %v6814_v13 = vld [vmem:[#allocation47_spill] sm:$0xff] }
 0xa77   : > { %v5857_v0 = vadd.f32 %v2267_v15, %v2266_v2  ;;  %v6816_v15 = vld [vmem:[#allocation49_spill] sm:$0xff] }
 0xa78   : > { %v6817_v2 = vld [vmem:[#allocation57_spill] sm:$0xff] }
 0xa79   : > { %4061 = vtanh.f32 %v5857_v0 }
 0xa86   : > { %v4062_v1 = vpop.eup %4061 }
 0xa87   : > { %v2270_v16 = vmul.f32 %v4062_v1, %v4060_v59  ;;  %v6818_v59 = vld [vmem:[#allocation51_spill] sm:$0xff]  ;;  %v6819_v1 = vld [vmem:[#allocation58_spill] sm:$0xff] }
 0xa89   : > { %3678 = vst [vmem:[%s4660_s26 + $0x8] sm:$0xff] %v2270_v16  ;;  %2340 = vmatmul.mubr.f32.vlgmr.msra.gmra.mxu0 %v2270_v16  ;;  %2411 = vmatmul.mubr.f32.vlgmr.msra.gmra.mxu1 %v2270_v16  ;;  %v6820_v16 = vld [vmem:[#allocation53_spill] sm:$0xff] }
 0xa8a   : > { %2471 = vmatpush1.msra.mxu0 %v5508_v17  ;;  %2542 = vmatpush1.msra.mxu1 %v5535_v34 }
 0xa8b   : > { %2472 = vmatprep.subr.mxu0 %v5510_v25  ;;  %2543 = vmatprep.subr.mxu1 %v5541_v36 }
 0xa8c   : > { %2473 = vmatpush1.msra.mxu0 %v5513_v26  ;;  %2544 = vmatpush1.msra.mxu1 %v5543_v37 }
 0xa8d   : > { %2474 = vmatprep.subr.mxu0 %v5517_v28  ;;  %2545 = vmatprep.subr.mxu1 %v5549_v39 }
 0xa8e   : > { %2475 = vmatpush1.msra.mxu0 %v5521_v29  ;;  %2546 = vmatpush1.msra.mxu1 %v5555_v41 }
 0xa8f   : > { %2476 = vmatprep.subr.mxu0 %v5524_v30  ;;  %2547 = vmatprep.subr.mxu1 %v5557_v42 }
 0xa90   : > { %2477 = vmatpush1.msra.mxu0 %v5527_v31  ;;  %2548 = vmatpush1.msra.mxu1 %v5563_v45 }
 0xa91   : > { %2478 = vmatprep.subr.mxu0 %v5532_v33  ;;  %2549 = vmatprep.subr.mxu1 %v5569_v56 }
 0xa92   : > { %2479 = vmatpush1.msra.mxu0 %v5538_v35  ;;  %2550 = vmatpush1.msra.mxu1 %v5575_v11 }
 0xa93   : > { %2480 = vmatprep.subr.mxu0 %v5546_v38  ;;  %2551 = vmatprep.subr.mxu1 %v5581_v60 }
 0xa94   : > { %2481 = vmatpush1.msra.mxu0 %v5552_v40  ;;  %2552 = vmatpush1.msra.mxu1 %v5587_v54 }
 0xa95   : > { %2482 = vmatprep.subr.mxu0 %v5560_v43  ;;  %2553 = vmatprep.subr.mxu1 %v5593_v53 }
 0xa96   : > { %2483 = vmatpush1.msra.mxu0 %v5566_v47  ;;  %2554 = vmatpush1.msra.mxu1 %v5599_v24 }
 0xa97   : > { %2484 = vmatprep.subr.mxu0 %v5572_v44  ;;  %2555 = vmatprep.subr.mxu1 %v5605_v22 }
 0xa98   : > { %2485 = vmatpush1.msra.mxu0 %v5578_v46  ;;  %2556 = vmatpush1.msra.mxu1 %v5611_v20 }
 0xa99   : > { %2486 = vmatprep.subr.mxu0 %v5584_v23  ;;  %2557 = vmatprep.subr.mxu1 %v5617_v12 }
 0xa9a   : > { %2487 = vmatpush1.msra.mxu0 %v5590_v51  ;;  %2558 = vmatpush1.msra.mxu1 %v5623_v18 }
 0xa9b   : > { %2488 = vmatprep.subr.mxu0 %v5596_v4  ;;  %2559 = vmatprep.subr.mxu1 %v5629_v52 }
 0xa9c   : > { %2489 = vmatpush1.msra.mxu0 %v5602_v7  ;;  %2560 = vmatpush1.msra.mxu1 %v5635_v55 }
 0xa9d   : > { %2490 = vmatprep.subr.mxu0 %v5608_v19  ;;  %2561 = vmatprep.subr.mxu1 %v5641_v58 }
 0xa9e   : > { %2491 = vmatpush1.msra.mxu0 %v5614_v14  ;;  %2562 = vmatpush1.msra.mxu1 %v5647_v48 }
 0xa9f   : > { %2492 = vmatprep.subr.mxu0 %v6802_v49  ;;  %2563 = vmatprep.subr.mxu1 %v6803_v61 }
 0xaa0   : > { %2493 = vmatpush1.msra.mxu0 %v6804_v32  ;;  %2564 = vmatpush1.msra.mxu1 %v6805_v57 }
 0xaa1   : > { %2494 = vmatprep.subr.mxu0 %v6806_v3  ;;  %2565 = vmatprep.subr.mxu1 %v6807_v8 }
 0xaa2   : > { %2495 = vmatpush1.msra.mxu0 %v6808_v21  ;;  %2566 = vmatpush1.msra.mxu1 %v6809_v6 }
 0xaa3   : > { %2496 = vmatprep.subr.mxu0 %v6810_v9  ;;  %2567 = vmatprep.subr.mxu1 %v6811_v50  ;;  %v6821_v9 = vmov 0.0   ;;  %v6822_v50 = vld [vmem:[#allocation59_spill] sm:$0xff] }
 0xaa4   : > { %2497 = vmatpush1.msra.mxu0 %v6812_v27  ;;  %2568 = vmatpush1.msra.mxu1 %v6813_v62  ;;  %v6823_v62 = vld [vmem:[#allocation38_spill] sm:$0xff] }
 0xaa5   : > { %2498 = vmatprep.subr.mxu0 %v6814_v13  ;;  %2569 = vmatprep.subr.mxu1 %v6815_v10  ;;  %v6824_v13 = vld [vmem:[#allocation39_spill] sm:$0xff] }
 0xaa6   : > { %2499 = vmatpush1.msra.mxu0 %v6816_v15  ;;  %2570 = vmatpush1.msra.mxu1 %v6817_v2  ;;  %v3679_v10 = vld [vmem:[%s4645_s25 + $0x2] ss:$8 sm:$0xf] }
 0xaa7   : > { %2500 = vmatprep.subr.mxu0 %v6818_v59  ;;  %2571 = vmatprep.subr.mxu1 %v6819_v1  ;;  %v6825_v15 = vld [vmem:[#allocation60_spill] sm:$0xff]  ;;  %v6826_v2 = vld [vmem:[#allocation61_spill] sm:$0xff] }
 0xaa8   : > { %2501 = vmatpush1.msra.mxu0 %v6820_v16  ;;  %2534 = vmatprep.mubr.f32.mxu0 %v6821_v9  ;;  %v2421_v27 = vrot.slane %v3679_v10, %v6825_v15  ;;  %v2425_v6 = vrot.slane %v3679_v10, %v6826_v2 }
 0xaa9   : > { %2572 = vmatpush1.msra.mxu1 %v6822_v50  ;;  %2605 = vmatprep.mubr.f32.mxu1 %v6821_v9  ;;  %v2433_v50 = vrot.slane %v3679_v10, %v6801_v63 }
 0xaaa   : > { %2665 = vmatprep.subr.mxu0 %v6823_v62  ;;  %2736 = vmatprep.subr.mxu1 %v6824_v13  ;;  %v2429_v13 = vrot.slane %v3679_v10, %v5777_v5 }
 0xb49   : > { %v2341_v59 = vpop.f32.mrf.mxu0  ;;  %v2412_v3 = vpop.f32.mrf.mxu1 }
 0xb4a   : > { %v2438_v21 = vadd.f32 %v2421_v27, %v2341_v59  ;;  %v2440_v15 = vadd.f32 %v2429_v13, %v2412_v3 }
 0xb4b   : > { %v2343_v1 = vpop.f32.mrf.mxu0  ;;  %v2414_v9 = vpop.f32.mrf.mxu1 }
 0xb4c   : > { %v3680_v8 = vmul.f32 -1.442695, %v2438_v21  ;;  %v2439_v16 = vadd.f32 %v2425_v6, %v2343_v1  ;;  %v2441_v62 = vadd.f32 %v2433_v50, %v2414_v9 }
 0xb4e   : > { %4063 = vpow2.f32 %v3680_v8  ;;  %v3681_v57 = vmul.f32 -1.442695, %v2439_v16  ;;  %v3682_v32 = vmul.f32 -1.442695, %v2441_v62 }
 0xb50   : > { %4065 = vpow2.f32 %v3681_v57 }
 0xb51   : > { %4067 = vpow2.f32 %v3682_v32 }
 0xb5b   : > { %v4064_v61 = vpop.eup %4063 }
 0xb5c   : > { %v2445_v49 = vadd.f32 1.0, %v4064_v61 }
 0xb5d   : > { %v4066_v2 = vpop.eup %4065 }
 0xb5e   : > { %4069 = vrcp.f32 %v2445_v49  ;;  %v2451_v27 = vadd.f32 1.0, %v4066_v2  ;;  %v4068_v8 = vpop.eup %4067 }
 0xb5f   : > { %4071 = vtanh.f32 %v2440_v15  ;;  %v2458_v59 = vadd.f32 1.0, %v4068_v8 }
 0xb60   : > { %4073 = vrcp.f32 %v2451_v27 }
 0xb61   : > { %4075 = vrcp.f32 %v2458_v59 }
 0xb6b   : > { %v4070_v21 = vpop.eup %4069 }
 0xb6c   : > { %v4072_v57 = vpop.eup %4071 }
 0xb6d   : > { %v4074_v6 = vpop.eup %4073  ;;  %v2462_v1 = vmul.f32 %v4072_v57, %v4070_v21 }
 0xb6e   : > { %v2461_v9 = vmul.f32 %v4074_v6, %v5857_v0  ;;  %v4076_v61 = vpop.eup %4075 }
 0xb70   : > { %v5933_v50 = vadd.f32 %v2462_v1, %v2461_v9  ;;  %v6017_v1 = vld [vmem:[#allocation10 + $0x1e0] sm:$0xff]  ;;  %v6020_v9 = vld [vmem:[#allocation10 + $0x1f0] sm:$0xff] }
 0xb72   : > { %4077 = vtanh.f32 %v5933_v50 }
 0xb7f   : > { %v4078_v32 = vpop.eup %4077 }
 0xb80   : > { %v2465_v49 = vmul.f32 %v4078_v32, %v4076_v61  ;;  %v6026_v61 = vld [vmem:[#allocation10 + $0x1d8] sm:$0xff]  ;;  %v6029_v32 = vld [vmem:[#allocation10 + $0x1c0] sm:$0xff] }
 0xb82   : > { %3683 = vst [vmem:[%s4660_s26 + $0x10] sm:$0xff] %v2465_v49  ;;  %2535 = vmatmul.mubr.f32.vlgmr.msra.gmra.mxu0 %v2465_v49  ;;  %2606 = vmatmul.mubr.f32.vlgmr.msra.gmra.mxu1 %v2465_v49  ;;  %v6032_v49 = vld [vmem:[#allocation10 + $0x1d0] sm:$0xff] }
 0xb83   : > { %2666 = vmatpush1.msra.mxu0 %v5508_v17  ;;  %2737 = vmatpush1.msra.mxu1 %v5535_v34  ;;  %v6827_v17 = vld [vmem:[#allocation40_spill] sm:$0xff] }
 0xb84   : > { %2667 = vmatprep.subr.mxu0 %v5510_v25  ;;  %2738 = vmatprep.subr.mxu1 %v5541_v36  ;;  %v6828_v25 = vld [vmem:[#allocation46_spill] sm:$0xff]  ;;  %v6835_v34 = vld [vmem:[#allocation44_spill] sm:$0xff]  ;;  %v6837_v36 = vld [vmem:[#allocation45_spill] sm:$0xff] }
 0xb85   : > { %2668 = vmatpush1.msra.mxu0 %v5513_v26  ;;  %2739 = vmatpush1.msra.mxu1 %v5543_v37  ;;  %v6829_v26 = vld [vmem:[#allocation41_spill] sm:$0xff]  ;;  %v6838_v37 = vld [vmem:[#allocation55_spill] sm:$0xff] }
 0xb86   : > { %2669 = vmatprep.subr.mxu0 %v5517_v28  ;;  %2740 = vmatprep.subr.mxu1 %v5549_v39  ;;  %v6830_v28 = vld [vmem:[#allocation48_spill] sm:$0xff] }
 0xb87   : > { %2670 = vmatpush1.msra.mxu0 %v5521_v29  ;;  %2741 = vmatpush1.msra.mxu1 %v5555_v41  ;;  %v6831_v29 = vld [vmem:[#allocation42_spill] sm:$0xff]  ;;  %v6840_v39 = vld [vmem:[#allocation56_spill] sm:$0xff]  ;;  %v6842_v41 = vld [vmem:[#allocation57_spill] sm:$0xff] }
 0xb88   : > { %2671 = vmatprep.subr.mxu0 %v5524_v30  ;;  %2742 = vmatprep.subr.mxu1 %v5557_v42  ;;  %v6832_v30 = vld [vmem:[#allocation50_spill] sm:$0xff]  ;;  %v6843_v42 = vld [vmem:[#allocation51_spill] sm:$0xff] }
 0xb89   : > { %2672 = vmatpush1.msra.mxu0 %v5527_v31  ;;  %2743 = vmatpush1.msra.mxu1 %v5563_v45  ;;  %v6833_v31 = vld [vmem:[#allocation43_spill] sm:$0xff]  ;;  %v6845_v45 = vld [vmem:[#allocation53_spill] sm:$0xff] }
 0xb8a   : > { %2673 = vmatprep.subr.mxu0 %v5532_v33  ;;  %2744 = vmatprep.subr.mxu1 %v5569_v56  ;;  %v6834_v33 = vld [vmem:[#allocation52_spill] sm:$0xff]  ;;  %v6847_v56 = vld [vmem:[#allocation59_spill] sm:$0xff] }
 0xb8b   : > { %2674 = vmatpush1.msra.mxu0 %v5538_v35  ;;  %2745 = vmatpush1.msra.mxu1 %v5575_v11  ;;  %v6836_v35 = vld [vmem:[#allocation54_spill] sm:$0xff]  ;;  %v6004_v11 = vld [vmem:[#allocation10 + $0x1f8] sm:$0xff] }
 0xb8c   : > { %2675 = vmatprep.subr.mxu0 %v5546_v38  ;;  %2746 = vmatprep.subr.mxu1 %v5581_v60  ;;  %v6839_v38 = vld [vmem:[#allocation47_spill] sm:$0xff]  ;;  %6849 = vst [vmem:[#allocation38_spill] sm:$0xff] %v6004_v11  ;;  %v6850_v60 = vld [vmem:[#allocation60_spill] sm:$0xff] }
 0xb8d   : > { %2676 = vmatpush1.msra.mxu0 %v5552_v40  ;;  %2747 = vmatpush1.msra.mxu1 %v5587_v54  ;;  %v6841_v40 = vld [vmem:[#allocation49_spill] sm:$0xff] }
 0xb8e   : > { %2677 = vmatprep.subr.mxu0 %v5560_v43  ;;  %2748 = vmatprep.subr.mxu1 %v5593_v53  ;;  %v6844_v43 = vld [vmem:[#allocation58_spill] sm:$0xff]  ;;  %v6851_v54 = vld [vmem:[#allocation61_spill] sm:$0xff] }
 0xb8f   : > { %2678 = vmatpush1.msra.mxu0 %v5566_v47  ;;  %2749 = vmatpush1.msra.mxu1 %v5599_v24  ;;  %v6846_v47 = vmov 0.0  }
 0xb90   : > { %2679 = vmatprep.subr.mxu0 %v5572_v44  ;;  %2750 = vmatprep.subr.mxu1 %v5605_v22  ;;  %v6001_v44 = vld [vmem:[#allocation10 + $0x1e8] sm:$0xff] }
 0xb91   : > { %2680 = vmatpush1.msra.mxu0 %v5578_v46  ;;  %2751 = vmatpush1.msra.mxu1 %v5611_v20  ;;  %6848 = vst [vmem:[#allocation62_spill] sm:$0xff] %v6001_v44  ;;  %v3684_v46 = vld [vmem:[%s4645_s25 + $0x3] ss:$8 sm:$0xf] }
 0xb92   : > { %2681 = vmatprep.subr.mxu0 %v5584_v23  ;;  %2752 = vmatprep.subr.mxu1 %v5617_v12  ;;  %v2616_v23 = vrot.slane %v3684_v46, %v6850_v60 }
 0xb93   : > { %2682 = vmatpush1.msra.mxu0 %v5590_v51  ;;  %2753 = vmatpush1.msra.mxu1 %v5623_v18  ;;  %v2620_v51 = vrot.slane %v3684_v46, %v6851_v54 }
 0xb94   : > { %2683 = vmatprep.subr.mxu0 %v5596_v4  ;;  %2754 = vmatprep.subr.mxu1 %v5629_v52  ;;  %v2624_v52 = vrot.slane %v3684_v46, %v5777_v5 }
 0xb95   : > { %2684 = vmatpush1.msra.mxu0 %v5602_v7  ;;  %2755 = vmatpush1.msra.mxu1 %v5635_v55 }
 0xb96   : > { %2685 = vmatprep.subr.mxu0 %v5608_v19  ;;  %2756 = vmatprep.subr.mxu1 %v5641_v58 }
 0xb97   : > { %2686 = vmatpush1.msra.mxu0 %v5614_v14  ;;  %2757 = vmatpush1.msra.mxu1 %v5647_v48  ;;  %v2628_v14 = vrot.slane %v3684_v46, %v6801_v63  ;;  %v6080_v46 = vld [vmem:[#allocation10 + $0x150] sm:$0xff] }
 0xb98   : > { %2687 = vmatprep.subr.mxu0 %v6827_v17  ;;  %2758 = vmatprep.subr.mxu1 %v6828_v25  ;;  %v6035_v17 = vld [vmem:[#allocation10 + $0x1a8] sm:$0xff]  ;;  %v6038_v25 = vld [vmem:[#allocation10 + $0x1b8] sm:$0xff] }
 0xb99   : > { %2688 = vmatpush1.msra.mxu0 %v6829_v26  ;;  %2759 = vmatpush1.msra.mxu1 %v6830_v28  ;;  %v6041_v26 = vld [vmem:[#allocation10 + $0x1a0] sm:$0xff]  ;;  %v6044_v28 = vld [vmem:[#allocation10 + $0x1b0] sm:$0xff] }
 0xb9a   : > { %2689 = vmatprep.subr.mxu0 %v6831_v29  ;;  %2760 = vmatprep.subr.mxu1 %v6832_v30  ;;  %v6047_v29 = vld [vmem:[#allocation10 + $0x188] sm:$0xff]  ;;  %v6050_v30 = vld [vmem:[#allocation10 + $0x198] sm:$0xff] }
 0xb9b   : > { %2690 = vmatpush1.msra.mxu0 %v6833_v31  ;;  %2761 = vmatpush1.msra.mxu1 %v6834_v33  ;;  %v6053_v31 = vld [vmem:[#allocation10 + $0x180] sm:$0xff]  ;;  %v6056_v33 = vld [vmem:[#allocation10 + $0x190] sm:$0xff] }
 0xb9c   : > { %2691 = vmatprep.subr.mxu0 %v6835_v34  ;;  %2762 = vmatprep.subr.mxu1 %v6836_v35  ;;  %v6059_v34 = vld [vmem:[#allocation10 + $0x168] sm:$0xff]  ;;  %v6062_v35 = vld [vmem:[#allocation10 + $0x178] sm:$0xff] }
 0xb9d   : > { %2692 = vmatpush1.msra.mxu0 %v6837_v36  ;;  %2763 = vmatpush1.msra.mxu1 %v6838_v37  ;;  %v6065_v36 = vld [vmem:[#allocation10 + $0x160] sm:$0xff] }
 0xb9e   : > { %2693 = vmatprep.subr.mxu0 %v6839_v38  ;;  %2764 = vmatprep.subr.mxu1 %v6840_v39  ;;  %v6068_v38 = vld [vmem:[#allocation10 + $0x170] sm:$0xff] }
 0xb9f   : > { %2694 = vmatpush1.msra.mxu0 %v6841_v40  ;;  %2765 = vmatpush1.msra.mxu1 %v6842_v41  ;;  %v6071_v40 = vld [vmem:[#allocation10 + $0x148] sm:$0xff] }
 0xba0   : > { %2695 = vmatprep.subr.mxu0 %v6843_v42  ;;  %2766 = vmatprep.subr.mxu1 %v6844_v43  ;;  %v6074_v42 = vld [vmem:[#allocation10 + $0x158] sm:$0xff] }
 0xba1   : > { %2696 = vmatpush1.msra.mxu0 %v6845_v45  ;;  %2729 = vmatprep.mubr.f32.mxu0 %v6846_v47  ;;  %v6077_v45 = vld [vmem:[#allocation10 + $0x140] sm:$0xff] }
 0xba2   : > { %2767 = vmatpush1.msra.mxu1 %v6847_v56  ;;  %2800 = vmatprep.mubr.f32.mxu1 %v6846_v47 }
 0xba3   : > { %2860 = vmatprep.subr.mxu0 %v6001_v44  ;;  %2931 = vmatprep.subr.mxu1 %v6004_v11 }
 0xc42   : > { %v2536_v53 = vpop.f32.mrf.mxu0  ;;  %v2607_v19 = vpop.f32.mrf.mxu1 }
 0xc43   : > { %v2633_v4 = vadd.f32 %v2616_v23, %v2536_v53  ;;  %v2635_v48 = vadd.f32 %v2624_v52, %v2607_v19  ;;  %v6083_v23 = vld [vmem:[#allocation10 + $0x128] sm:$0xff]  ;;  %v6089_v53 = vld [vmem:[#allocation10 + $0x120] sm:$0xff]  ;;  %v6104_v19 = vld [vmem:[#allocation10 + $0x110] sm:$0xff] }
 0xc44   : > { %v2538_v24 = vpop.f32.mrf.mxu0  ;;  %v2609_v12 = vpop.f32.mrf.mxu1  ;;  %v6119_v52 = vld [vmem:[#allocation10 + $0xc8] sm:$0xff] }
 0xc45   : > { %v3685_v7 = vmul.f32 -1.442695, %v2633_v4  ;;  %v2634_v22 = vadd.f32 %v2620_v51, %v2538_v24  ;;  %v2636_v18 = vadd.f32 %v2628_v14, %v2609_v12  ;;  %v6086_v51 = vld [vmem:[#allocation10 + $0x138] sm:$0xff]  ;;  %v6092_v4 = vld [vmem:[#allocation10 + $0x130] sm:$0xff]  ;;  %v6095_v24 = vld [vmem:[#allocation10 + $0x108] sm:$0xff] }
 0xc46   : > { %v6110_v14 = vld [vmem:[#allocation10 + $0xf8] sm:$0xff]  ;;  %v6113_v12 = vld [vmem:[#allocation10 + $0xe0] sm:$0xff] }
 0xc47   : > { %4079 = vpow2.f32 %v3685_v7  ;;  %v3686_v20 = vmul.f32 -1.442695, %v2634_v22  ;;  %v3687_v55 = vmul.f32 -1.442695, %v2636_v18  ;;  %v6098_v7 = vld [vmem:[#allocation10 + $0x118] sm:$0xff]  ;;  %v6101_v22 = vld [vmem:[#allocation10 + $0x100] sm:$0xff] }
 0xc48   : > { %v6116_v18 = vld [vmem:[#allocation10 + $0xf0] sm:$0xff] }
 0xc49   : > { %4081 = vpow2.f32 %v3686_v20  ;;  %v6107_v20 = vld [vmem:[#allocation10 + $0xe8] sm:$0xff] }
 0xc4a   : > { %4083 = vpow2.f32 %v3687_v55  ;;  %v6122_v55 = vld [vmem:[#allocation10 + $0xd8] sm:$0xff] }
 0xc54   : > { %v4080_v58 = vpop.eup %4079 }
 0xc55   : > { %v2640_v0 = vadd.f32 1.0, %v4080_v58  ;;  %v6125_v58 = vld [vmem:[#allocation10 + $0xc0] sm:$0xff] }
 0xc56   : > { %v4082_v3 = vpop.eup %4081 }
 0xc57   : > { %4085 = vrcp.f32 %v2640_v0  ;;  %v2646_v10 = vadd.f32 1.0, %v4082_v3  ;;  %v4084_v15 = vpop.eup %4083  ;;  %v6131_v0 = vld [vmem:[#allocation10 + $0xa8] sm:$0xff]  ;;  %v6134_v3 = vld [vmem:[#allocation10 + $0xb8] sm:$0xff] }
 0xc58   : > { %4087 = vtanh.f32 %v2635_v48  ;;  %v2653_v13 = vadd.f32 1.0, %v4084_v15  ;;  %v6128_v48 = vld [vmem:[#allocation10 + $0xd0] sm:$0xff] }
 0xc59   : > { %4089 = vrcp.f32 %v2646_v10  ;;  %v6137_v10 = vld [vmem:[#allocation10 + $0xa0] sm:$0xff]  ;;  %v6140_v15 = vld [vmem:[#allocation10 + $0xb0] sm:$0xff] }
 0xc5a   : > { %4091 = vrcp.f32 %v2653_v13  ;;  %v6152_v13 = vld [vmem:[#allocation10 + $0x90] sm:$0xff] }
 0xc5b   : > { %6855 = vst [vmem:[#allocation41_spill] sm:$0xff] %v6152_v13 }
 0xc64   : > { %v4086_v2 = vpop.eup %4085 }
 0xc65   : > { %v4088_v16 = vpop.eup %4087 }
 0xc66   : > { %v4090_v62 = vpop.eup %4089  ;;  %v2657_v27 = vmul.f32 %v4088_v16, %v4086_v2  ;;  %v6143_v2 = vld [vmem:[#allocation10 + $0x88] sm:$0xff]  ;;  %v6146_v16 = vld [vmem:[#allocation10 + $0x98] sm:$0xff] }
 0xc67   : > { %v2656_v8 = vmul.f32 %v4090_v62, %v5933_v50  ;;  %v4092_v57 = vpop.eup %4091  ;;  %v6023_v50 = vld [vmem:[#allocation10 + $0x1c8] sm:$0xff]  ;;  %6852 = vst [vmem:[#allocation39_spill] sm:$0xff] %v6143_v2  ;;  %6853 = vst [vmem:[#allocation40_spill] sm:$0xff] %v6146_v16  ;;  %v6149_v62 = vld [vmem:[#allocation10 + $0x80] sm:$0xff] }
 0xc68   : > { %6854 = vst [vmem:[#allocation46_spill] sm:$0xff] %v6149_v62 }
 0xc69   : > { %v6013_v21 = vadd.f32 %v2657_v27, %v2656_v8  ;;  %v6155_v27 = vld [vmem:[#allocation10 + $0x68] sm:$0xff]  ;;  %v6158_v8 = vld [vmem:[#allocation10 + $0x78] sm:$0xff] }
 0xc6a   : > { %6856 = vst [vmem:[#allocation48_spill] sm:$0xff] %v6155_v27  ;;  %6857 = vst [vmem:[#allocation42_spill] sm:$0xff] %v6158_v8 }
 0xc6b   : > { %4093 = vtanh.f32 %v6013_v21 }
 0xc78   : > { %v4094_v6 = vpop.eup %4093 }
 0xc79   : > { %v2660_v59 = vmul.f32 %v4094_v6, %v4092_v57  ;;  %v6161_v57 = vld [vmem:[#allocation10 + $0x60] sm:$0xff]  ;;  %v6164_v6 = vld [vmem:[#allocation10 + $0x70] sm:$0xff] }
 0xc7a   : > { %6858 = vst [vmem:[#allocation50_spill] sm:$0xff] %v6161_v57  ;;  %6859 = vst [vmem:[#allocation43_spill] sm:$0xff] %v6164_v6 }
 0xc7b   : > { %3688 = vst [vmem:[%s4660_s26 + $0x18] sm:$0xff] %v2660_v59  ;;  %2730 = vmatmul.mubr.f32.vlgmr.msra.gmra.mxu0 %v2660_v59  ;;  %2801 = vmatmul.mubr.f32.vlgmr.msra.gmra.mxu1 %v2660_v59  ;;  %v6167_v59 = vld [vmem:[#allocation10 + $0x48] sm:$0xff] }
 0xc7c   : > { %2861 = vmatpush1.msra.mxu0 %v6017_v1  ;;  %2932 = vmatpush1.msra.mxu1 %v6020_v9  ;;  %6860 = vst [vmem:[#allocation52_spill] sm:$0xff] %v6167_v59 }
 0xc7d   : > { %2862 = vmatprep.subr.mxu0 %v6023_v50  ;;  %2933 = vmatprep.subr.mxu1 %v6026_v61 }
 0xc7e   : > { %2863 = vmatpush1.msra.mxu0 %v6029_v32  ;;  %2934 = vmatpush1.msra.mxu1 %v6032_v49 }
 0xc7f   : > { %2864 = vmatprep.subr.mxu0 %v6035_v17  ;;  %2935 = vmatprep.subr.mxu1 %v6038_v25 }
 0xc80   : > { %2865 = vmatpush1.msra.mxu0 %v6041_v26  ;;  %2936 = vmatpush1.msra.mxu1 %v6044_v28 }
 0xc81   : > { %2866 = vmatprep.subr.mxu0 %v6047_v29  ;;  %2937 = vmatprep.subr.mxu1 %v6050_v30 }
 0xc82   : > { %2867 = vmatpush1.msra.mxu0 %v6053_v31  ;;  %2938 = vmatpush1.msra.mxu1 %v6056_v33 }
 0xc83   : > { %2868 = vmatprep.subr.mxu0 %v6059_v34  ;;  %2939 = vmatprep.subr.mxu1 %v6062_v35 }
 0xc84   : > { %2869 = vmatpush1.msra.mxu0 %v6065_v36  ;;  %2940 = vmatpush1.msra.mxu1 %v6068_v38 }
 0xc85   : > { %2870 = vmatprep.subr.mxu0 %v6071_v40  ;;  %2941 = vmatprep.subr.mxu1 %v6074_v42 }
 0xc86   : > { %2871 = vmatpush1.msra.mxu0 %v6077_v45  ;;  %2942 = vmatpush1.msra.mxu1 %v6080_v46 }
 0xc87   : > { %2872 = vmatprep.subr.mxu0 %v6083_v23  ;;  %2943 = vmatprep.subr.mxu1 %v6086_v51 }
 0xc88   : > { %2873 = vmatpush1.msra.mxu0 %v6089_v53  ;;  %2944 = vmatpush1.msra.mxu1 %v6092_v4 }
 0xc89   : > { %2874 = vmatprep.subr.mxu0 %v6095_v24  ;;  %2945 = vmatprep.subr.mxu1 %v6098_v7 }
 0xc8a   : > { %2875 = vmatpush1.msra.mxu0 %v6101_v22  ;;  %2946 = vmatpush1.msra.mxu1 %v6104_v19 }
 0xc8b   : > { %2876 = vmatprep.subr.mxu0 %v6107_v20  ;;  %2947 = vmatprep.subr.mxu1 %v6110_v14 }
 0xc8c   : > { %2877 = vmatpush1.msra.mxu0 %v6113_v12  ;;  %2948 = vmatpush1.msra.mxu1 %v6116_v18 }
 0xc8d   : > { %2878 = vmatprep.subr.mxu0 %v6119_v52  ;;  %2949 = vmatprep.subr.mxu1 %v6122_v55 }
 0xc8e   : > { %2879 = vmatpush1.msra.mxu0 %v6125_v58  ;;  %2950 = vmatpush1.msra.mxu1 %v6128_v48 }
 0xc8f   : > { %2880 = vmatprep.subr.mxu0 %v6131_v0  ;;  %2951 = vmatprep.subr.mxu1 %v6134_v3 }
 0xc90   : > { %2881 = vmatpush1.msra.mxu0 %v6137_v10  ;;  %2952 = vmatpush1.msra.mxu1 %v6140_v15 }
 0xc91   : > { %2882 = vmatprep.subr.mxu0 %v6143_v2  ;;  %2953 = vmatprep.subr.mxu1 %v6146_v16 }
 0xc92   : > { %2883 = vmatpush1.msra.mxu0 %v6149_v62  ;;  %2954 = vmatpush1.msra.mxu1 %v6152_v13  ;;  %v6170_v13 = vld [vmem:[#allocation10 + $0x58] sm:$0xff] }
 0xc93   : > { %2884 = vmatprep.subr.mxu0 %v6155_v27  ;;  %2955 = vmatprep.subr.mxu1 %v6158_v8  ;;  %6861 = vst [vmem:[#allocation44_spill] sm:$0xff] %v6170_v13  ;;  %v6173_v27 = vld [vmem:[#allocation10 + $0x40] sm:$0xff]  ;;  %v6177_v8 = vld [vmem:[#allocation10 + $0x28] sm:$0xff] }
 0xc94   : > { %2885 = vmatpush1.msra.mxu0 %v6161_v57  ;;  %2956 = vmatpush1.msra.mxu1 %v6164_v6  ;;  %6862 = vst [vmem:[#allocation54_spill] sm:$0xff] %v6173_v27  ;;  %6863 = vst [vmem:[#allocation45_spill] sm:$0xff] %v6177_v8  ;;  %v6181_v6 = vld [vmem:[#allocation10 + $0x20] sm:$0xff] }
 0xc95   : > { %2886 = vmatprep.subr.mxu0 %v6167_v59  ;;  %2957 = vmatprep.subr.mxu1 %v6170_v13  ;;  %6864 = vst [vmem:[#allocation55_spill] sm:$0xff] %v6181_v6  ;;  %v6185_v13 = vld [vmem:[#allocation10 + $0x8] sm:$0xff] }
 0xc96   : > { %2887 = vmatpush1.msra.mxu0 %v6173_v27  ;;  %2958 = vmatpush1.msra.mxu1 %v6838_v37  ;;  %6865 = vst [vmem:[#allocation47_spill] sm:$0xff] %v6185_v13  ;;  %v6189_v37 = vld [vmem:[#allocation10] sm:$0xff] }
 0xc97   : > { %2888 = vmatprep.subr.mxu0 %v6177_v8  ;;  %2959 = vmatprep.subr.mxu1 %v6840_v39  ;;  %6866 = vst [vmem:[#allocation56_spill] sm:$0xff] %v6189_v37  ;;  %v3689_v39 = vld [vmem:[%s4645_s25 + $0x4] ss:$8 sm:$0xf] }
 0xc98   : > { %2889 = vmatpush1.msra.mxu0 %v6181_v6  ;;  %2960 = vmatpush1.msra.mxu1 %v6842_v41  ;;  %v2811_v41 = vrot.slane %v3689_v39, %v6850_v60 }
 0xc99   : > { %2890 = vmatprep.subr.mxu0 %v6185_v13  ;;  %2961 = vmatprep.subr.mxu1 %v6844_v43  ;;  %v2815_v13 = vrot.slane %v3689_v39, %v6851_v54 }
 0xc9a   : > { %2891 = vmatpush1.msra.mxu0 %v6189_v37  ;;  %2924 = vmatprep.mubr.f32.mxu0 %v6846_v47 }
 0xc9b   : > { %2962 = vmatpush1.msra.mxu1 %v6847_v56  ;;  %2995 = vmatprep.mubr.f32.mxu1 %v6846_v47  ;;  %v2823_v56 = vrot.slane %v3689_v39, %v6801_v63 }
 0xc9c   : > { %3055 = vmatprep.subr.mxu0 %v6001_v44  ;;  %3126 = vmatprep.subr.mxu1 %v6004_v11  ;;  %v2819_v11 = vrot.slane %v3689_v39, %v5777_v5 }
 0xd3b   : > { %v2731_v43 = vpop.f32.mrf.mxu0  ;;  %v2802_v59 = vpop.f32.mrf.mxu1 }
 0xd3c   : > { %v2828_v6 = vadd.f32 %v2811_v41, %v2731_v43  ;;  %v2830_v60 = vadd.f32 %v2819_v11, %v2802_v59  ;;  %v6872_v59 = vld [vmem:[#allocation42_spill] sm:$0xff] }
 0xd3d   : > { %v2733_v8 = vpop.f32.mrf.mxu0  ;;  %v2804_v47 = vpop.f32.mrf.mxu1  ;;  %v6873_v43 = vld [vmem:[#allocation50_spill] sm:$0xff] }
 0xd3e   : > { %v3690_v27 = vmul.f32 -1.442695, %v2828_v6  ;;  %v2829_v37 = vadd.f32 %v2815_v13, %v2733_v8  ;;  %v2831_v44 = vadd.f32 %v2823_v56, %v2804_v47  ;;  %v6874_v56 = vld [vmem:[#allocation43_spill] sm:$0xff] }
 0xd40   : > { %4095 = vpow2.f32 %v3690_v27  ;;  %v3691_v57 = vmul.f32 -1.442695, %v2829_v37  ;;  %v3692_v62 = vmul.f32 -1.442695, %v2831_v44 }
 0xd42   : > { %4097 = vpow2.f32 %v3691_v57 }
 0xd43   : > { %4099 = vpow2.f32 %v3692_v62  ;;  %v6871_v62 = vld [vmem:[#allocation48_spill] sm:$0xff] }
 0xd4d   : > { %v4096_v16 = vpop.eup %4095 }
 0xd4e   : > { %v2835_v2 = vadd.f32 1.0, %v4096_v16  ;;  %v6870_v16 = vld [vmem:[#allocation41_spill] sm:$0xff] }
 0xd4f   : > { %v4098_v54 = vpop.eup %4097 }
 0xd50   : > { %4101 = vrcp.f32 %v2835_v2  ;;  %v2841_v41 = vadd.f32 1.0, %v4098_v54  ;;  %v4100_v13 = vpop.eup %4099  ;;  %v6868_v54 = vld [vmem:[#allocation40_spill] sm:$0xff] }
 0xd51   : > { %4103 = vtanh.f32 %v2830_v60  ;;  %v2848_v6 = vadd.f32 1.0, %v4100_v13  ;;  %v6867_v60 = vld [vmem:[#allocation39_spill] sm:$0xff]  ;;  %v6876_v13 = vld [vmem:[#allocation44_spill] sm:$0xff] }
 0xd52   : > { %4105 = vrcp.f32 %v2841_v41  ;;  %v6875_v41 = vld [vmem:[#allocation52_spill] sm:$0xff] }
 0xd53   : > { %4107 = vrcp.f32 %v2848_v6  ;;  %v6264_v6 = vld [vmem:[#allocation10 + $0x38] sm:$0xff] }
 0xd54   : > { %6880 = vst [vmem:[#allocation57_spill] sm:$0xff] %v6264_v6 }
 0xd5d   : > { %v4102_v27 = vpop.eup %4101 }
 0xd5e   : > { %v4104_v8 = vpop.eup %4103 }
 0xd5f   : > { %v4106_v57 = vpop.eup %4105  ;;  %v2852_v37 = vmul.f32 %v4104_v8, %v4102_v27  ;;  %v6877_v27 = vld [vmem:[#allocation54_spill] sm:$0xff]  ;;  %v6260_v8 = vld [vmem:[#allocation10 + $0x50] sm:$0xff] }
 0xd60   : > { %v2851_v47 = vmul.f32 %v4106_v57, %v6013_v21  ;;  %v4108_v44 = vpop.eup %4107  ;;  %v6869_v21 = vld [vmem:[#allocation46_spill] sm:$0xff]  ;;  %6878 = vst [vmem:[#allocation49_spill] sm:$0xff] %v6260_v8  ;;  %v6879_v57 = vld [vmem:[#allocation45_spill] sm:$0xff] }
 0xd62   : > { %v6203_v39 = vadd.f32 %v2852_v37, %v2851_v47  ;;  %v6881_v37 = vld [vmem:[#allocation55_spill] sm:$0xff]  ;;  %v6268_v47 = vld [vmem:[#allocation10 + $0x30] sm:$0xff] }
 0xd63   : > { %6882 = vst [vmem:[#allocation51_spill] sm:$0xff] %v6268_v47 }
 0xd64   : > { %4109 = vtanh.f32 %v6203_v39 }
 0xd71   : > { %v4110_v11 = vpop.eup %4109 }
 0xd72   : > { %v2855_v2 = vmul.f32 %v4110_v11, %v4108_v44  ;;  %v6883_v44 = vld [vmem:[#allocation47_spill] sm:$0xff]  ;;  %v6272_v11 = vld [vmem:[#allocation10 + $0x18] sm:$0xff] }
 0xd73   : > { %6884 = vst [vmem:[#allocation58_spill] sm:$0xff] %v6272_v11 }
 0xd74   : > { %3693 = vst [vmem:[%s4660_s26 + $0x20] sm:$0xff] %v2855_v2  ;;  %2925 = vmatmul.mubr.f32.vlgmr.msra.gmra.mxu0 %v2855_v2  ;;  %2996 = vmatmul.mubr.f32.vlgmr.msra.gmra.mxu1 %v2855_v2  ;;  %v6885_v2 = vld [vmem:[#allocation56_spill] sm:$0xff] }
 0xd75   : > { %3056 = vmatpush1.msra.mxu0 %v6017_v1  ;;  %3127 = vmatpush1.msra.mxu1 %v6020_v9 }
 0xd76   : > { %3057 = vmatprep.subr.mxu0 %v6023_v50  ;;  %3128 = vmatprep.subr.mxu1 %v6026_v61 }
 0xd77   : > { %3058 = vmatpush1.msra.mxu0 %v6029_v32  ;;  %3129 = vmatpush1.msra.mxu1 %v6032_v49 }
 0xd78   : > { %3059 = vmatprep.subr.mxu0 %v6035_v17  ;;  %3130 = vmatprep.subr.mxu1 %v6038_v25 }
 0xd79   : > { %3060 = vmatpush1.msra.mxu0 %v6041_v26  ;;  %3131 = vmatpush1.msra.mxu1 %v6044_v28 }
 0xd7a   : > { %3061 = vmatprep.subr.mxu0 %v6047_v29  ;;  %3132 = vmatprep.subr.mxu1 %v6050_v30 }
 0xd7b   : > { %3062 = vmatpush1.msra.mxu0 %v6053_v31  ;;  %3133 = vmatpush1.msra.mxu1 %v6056_v33 }
 0xd7c   : > { %3063 = vmatprep.subr.mxu0 %v6059_v34  ;;  %3134 = vmatprep.subr.mxu1 %v6062_v35 }
 0xd7d   : > { %3064 = vmatpush1.msra.mxu0 %v6065_v36  ;;  %3135 = vmatpush1.msra.mxu1 %v6068_v38 }
 0xd7e   : > { %3065 = vmatprep.subr.mxu0 %v6071_v40  ;;  %3136 = vmatprep.subr.mxu1 %v6074_v42 }
 0xd7f   : > { %3066 = vmatpush1.msra.mxu0 %v6077_v45  ;;  %3137 = vmatpush1.msra.mxu1 %v6080_v46 }
 0xd80   : > { %3067 = vmatprep.subr.mxu0 %v6083_v23  ;;  %3138 = vmatprep.subr.mxu1 %v6086_v51 }
 0xd81   : > { %3068 = vmatpush1.msra.mxu0 %v6089_v53  ;;  %3139 = vmatpush1.msra.mxu1 %v6092_v4 }
 0xd82   : > { %3069 = vmatprep.subr.mxu0 %v6095_v24  ;;  %3140 = vmatprep.subr.mxu1 %v6098_v7 }
 0xd83   : > { %3070 = vmatpush1.msra.mxu0 %v6101_v22  ;;  %3141 = vmatpush1.msra.mxu1 %v6104_v19 }
 0xd84   : > { %3071 = vmatprep.subr.mxu0 %v6107_v20  ;;  %3142 = vmatprep.subr.mxu1 %v6110_v14 }
 0xd85   : > { %3072 = vmatpush1.msra.mxu0 %v6113_v12  ;;  %3143 = vmatpush1.msra.mxu1 %v6116_v18 }
 0xd86   : > { %3073 = vmatprep.subr.mxu0 %v6119_v52  ;;  %3144 = vmatprep.subr.mxu1 %v6122_v55 }
 0xd87   : > { %3074 = vmatpush1.msra.mxu0 %v6125_v58  ;;  %3145 = vmatpush1.msra.mxu1 %v6128_v48 }
 0xd88   : > { %3075 = vmatprep.subr.mxu0 %v6131_v0  ;;  %3146 = vmatprep.subr.mxu1 %v6134_v3 }
 0xd89   : > { %3076 = vmatpush1.msra.mxu0 %v6137_v10  ;;  %3147 = vmatpush1.msra.mxu1 %v6140_v15 }
 0xd8a   : > { %3077 = vmatprep.subr.mxu0 %v6867_v60  ;;  %3148 = vmatprep.subr.mxu1 %v6868_v54 }
 0xd8b   : > { %3078 = vmatpush1.msra.mxu0 %v6869_v21  ;;  %3149 = vmatpush1.msra.mxu1 %v6870_v16 }
 0xd8c   : > { %3079 = vmatprep.subr.mxu0 %v6871_v62  ;;  %3150 = vmatprep.subr.mxu1 %v6872_v59 }
 0xd8d   : > { %3080 = vmatpush1.msra.mxu0 %v6873_v43  ;;  %3151 = vmatpush1.msra.mxu1 %v6874_v56 }
 0xd8e   : > { %3081 = vmatprep.subr.mxu0 %v6875_v41  ;;  %3152 = vmatprep.subr.mxu1 %v6876_v13  ;;  %v6891_v13 = vld [vmem:[#allocation61_spill] sm:$0xff] }
 0xd8f   : > { %3082 = vmatpush1.msra.mxu0 %v6877_v27  ;;  %3153 = vmatpush1.msra.mxu1 %v6260_v8  ;;  %v6277_v8 = vld [vmem:[#allocation10 + $0x10] sm:$0xff] }
 0xd90   : > { %3083 = vmatprep.subr.mxu0 %v6879_v57  ;;  %3154 = vmatprep.subr.mxu1 %v6264_v6  ;;  %v6886_v57 = vmov 0.0   ;;  %6887 = vst [vmem:[#allocation53_spill] sm:$0xff] %v6277_v8  ;;  %v6889_v6 = vld [vmem:[#allocation38_spill] sm:$0xff] }
 0xd91   : > { %3084 = vmatpush1.msra.mxu0 %v6881_v37  ;;  %3155 = vmatpush1.msra.mxu1 %v6268_v47  ;;  %v6888_v37 = vld [vmem:[#allocation62_spill] sm:$0xff] }
 0xd92   : > { %3085 = vmatprep.subr.mxu0 %v6883_v44  ;;  %3156 = vmatprep.subr.mxu1 %v6272_v11  ;;  %v3694_v47 = vld [vmem:[%s4645_s25 + $0x5] ss:$8 sm:$0xf] }
 0xd93   : > { %3086 = vmatpush1.msra.mxu0 %v6885_v2  ;;  %3119 = vmatprep.mubr.f32.mxu0 %v6886_v57  ;;  %v6890_v44 = vld [vmem:[#allocation60_spill] sm:$0xff]  ;;  %v3010_v41 = vrot.slane %v3694_v47, %v6891_v13 }
 0xd94   : > { %3157 = vmatpush1.msra.mxu1 %v6277_v8  ;;  %3190 = vmatprep.mubr.f32.mxu1 %v6886_v57  ;;  %v3006_v27 = vrot.slane %v3694_v47, %v6890_v44  ;;  %v3018_v8 = vrot.slane %v3694_v47, %v6801_v63 }
 0xd95   : > { %3250 = vmatprep.subr.mxu0 %v6888_v37  ;;  %3321 = vmatprep.subr.mxu1 %v6889_v6  ;;  %v3014_v6 = vrot.slane %v3694_v47, %v5777_v5 }
 0xe34   : > { %v2926_v11 = vpop.f32.mrf.mxu0  ;;  %v2997_v62 = vpop.f32.mrf.mxu1 }
 0xe35   : > { %v3023_v56 = vadd.f32 %v3006_v27, %v2926_v11  ;;  %v3025_v44 = vadd.f32 %v3014_v6, %v2997_v62 }
 0xe36   : > { %v2928_v2 = vpop.f32.mrf.mxu0  ;;  %v2999_v57 = vpop.f32.mrf.mxu1 }
 0xe37   : > { %v3695_v43 = vmul.f32 -1.442695, %v3023_v56  ;;  %v3024_v59 = vadd.f32 %v3010_v41, %v2928_v2  ;;  %v3026_v37 = vadd.f32 %v3018_v8, %v2999_v57 }
 0xe39   : > { %4111 = vpow2.f32 %v3695_v43  ;;  %v3696_v16 = vmul.f32 -1.442695, %v3024_v59  ;;  %v3697_v21 = vmul.f32 -1.442695, %v3026_v37 }
 0xe3b   : > { %4113 = vpow2.f32 %v3696_v16 }
 0xe3c   : > { %4115 = vpow2.f32 %v3697_v21 }
 0xe46   : > { %v4112_v54 = vpop.eup %4111 }
 0xe47   : > { %v3030_v60 = vadd.f32 1.0, %v4112_v54 }
 0xe48   : > { %v4114_v13 = vpop.eup %4113 }
 0xe49   : > { %4117 = vrcp.f32 %v3030_v60  ;;  %v3036_v27 = vadd.f32 1.0, %v4114_v13  ;;  %v4116_v43 = vpop.eup %4115 }
 0xe4a   : > { %4119 = vtanh.f32 %v3025_v44  ;;  %v3043_v41 = vadd.f32 1.0, %v4116_v43 }
 0xe4b   : > { %4121 = vrcp.f32 %v3036_v27 }
 0xe4c   : > { %4123 = vrcp.f32 %v3043_v41 }
 0xe56   : > { %v4118_v59 = vpop.eup %4117 }
 0xe57   : > { %v4120_v16 = vpop.eup %4119 }
 0xe58   : > { %v4122_v56 = vpop.eup %4121  ;;  %v3047_v11 = vmul.f32 %v4120_v16, %v4118_v59 }
 0xe59   : > { %v3046_v8 = vmul.f32 %v4122_v56, %v6203_v39  ;;  %v4124_v54 = vpop.eup %4123  ;;  %v3704_v56 = vld [vmem:[%s4645_s25 + $0x7] ss:$8 sm:$0xf] }
 0xe5b   : > { %v6289_v57 = vadd.f32 %v3047_v11, %v3046_v8 }
 0xe5d   : > { %4125 = vtanh.f32 %v6289_v57 }
 0xe6a   : > { %v4126_v21 = vpop.eup %4125 }
 0xe6b   : > { %v3050_v60 = vmul.f32 %v4126_v21, %v4124_v54 }
 0xe6d   : > { %3698 = vst [vmem:[%s4660_s26 + $0x28] sm:$0xff] %v3050_v60  ;;  %3120 = vmatmul.mubr.f32.vlgmr.msra.gmra.mxu0 %v3050_v60  ;;  %3191 = vmatmul.mubr.f32.vlgmr.msra.gmra.mxu1 %v3050_v60 }
 0xe6e   : > { %3251 = vmatpush1.msra.mxu0 %v6017_v1  ;;  %3322 = vmatpush1.msra.mxu1 %v6020_v9  ;;  %v6892_v1 = vld [vmem:[#allocation39_spill] sm:$0xff]  ;;  %v6893_v9 = vld [vmem:[#allocation40_spill] sm:$0xff] }
 0xe6f   : > { %3252 = vmatprep.subr.mxu0 %v6023_v50  ;;  %3323 = vmatprep.subr.mxu1 %v6026_v61  ;;  %v6894_v50 = vld [vmem:[#allocation46_spill] sm:$0xff]  ;;  %v6895_v61 = vld [vmem:[#allocation41_spill] sm:$0xff] }
 0xe70   : > { %3253 = vmatpush1.msra.mxu0 %v6029_v32  ;;  %3324 = vmatpush1.msra.mxu1 %v6032_v49  ;;  %v6896_v32 = vld [vmem:[#allocation48_spill] sm:$0xff]  ;;  %v6897_v49 = vld [vmem:[#allocation42_spill] sm:$0xff] }
 0xe71   : > { %3254 = vmatprep.subr.mxu0 %v6035_v17  ;;  %3325 = vmatprep.subr.mxu1 %v6038_v25  ;;  %v6898_v17 = vld [vmem:[#allocation50_spill] sm:$0xff]  ;;  %v6899_v25 = vld [vmem:[#allocation43_spill] sm:$0xff] }
 0xe72   : > { %3255 = vmatpush1.msra.mxu0 %v6041_v26  ;;  %3326 = vmatpush1.msra.mxu1 %v6044_v28  ;;  %v6900_v26 = vld [vmem:[#allocation52_spill] sm:$0xff] }
 0xe73   : > { %3256 = vmatprep.subr.mxu0 %v6047_v29  ;;  %3327 = vmatprep.subr.mxu1 %v6050_v30  ;;  %v6901_v28 = vld [vmem:[#allocation44_spill] sm:$0xff]  ;;  %v6902_v29 = vld [vmem:[#allocation54_spill] sm:$0xff]  ;;  %v6903_v30 = vld [vmem:[#allocation49_spill] sm:$0xff] }
 0xe74   : > { %3257 = vmatpush1.msra.mxu0 %v6053_v31  ;;  %3328 = vmatpush1.msra.mxu1 %v6056_v33  ;;  %v6904_v31 = vld [vmem:[#allocation45_spill] sm:$0xff] }
 0xe75   : > { %3258 = vmatprep.subr.mxu0 %v6059_v34  ;;  %3329 = vmatprep.subr.mxu1 %v6062_v35  ;;  %v6905_v33 = vld [vmem:[#allocation57_spill] sm:$0xff]  ;;  %v6906_v34 = vld [vmem:[#allocation55_spill] sm:$0xff] }
 0xe76   : > { %3259 = vmatpush1.msra.mxu0 %v6065_v36  ;;  %3330 = vmatpush1.msra.mxu1 %v6068_v38  ;;  %v6907_v35 = vld [vmem:[#allocation51_spill] sm:$0xff]  ;;  %v6909_v38 = vld [vmem:[#allocation58_spill] sm:$0xff] }
 0xe77   : > { %3260 = vmatprep.subr.mxu0 %v6071_v40  ;;  %3331 = vmatprep.subr.mxu1 %v6074_v42  ;;  %v6908_v36 = vld [vmem:[#allocation47_spill] sm:$0xff]  ;;  %v6910_v40 = vld [vmem:[#allocation56_spill] sm:$0xff]  ;;  %v6911_v42 = vmov 0.0  }
 0xe78   : > { %3261 = vmatpush1.msra.mxu0 %v6077_v45  ;;  %3332 = vmatpush1.msra.mxu1 %v6080_v46  ;;  %v6912_v45 = vld [vmem:[#allocation53_spill] sm:$0xff] }
 0xe79   : > { %3262 = vmatprep.subr.mxu0 %v6083_v23  ;;  %3333 = vmatprep.subr.mxu1 %v6086_v51  ;;  %v3699_v46 = vld [vmem:[%s4645_s25 + $0x6] ss:$8 sm:$0xf] }
 0xe7a   : > { %3263 = vmatpush1.msra.mxu0 %v6089_v53  ;;  %3334 = vmatpush1.msra.mxu1 %v6092_v4  ;;  %v6913_v23 = vld [vmem:[#allocation60_spill] sm:$0xff]  ;;  %v6914_v53 = vld [vmem:[#allocation61_spill] sm:$0xff] }
 0xe7b   : > { %3264 = vmatprep.subr.mxu0 %v6095_v24  ;;  %3335 = vmatprep.subr.mxu1 %v6098_v7  ;;  %v3201_v51 = vrot.slane %v3699_v46, %v6913_v23  ;;  %v3205_v4 = vrot.slane %v3699_v46, %v6914_v53  ;;  %v3396_v41 = vrot.slane %v3704_v56, %v6913_v23 }
 0xe7c   : > { %3265 = vmatpush1.msra.mxu0 %v6101_v22  ;;  %3336 = vmatpush1.msra.mxu1 %v6104_v19  ;;  %v3400_v11 = vrot.slane %v3704_v56, %v6914_v53 }
 0xe7d   : > { %3266 = vmatprep.subr.mxu0 %v6107_v20  ;;  %3337 = vmatprep.subr.mxu1 %v6110_v14 }
 0xe7e   : > { %3267 = vmatpush1.msra.mxu0 %v6113_v12  ;;  %3338 = vmatpush1.msra.mxu1 %v6116_v18  ;;  %v3213_v18 = vrot.slane %v3699_v46, %v6801_v63 }
 0xe7f   : > { %3268 = vmatprep.subr.mxu0 %v6119_v52  ;;  %3339 = vmatprep.subr.mxu1 %v6122_v55 }
 0xe80   : > { %3269 = vmatpush1.msra.mxu0 %v6125_v58  ;;  %3340 = vmatpush1.msra.mxu1 %v6128_v48  ;;  %v3209_v58 = vrot.slane %v3699_v46, %v5777_v5 }
 0xe81   : > { %3270 = vmatprep.subr.mxu0 %v6131_v0  ;;  %3341 = vmatprep.subr.mxu1 %v6134_v3 }
 0xe82   : > { %3271 = vmatpush1.msra.mxu0 %v6137_v10  ;;  %3342 = vmatpush1.msra.mxu1 %v6140_v15 }
 0xe83   : > { %3272 = vmatprep.subr.mxu0 %v6892_v1  ;;  %3343 = vmatprep.subr.mxu1 %v6893_v9 }
 0xe84   : > { %3273 = vmatpush1.msra.mxu0 %v6894_v50  ;;  %3344 = vmatpush1.msra.mxu1 %v6895_v61  ;;  %v3408_v50 = vrot.slane %v3704_v56, %v6801_v63 }
 0xe85   : > { %3274 = vmatprep.subr.mxu0 %v6896_v32  ;;  %3345 = vmatprep.subr.mxu1 %v6897_v49  ;;  %v3404_v49 = vrot.slane %v3704_v56, %v5777_v5 }
 0xe86   : > { %3275 = vmatpush1.msra.mxu0 %v6898_v17  ;;  %3346 = vmatpush1.msra.mxu1 %v6899_v25 }
 0xe87   : > { %3276 = vmatprep.subr.mxu0 %v6900_v26  ;;  %3347 = vmatprep.subr.mxu1 %v6901_v28 }
 0xe88   : > { %3277 = vmatpush1.msra.mxu0 %v6902_v29  ;;  %3348 = vmatpush1.msra.mxu1 %v6903_v30 }
 0xe89   : > { %3278 = vmatprep.subr.mxu0 %v6904_v31  ;;  %3349 = vmatprep.subr.mxu1 %v6905_v33 }
 0xe8a   : > { %3279 = vmatpush1.msra.mxu0 %v6906_v34  ;;  %3350 = vmatpush1.msra.mxu1 %v6907_v35 }
 0xe8b   : > { %3280 = vmatprep.subr.mxu0 %v6908_v36  ;;  %3351 = vmatprep.subr.mxu1 %v6909_v38 }
 0xe8c   : > { %3281 = vmatpush1.msra.mxu0 %v6910_v40  ;;  %3314 = vmatprep.mubr.f32.mxu0 %v6911_v42 }
 0xe8d   : > { %3352 = vmatpush1.msra.mxu1 %v6912_v45  ;;  %3385 = vmatprep.mubr.f32.mxu1 %v6911_v42 }
 0xf2d   : > { %v3121_v24 = vpop.f32.mrf.mxu0  ;;  %v3192_v14 = vpop.f32.mrf.mxu1 }
 0xf2e   : > { %v3218_v7 = vadd.f32 %v3201_v51, %v3121_v24  ;;  %v3220_v3 = vadd.f32 %v3209_v58, %v3192_v14 }
 0xf2f   : > { %v3123_v22 = vpop.f32.mrf.mxu0  ;;  %v3194_v52 = vpop.f32.mrf.mxu1 }
 0xf30   : > { %v3700_v19 = vmul.f32 -1.442695, %v3218_v7  ;;  %v3219_v20 = vadd.f32 %v3205_v4, %v3123_v22  ;;  %v3221_v55 = vadd.f32 %v3213_v18, %v3194_v52 }
 0xf32   : > { %4127 = vpow2.f32 %v3700_v19  ;;  %v3701_v12 = vmul.f32 -1.442695, %v3219_v20  ;;  %v3702_v48 = vmul.f32 -1.442695, %v3221_v55 }
 0xf34   : > { %4129 = vpow2.f32 %v3701_v12 }
 0xf35   : > { %4131 = vpow2.f32 %v3702_v48 }
 0xf3f   : > { %v4128_v0 = vpop.eup %4127 }
 0xf40   : > { %v3225_v10 = vadd.f32 1.0, %v4128_v0 }
 0xf41   : > { %v4130_v15 = vpop.eup %4129 }
 0xf42   : > { %4133 = vrcp.f32 %v3225_v10  ;;  %v3231_v39 = vadd.f32 1.0, %v4130_v15  ;;  %v4132_v62 = vpop.eup %4131 }
 0xf43   : > { %4135 = vtanh.f32 %v3220_v3  ;;  %v3238_v2 = vadd.f32 1.0, %v4132_v62 }
 0xf44   : > { %4137 = vrcp.f32 %v3231_v39 }
 0xf45   : > { %4139 = vrcp.f32 %v3238_v2 }
 0xf4f   : > { %v4134_v13 = vpop.eup %4133 }
 0xf50   : > { %v4136_v47 = vpop.eup %4135 }
 0xf51   : > { %v4138_v44 = vpop.eup %4137  ;;  %v3242_v37 = vmul.f32 %v4136_v47, %v4134_v13 }
 0xf52   : > { %v3241_v6 = vmul.f32 %v4138_v44, %v6289_v57  ;;  %v4140_v43 = vpop.eup %4139 }
 0xf54   : > { %v3243_v27 = vadd.f32 %v3242_v37, %v3241_v6 }
 0xf56   : > { %4141 = vtanh.f32 %v3243_v27 }
 0xf63   : > { %v4142_v59 = vpop.eup %4141 }
 0xf64   : > { %v3245_v16 = vmul.f32 %v4142_v59, %v4140_v43 }
 0xf66   : > { %3703 = vst [vmem:[%s4660_s26 + $0x30] sm:$0xff] %v3245_v16  ;;  %3315 = vmatmul.mubr.f32.vlgmr.msra.gmra.mxu0 %v3245_v16  ;;  %3386 = vmatmul.mubr.f32.vlgmr.msra.gmra.mxu1 %v3245_v16 }
0x1026   : > { %v3316_v8 = vpop.f32.mrf.mxu0  ;;  %v3387_v57 = vpop.f32.mrf.mxu1 }
0x1027   : > { %v3413_v54 = vadd.f32 %v3396_v41, %v3316_v8  ;;  %v3415_v26 = vadd.f32 %v3404_v49, %v3387_v57 }
0x1028   : > { %v3318_v21 = vpop.f32.mrf.mxu0  ;;  %v3389_v61 = vpop.f32.mrf.mxu1 }
0x1029   : > { %v3705_v60 = vmul.f32 -1.442695, %v3413_v54  ;;  %v3414_v1 = vadd.f32 %v3400_v11, %v3318_v21  ;;  %v3416_v32 = vadd.f32 %v3408_v50, %v3389_v61 }
0x102b   : > { %4143 = vpow2.f32 %v3705_v60  ;;  %v3706_v9 = vmul.f32 -1.442695, %v3414_v1  ;;  %v3707_v17 = vmul.f32 -1.442695, %v3416_v32 }
0x102d   : > { %4145 = vpow2.f32 %v3706_v9 }
0x102e   : > { %4147 = vpow2.f32 %v3707_v17 }
0x1038   : > { %v4144_v25 = vpop.eup %4143 }
0x1039   : > { %v3420_v28 = vadd.f32 1.0, %v4144_v25 }
0x103a   : > { %v4146_v29 = vpop.eup %4145 }
0x103b   : > { %4149 = vrcp.f32 %v3420_v28  ;;  %v3426_v30 = vadd.f32 1.0, %v4146_v29  ;;  %v4148_v31 = vpop.eup %4147 }
0x103c   : > { %4151 = vtanh.f32 %v3415_v26  ;;  %v3433_v63 = vadd.f32 1.0, %v4148_v31 }
0x103d   : > { %4153 = vrcp.f32 %v3426_v30 }
0x103e   : > { %4155 = vrcp.f32 %v3433_v63 }
0x1048   : > { %v4150_v33 = vpop.eup %4149 }
0x1049   : > { %v4152_v34 = vpop.eup %4151 }
0x104a   : > { %v4154_v35 = vpop.eup %4153  ;;  %v3437_v36 = vmul.f32 %v4152_v34, %v4150_v33 }
0x104b   : > { %v3436_v38 = vmul.f32 %v4154_v35, %v3243_v27  ;;  %v4156_v5 = vpop.eup %4155 }
0x104d   : > { %v3438_v40 = vadd.f32 %v3437_v36, %v3436_v38 }
0x104f   : > { %4157 = vtanh.f32 %v3438_v40  ;;  %3444 = vst [vmem:[#allocation3] sm:$0xff] %v3438_v40 }
0x105c   : > { %v4158_v42 = vpop.eup %4157 }
0x105d   : > { %v3440_v45 = vmul.f32 %v4158_v42, %v4156_v5 }
0x105f   : > { %3708 = vst [vmem:[%s4660_s26 + $0x38] sm:$0xff] %v3440_v45  ;;  %3443 = vst [vmem:[#allocation2] sm:$0xff] %v3440_v45 }
0x1060 PF: > { %s3710_s22 = sadd.s32 4294967295, %s4433_s19  ;;  %s3463_s11 = sshll.u32 %s4660_s26, 4  ;;  %s6372_s11 = int_to_ptr.vmem [resolvable:$true] %s3463_s11 }
0x1061   : > { %p3454_p12 = scmp.gt.s32.totalorder %s3710_s22, 0  ;;  %s3446_s7 = scalar_lea.sflag [#allocation6], %s4642_s6 }
0x1062   : > { %s4331_s8 = scalar_lea.vmem %s6372_s11, 1024  ;;  %s4453_s19 = smov [#allocation12]  }
0x1063   : > { %s6923_s22 = smov (!%p3454_p12, %s3710_s22), 0  ;;  %p4332_p9 = scmp.ne.s32.totalorder %s6372_s11, %s4331_s8 }
0x1064   : > { %s3718_s27 = sshll.u32 %s6923_s22, 10  ;;  %s4335_s9 = sshll.u32 %s4453_s19, 4  ;;  %s4336_s9 = int_to_ptr.vmem [resolvable:$false] %s4335_s9 }
0x1065   : > { %s6377_s30 = scalar_lea.hbm %s6430_s4, %s3718_s27  ;;  %p4333_p8 = pnand %p4332_p9, %p4609_p4 }
0x1066   : > { %s4337_s10 = scalar_lea.vmem %s4336_s9, 2048  ;;  %p4338_p10 = scmp.lt.s32.totalorder %s6372_s11, %s4336_s9 }
0x1067   : > { %p4334_p3 = pneg %p4333_p8  ;;  %p4339_p11 = scmp.lt.s32.totalorder %s4337_s10, %s4331_s8 }
0x1069   : > { %p4340_p13 = por %p4339_p11, %p4338_p10 }
0x106b   : > { %p4341_p1 = pnand %p4340_p13, %p4334_p3 }
0x106d   : > { %4344 = shalt.err (!%p4341_p1)
}
0x106e   : > { %s4345_s5 = scalar_lea.hbm %s6377_s30, 1024  ;;  %s4349_s25 = scalar_lea.hbm %s6430_s4, 1024 }
0x106f   : > { %p4346_p2 = scmp.ne.s32.totalorder %s6377_s30, %s4345_s5  ;;  %p4350_p6 = scmp.lt.s32.totalorder %s6377_s30, %s6430_s4 }
0x1070   : > { %p4351_p12 = scmp.lt.s32.totalorder %s4349_s25, %s4345_s5 }
0x1071   : > { %p4347_p0 = pnand %p4346_p2, %p4609_p4 }
0x1072   : > { %p4352_p9 = por %p4351_p12, %p4350_p6 }
0x1073   : > { %p4348_p5 = pneg %p4347_p0 }
0x1075   : > { %p4353_p8 = pnand %p4352_p9, %p4348_p5 }
0x1077   : > { %4356 = shalt.err (!%p4353_p8)
}
0x1078   : > { %s4454_s22 = smov 128   ;;  %s4455_s27 = smov 8  }
0x1079   : > { %3731 = dma.vmem_to_hbm [thread:$0]  (%p4609_p4), %s6372_s11, 1024, %s6377_s30, %s3446_s7, %s4454_s22, %s4454_s22, %s4455_s27  }
0x107a PF: > { %s3478_s28 = sand.u32 1, %s4417_s15   ;;  %p6915_p3 = scmp.ge.s32.totalorder %s4441_s21, 2 }
0x107b   : > { %s3479_s29 = scalar_lea.sflag [#allocation6], %s3478_s28 }
0x107c   : > { %p3748_p10 = pnand %p6915_p3, %p4613_p7 }
0x107e   : > { %p3749_p11 = pneg %p3748_p10 }
0x1080   : > { %4410 = dma.done.wait (%p3749_p11), %s3479_s29, 1024  }
0x1081   : > { %4412 = vsyncadd (%p3749_p11), %s3479_s29, 4294966272  ;;  %s24_s21 = sadd.s32 1, %s4441_s21   ;;  %s6916_s15 = smov %s4421_s16 }
0x1082   : > { %p21_p13 = scmp.ge.s32.totalorder %s24_s21, 4   ;;  %s6411_s16 = smov 0  }
0x1083   : > { %s6917_s17 = smov %s4429_s18  ;;  %s6416_s18 = smov 0  }
0x1084   : > { %s6918_s19 = smov %s4437_s20  ;;  %s6919_s20 = smov %s6921_s12 }
0x1085   :  { %23 = sbr.rel (!%p21_p13) target bundleno = 10 (0xa), region = 139 }
0x108a   :  { %3484 = vsyncpa [#allocation5], 1 }
0x108b   :  { %3486 = vsyncpa [#allocation5 + $0x1], 1 }
0x108c   :  { %3487 = vsyncpa [#allocation8], 1 }
0x108d   :  { %3489 = vsyncpa [#allocation8 + $0x1], 1 }
0x108e   :  { %3490 = vsyncpa [#allocation11], 1 }
0x108f   :  { %3491 = vsyncpa [#allocation6], 1 }
0x1090   :  { %3493 = vsyncpa [#allocation6 + $0x1], 1 }

</bundles_post_ra>
